<compile_context>
chip_gen: v5e
topology: v5e:2x2
jax: 0.10.0
libtpu: 0.0.40
codegen_flags: <defaults>
</compile_context>

<pallas_src>
import numpy as np
import jax
import jax.numpy as jnp
from jax.experimental import pallas as pl
from jax.experimental.pallas import tpu as pltpu

OUT_H = 224
OUT_W = 224


def _bilinear_weight_matrix(in_size: int, out_size: int) -> np.ndarray:
    """Dense (out_size, in_size) bilinear interp matrix, half-pixel centers."""
    w = np.zeros((out_size, in_size), dtype=np.float32)
    scale = in_size / out_size
    for i in range(out_size):
        src = (i + 0.5) * scale - 0.5
        src = min(max(src, 0.0), in_size - 1.0)
        lo = int(np.floor(src))
        hi = min(lo + 1, in_size - 1)
        frac = src - lo
        w[i, lo] += 1.0 - frac
        w[i, hi] += frac
    return w


def _chip_info():
    """Returns (physical VMEM bytes per TensorCore, TensorCores per chip)."""
    try:
        kind = jax.devices()[0].device_kind.lower()
    except Exception:
        kind = ""
    n_tc = 2 if "7" in kind else 1          # v7x: 2 TCs/chip; v5e/v6e: 1
    vmem_phys = None
    try:
        vmem_phys = int(pltpu.get_tpu_info().vmem_capacity_bytes)
    except Exception:
        vmem_phys = None
    if not vmem_phys or vmem_phys <= 0:
        vmem_phys = (64 << 20) if "7" in kind else (128 << 20)
    return vmem_phys, n_tc


def _plan(n: int, h: int, w: int, itemsize: int):
    """Returns (imgs_per_step, h_first, vmem_limit_bytes) sized per generation."""
    vmem_phys, n_tc = _chip_info()
    h_first = h >= w
    out_img = 3 * OUT_H * OUT_W * 4                      # f32 output per image
    in_img = h * w * itemsize                            # raw input per image
    scratch_img = (OUT_H * w * 4) if h_first else (h * OUT_W * 4)
    # materialized f32 temporaries per image (batched dot result + subtract,
    # plus the f32 cast of the input block on the w-first path)
    temp_img = 2 * OUT_H * OUT_W * 4 + (0 if h_first else h * w * 4)
    per_img = 2 * (in_img + out_img) + scratch_img + temp_img   # double-buffered I/O
    weight_bytes = (OUT_H * h + w * OUT_W) * 4           # single-buffered residents
    headroom = 4 << 20                                   # compiler-internal scratch

    budget = (vmem_phys * 3) // 4                        # ~48 MiB v7x, ~96 MiB v5e/v6e
    max_b = 32 if budget >= (64 << 20) else 16
    b = int(max(1, min(n, max_b, (budget - weight_bytes - headroom) // per_img)))
    if n_tc > 1 and n >= n_tc:
        # Only multi-TensorCore chips benefit from keeping >= n_tc grid steps.
        b = min(b, pl.cdiv(n, n_tc))
    b = max(1, b)

    needed = weight_bytes + headroom + b * per_img
    vmem_limit = int(min(budget, max(32 << 20, needed + needed // 4)))
    return b, h_first, vmem_limit


def _make_transform_kernel(imgs_per_step: int, h: int, w: int, h_first: bool):
    """Kernel processing `imgs_per_step` grayscale images per grid step."""
    if h_first:
        # Contract H first (per image), then one batched W-contraction matmul.
        def kernel(x_ref, wh_ref, ww_ref, o_ref, t_ref):
            # x_ref : (B, H, W)  raw pixels in original dtype (e.g. uint8)
            # wh_ref: (224, H)   row-interpolation matrix
            # ww_ref: (W, 224)   col-interpolation matrix (transposed, scale folded)
            # o_ref : (B, 3, 224, 224)
            # t_ref : (B, 224, W) f32 scratch
            wh = wh_ref[...]

            def row_resize(b, carry):
                x = x_ref[b].astype(jnp.float32)                       # (H, W)
                t_ref[b] = jnp.dot(wh, x, preferred_element_type=jnp.float32)
                return carry

            jax.lax.fori_loop(0, imgs_per_step, row_resize, 0)
            # One large-M matmul for the column resize across all B images.
            t = t_ref[...].reshape(imgs_per_step * OUT_H, w)           # (B*224, W)
            y = jnp.dot(t, ww_ref[...], preferred_element_type=jnp.float32)
            # (x/255 - 0.5)/0.5 == x * (1/127.5) - 1 ; the scale lives in ww.
            y = y.reshape(imgs_per_step, OUT_H, OUT_W) - jnp.float32(1.0)
            # GrayscaleToRgb: replicate to 3 channels.
            o_ref[:, 0, :, :] = y
            o_ref[:, 1, :, :] = y
            o_ref[:, 2, :, :] = y
    else:
        # Contract W first (one batched matmul), then per-image H-contraction.
        def kernel(x_ref, wh_ref, ww_ref, o_ref, t_ref):
            # t_ref : (B, H, 224) f32 scratch
            x2 = x_ref[...].astype(jnp.float32).reshape(imgs_per_step * h, w)
            t = jnp.dot(x2, ww_ref[...], preferred_element_type=jnp.float32)
            t_ref[...] = t.reshape(imgs_per_step, h, OUT_W)
            wh = wh_ref[...]

            def col_to_out(b, carry):
                y = jnp.dot(wh, t_ref[b], preferred_element_type=jnp.float32)
                y = y - jnp.float32(1.0)
                o_ref[b] = jnp.broadcast_to(y[None], (3, OUT_H, OUT_W))
                return carry

            jax.lax.fori_loop(0, imgs_per_step, col_to_out, 0)

    return kernel


def general_transforms(x: jax.Array) -> jax.Array:
    """JAX/Pallas equivalent of GeneralTransforms.forward.

    Accepts (N, H, W) or (N, 1, H, W) in any dtype (uint8 preferred),
    returns (N, 3, 224, 224) float32.
    """
    if x.ndim == 3:
        x = x[:, None, :, :]
    assert x.ndim == 4 and x.shape[1] == 1, "expected grayscale NCHW input"
    n, _, h, w = x.shape
    # Keep the original dtype across the input DMA; cast to f32 on the VPU.
    x = x[:, 0]                                                          # (N, H, W)

    wh_np = _bilinear_weight_matrix(h, OUT_H)                            # (224, H)
    ww_np = _bilinear_weight_matrix(w, OUT_W).T * np.float32(1.0 / 127.5)  # (W, 224)
    wh = jnp.asarray(wh_np)
    ww = jnp.asarray(ww_np)

    imgs_per_step, h_first, vmem_limit = _plan(n, h, w, x.dtype.itemsize)
    n_steps = pl.cdiv(n, imgs_per_step)
    n_pad = n_steps * imgs_per_step
    if n_pad != n:
        x = jnp.pad(x, ((0, n_pad - n), (0, 0), (0, 0)))

    kernel = _make_transform_kernel(imgs_per_step, h, w, h_first)
    scratch_shape = (
        (imgs_per_step, OUT_H, w) if h_first else (imgs_per_step, h, OUT_W)
    )

    def _run(single_buffer_weights: bool):
        if single_buffer_weights:
            # Whole-array VMEM residents: single buffer, never re-DMA'd.
            wh_spec = pl.BlockSpec(memory_space=pltpu.MemorySpace.VMEM)
            ww_spec = pl.BlockSpec(memory_space=pltpu.MemorySpace.VMEM)
        else:
            wh_spec = pl.BlockSpec((OUT_H, h), lambda i: (0, 0))
            ww_spec = pl.BlockSpec((w, OUT_W), lambda i: (0, 0))
        return pl.pallas_call(
            kernel,
            out_shape=jax.ShapeDtypeStruct((n_pad, 3, OUT_H, OUT_W), jnp.float32),
            grid_spec=pltpu.PrefetchScalarGridSpec(
                num_scalar_prefetch=0,
                grid=(n_steps,),
                in_specs=[
                    pl.BlockSpec((imgs_per_step, h, w), lambda i: (i, 0, 0)),
                    wh_spec,
                    ww_spec,
                ],
                out_specs=pl.BlockSpec(
                    (imgs_per_step, 3, OUT_H, OUT_W), lambda i: (i, 0, 0, 0)
                ),
                scratch_shapes=[pltpu.VMEM(scratch_shape, jnp.float32)],
            ),
            compiler_params=pltpu.CompilerParams(
                dimension_semantics=("parallel",),
                vmem_limit_bytes=vmem_limit,
            ),
        )(x, wh, ww)

    try:
        out = _run(single_buffer_weights=True)
    except Exception:
        # Fall back to ordinary blocked (double-buffered) weight specs.
        out = _run(single_buffer_weights=False)

    if n_pad != n:
        out = out[:n]
    return out


if __name__ == "__main__":
    key = jax.random.PRNGKey(0)
    # Small grayscale images as raw uint8 pixel data (realistic input dtype).
    x = jax.random.randint(key, (2, 1, 16, 16), 0, 256, dtype=jnp.int32).astype(
        jnp.uint8
    )

    y = jax.block_until_ready(general_transforms(x))

    # Pure-JAX reference using the same separable bilinear weights.
    wh = jnp.asarray(_bilinear_weight_matrix(16, OUT_H))
    ww = jnp.asarray(_bilinear_weight_matrix(16, OUT_W))
    xf = x[:, 0].astype(jnp.float32)
    ref_1ch = jnp.einsum("oh,nhw,pw->nop", wh, xf / 255.0, ww)
    ref = (jnp.repeat(ref_1ch[:, None], 3, axis=1) - 0.5) / 0.5

    assert y.shape == (2, 3, 224, 224)
    assert float(jnp.max(jnp.abs(y - ref))) < 1e-4

    print("KERNEL_OK")
</pallas_src>

<mosaic_0001>
module attributes {stable_mosaic.version = 11 : i64} {
  func.func @kernel(%arg0: i32, %arg1: memref<2x16x16xi8, #tpu.memory_space<vmem>>, %arg2: memref<224x16xf32, #tpu.memory_space<vmem>>, %arg3: memref<16x224xf32, #tpu.memory_space<vmem>>, %arg4: memref<2x3x224x224xf32, #tpu.memory_space<vmem>>, %arg5: memref<2x224x16xf32, #tpu.memory_space<vmem>>) attributes {dimension_semantics = [#tpu.dimension_semantics<parallel>], iteration_bounds = array<i64: 1>, scalar_prefetch = 0 : i64, scratch_operands = 1 : i64, tpu.core_type = #tpu.core_type<tc>, window_params = [{transform_indices = @transform_0, window_bounds = array<i64: 2, 16, 16>}, {pipeline_mode = #tpu.pipeline_mode<synchronous>, transform_indices = @transform_1, window_bounds = array<i64: 224, 16>}, {pipeline_mode = #tpu.pipeline_mode<synchronous>, transform_indices = @transform_2, window_bounds = array<i64: 16, 224>}, {transform_indices = @transform_3, window_bounds = array<i64: 2, 3, 224, 224>}]} {
    %c0 = arith.constant 0 : index
    %c0_0 = arith.constant 0 : index
    %0 = vector.load %arg2[%c0, %c0_0] : memref<224x16xf32, #tpu.memory_space<vmem>>, vector<224x16xf32>
    %c0_i32 = arith.constant 0 : i32
    %c2_i32 = arith.constant 2 : i32
    %1 = arith.addi %c0_i32, %c2_i32 : i32
    %c1_i32 = arith.constant 1 : i32
    scf.for %arg6 = %c0_i32 to %1 step %c1_i32  : i32 {
      %18 = arith.index_cast %arg6 : i32 to index
      %c0_18 = arith.constant 0 : index
      %c0_19 = arith.constant 0 : index
      %19 = vector.load %arg1[%18, %c0_18, %c0_19] : memref<2x16x16xi8, #tpu.memory_space<vmem>>, vector<1x16x16xi8>
      %20 = vector.shape_cast %19 : vector<1x16x16xi8> to vector<16x16xi8>
      %21 = arith.uitofp %20 : vector<16x16xi8> to vector<16x16xf32>
      %cst_20 = arith.constant dense<0.000000e+00> : vector<224x16xf32>
      %22 = tpu.matmul %0, %21, %cst_20 {dimension_numbers = #tpu.dot_dimension_numbers<[1], [0], [0], [1], [0, 0, 1, 1], [], []>} : vector<224x16xf32>, vector<16x16xf32>, vector<224x16xf32> -> vector<224x16xf32>
      %23 = arith.index_cast %arg6 : i32 to index
      %c0_21 = arith.constant 0 : index
      %c0_22 = arith.constant 0 : index
      %24 = vector.load %arg5[%23, %c0_21, %c0_22] : memref<2x224x16xf32, #tpu.memory_space<vmem>>, vector<1x224x16xf32>
      %25 = vector.shape_cast %24 : vector<1x224x16xf32> to vector<224x16xf32>
      %26 = vector.shape_cast %22 : vector<224x16xf32> to vector<1x224x16xf32>
      tpu.vector_store %arg5[%23, %c0_21, %c0_22], %26 {strides = array<i32>} : memref<2x224x16xf32, #tpu.memory_space<vmem>>, vector<1x224x16xf32>,
    }
    %c2_i32_1 = arith.constant 2 : i32
    %c0_2 = arith.constant 0 : index
    %c0_3 = arith.constant 0 : index
    %c0_4 = arith.constant 0 : index
    %2 = vector.load %arg5[%c0_2, %c0_3, %c0_4] : memref<2x224x16xf32, #tpu.memory_space<vmem>>, vector<2x224x16xf32>
    %3 = vector.shape_cast %2 : vector<2x224x16xf32> to vector<448x16xf32>
    %c0_5 = arith.constant 0 : index
    %c0_6 = arith.constant 0 : index
    %4 = vector.load %arg3[%c0_5, %c0_6] : memref<16x224xf32, #tpu.memory_space<vmem>>, vector<16x224xf32>
    %cst = arith.constant dense<0.000000e+00> : vector<448x224xf32>
    %5 = tpu.matmul %3, %4, %cst {dimension_numbers = #tpu.dot_dimension_numbers<[1], [0], [0], [1], [0, 0, 1, 1], [], []>} : vector<448x16xf32>, vector<16x224xf32>, vector<448x224xf32> -> vector<448x224xf32>
    %6 = vector.shape_cast %5 : vector<448x224xf32> to vector<2x224x224xf32>
    %cst_7 = arith.constant 1.000000e+00 : f32
    %7 = vector.broadcast %cst_7 : f32 to vector<2x224x224xf32>
    %8 = arith.subf %6, %7 : vector<2x224x224xf32>
    %c0_8 = arith.constant 0 : index
    %c0_9 = arith.constant 0 : index
    %c0_10 = arith.constant 0 : index
    %c0_11 = arith.constant 0 : index
    %9 = vector.load %arg4[%c0_8, %c0_9, %c0_10, %c0_11] : memref<2x3x224x224xf32, #tpu.memory_space<vmem>>, vector<2x1x224x224xf32>
    %10 = vector.shape_cast %9 : vector<2x1x224x224xf32> to vector<2x224x224xf32>
    %11 = vector.shape_cast %8 : vector<2x224x224xf32> to vector<2x1x224x224xf32>
    tpu.vector_store %arg4[%c0_8, %c0_9, %c0_10, %c0_11], %11 {strides = array<i32>} : memref<2x3x224x224xf32, #tpu.memory_space<vmem>>, vector<2x1x224x224xf32>,
    %c0_12 = arith.constant 0 : index
    %c1 = arith.constant 1 : index
    %c0_13 = arith.constant 0 : index
    %c0_14 = arith.constant 0 : index
    %12 = vector.load %arg4[%c0_12, %c1, %c0_13, %c0_14] : memref<2x3x224x224xf32, #tpu.memory_space<vmem>>, vector<2x1x224x224xf32>
    %13 = vector.shape_cast %12 : vector<2x1x224x224xf32> to vector<2x224x224xf32>
    %14 = vector.shape_cast %8 : vector<2x224x224xf32> to vector<2x1x224x224xf32>
    tpu.vector_store %arg4[%c0_12, %c1, %c0_13, %c0_14], %14 {strides = array<i32>} : memref<2x3x224x224xf32, #tpu.memory_space<vmem>>, vector<2x1x224x224xf32>,
    %c0_15 = arith.constant 0 : index
    %c2 = arith.constant 2 : index
    %c0_16 = arith.constant 0 : index
    %c0_17 = arith.constant 0 : index
    %15 = vector.load %arg4[%c0_15, %c2, %c0_16, %c0_17] : memref<2x3x224x224xf32, #tpu.memory_space<vmem>>, vector<2x1x224x224xf32>
    %16 = vector.shape_cast %15 : vector<2x1x224x224xf32> to vector<2x224x224xf32>
    %17 = vector.shape_cast %8 : vector<2x224x224xf32> to vector<2x1x224x224xf32>
    tpu.vector_store %arg4[%c0_15, %c2, %c0_16, %c0_17], %17 {strides = array<i32>} : memref<2x3x224x224xf32, #tpu.memory_space<vmem>>, vector<2x1x224x224xf32>,
    return
  }
  func.func @transform_0(%arg0: i32) -> (i32, i32, i32) {
    %c0_i32 = arith.constant 0 : i32
    %c0_i32_0 = arith.constant 0 : i32
    %c0_i32_1 = arith.constant 0 : i32
    return %arg0, %c0_i32, %c0_i32_0 : i32, i32, i32
  }
  func.func @transform_1(%arg0: i32) -> (i32, i32) {
    %c0_i32 = arith.constant 0 : i32
    %c0_i32_0 = arith.constant 0 : i32
    %c0_i32_1 = arith.constant 0 : i32
    return %c0_i32, %c0_i32_0 : i32, i32
  }
  func.func @transform_2(%arg0: i32) -> (i32, i32) {
    %c0_i32 = arith.constant 0 : i32
    %c0_i32_0 = arith.constant 0 : i32
    %c0_i32_1 = arith.constant 0 : i32
    return %c0_i32, %c0_i32_0 : i32, i32
  }
  func.func @transform_3(%arg0: i32) -> (i32, i32, i32, i32) {
    %c0_i32 = arith.constant 0 : i32
    %c0_i32_0 = arith.constant 0 : i32
    %c0_i32_1 = arith.constant 0 : i32
    %c0_i32_2 = arith.constant 0 : i32
    return %arg0, %c0_i32, %c0_i32_0, %c0_i32_1 : i32, i32, i32, i32
  }
}

module attributes {stable_mosaic.version = 11 : i64} {
  func.func @kernel(%arg0: i32, %arg1: memref<2x16x16xi8, #tpu.memory_space<vmem>>, %arg2: memref<224x16xf32, #tpu.memory_space<vmem>>, %arg3: memref<16x224xf32, #tpu.memory_space<vmem>>, %arg4: memref<2x3x224x224xf32, #tpu.memory_space<vmem>>, %arg5: memref<2x224x16xf32, #tpu.memory_space<vmem>>) attributes {dimension_semantics = [#tpu.dimension_semantics<parallel>], iteration_bounds = array<i64: 1>, scalar_prefetch = 0 : i64, scratch_operands = 1 : i64, tpu.core_type = #tpu.core_type<tc>, window_params = [{transform_indices = @transform_0, window_bounds = array<i64: 2, 16, 16>}, {pipeline_mode = #tpu.pipeline_mode<synchronous>, transform_indices = @transform_1, window_bounds = array<i64: 224, 16>}, {pipeline_mode = #tpu.pipeline_mode<synchronous>, transform_indices = @transform_2, window_bounds = array<i64: 16, 224>}, {transform_indices = @transform_3, window_bounds = array<i64: 2, 3, 224, 224>}]} {
    %c0 = arith.constant 0 : index
    %c0_0 = arith.constant 0 : index
    %0 = vector.load %arg2[%c0, %c0_0] : memref<224x16xf32, #tpu.memory_space<vmem>>, vector<224x16xf32>
    %c0_i32 = arith.constant 0 : i32
    %c2_i32 = arith.constant 2 : i32
    %1 = arith.addi %c0_i32, %c2_i32 : i32
    %c1_i32 = arith.constant 1 : i32
    scf.for %arg6 = %c0_i32 to %1 step %c1_i32  : i32 {
      %18 = arith.index_cast %arg6 : i32 to index
      %c0_18 = arith.constant 0 : index
      %c0_19 = arith.constant 0 : index
      %19 = vector.load %arg1[%18, %c0_18, %c0_19] : memref<2x16x16xi8, #tpu.memory_space<vmem>>, vector<1x16x16xi8>
      %20 = vector.shape_cast %19 : vector<1x16x16xi8> to vector<16x16xi8>
      %21 = arith.uitofp %20 : vector<16x16xi8> to vector<16x16xf32>
      %cst_20 = arith.constant dense<0.000000e+00> : vector<224x16xf32>
      %22 = tpu.matmul %0, %21, %cst_20 {dimension_numbers = #tpu.dot_dimension_numbers<[1], [0], [0], [1], [0, 0, 1, 1], [], []>} : vector<224x16xf32>, vector<16x16xf32>, vector<224x16xf32> -> vector<224x16xf32>
      %23 = arith.index_cast %arg6 : i32 to index
      %c0_21 = arith.constant 0 : index
      %c0_22 = arith.constant 0 : index
      %24 = vector.load %arg5[%23, %c0_21, %c0_22] : memref<2x224x16xf32, #tpu.memory_space<vmem>>, vector<1x224x16xf32>
      %25 = vector.shape_cast %24 : vector<1x224x16xf32> to vector<224x16xf32>
      %26 = vector.shape_cast %22 : vector<224x16xf32> to vector<1x224x16xf32>
      tpu.vector_store %arg5[%23, %c0_21, %c0_22], %26 {strides = array<i32>} : memref<2x224x16xf32, #tpu.memory_space<vmem>>, vector<1x224x16xf32>,
    }
    %c2_i32_1 = arith.constant 2 : i32
    %c0_2 = arith.constant 0 : index
    %c0_3 = arith.constant 0 : index
    %c0_4 = arith.constant 0 : index
    %2 = vector.load %arg5[%c0_2, %c0_3, %c0_4] : memref<2x224x16xf32, #tpu.memory_space<vmem>>, vector<2x224x16xf32>
    %3 = vector.shape_cast %2 : vector<2x224x16xf32> to vector<448x16xf32>
    %c0_5 = arith.constant 0 : index
    %c0_6 = arith.constant 0 : index
    %4 = vector.load %arg3[%c0_5, %c0_6] : memref<16x224xf32, #tpu.memory_space<vmem>>, vector<16x224xf32>
    %cst = arith.constant dense<0.000000e+00> : vector<448x224xf32>
    %5 = tpu.matmul %3, %4, %cst {dimension_numbers = #tpu.dot_dimension_numbers<[1], [0], [0], [1], [0, 0, 1, 1], [], []>} : vector<448x16xf32>, vector<16x224xf32>, vector<448x224xf32> -> vector<448x224xf32>
    %6 = vector.shape_cast %5 : vector<448x224xf32> to vector<2x224x224xf32>
    %cst_7 = arith.constant 1.000000e+00 : f32
    %7 = vector.broadcast %cst_7 : f32 to vector<2x224x224xf32>
    %8 = arith.subf %6, %7 : vector<2x224x224xf32>
    %c0_8 = arith.constant 0 : index
    %c0_9 = arith.constant 0 : index
    %c0_10 = arith.constant 0 : index
    %c0_11 = arith.constant 0 : index
    %9 = vector.load %arg4[%c0_8, %c0_9, %c0_10, %c0_11] : memref<2x3x224x224xf32, #tpu.memory_space<vmem>>, vector<2x1x224x224xf32>
    %10 = vector.shape_cast %9 : vector<2x1x224x224xf32> to vector<2x224x224xf32>
    %11 = vector.shape_cast %8 : vector<2x224x224xf32> to vector<2x1x224x224xf32>
    tpu.vector_store %arg4[%c0_8, %c0_9, %c0_10, %c0_11], %11 {strides = array<i32>} : memref<2x3x224x224xf32, #tpu.memory_space<vmem>>, vector<2x1x224x224xf32>,
    %c0_12 = arith.constant 0 : index
    %c1 = arith.constant 1 : index
    %c0_13 = arith.constant 0 : index
    %c0_14 = arith.constant 0 : index
    %12 = vector.load %arg4[%c0_12, %c1, %c0_13, %c0_14] : memref<2x3x224x224xf32, #tpu.memory_space<vmem>>, vector<2x1x224x224xf32>
    %13 = vector.shape_cast %12 : vector<2x1x224x224xf32> to vector<2x224x224xf32>
    %14 = vector.shape_cast %8 : vector<2x224x224xf32> to vector<2x1x224x224xf32>
    tpu.vector_store %arg4[%c0_12, %c1, %c0_13, %c0_14], %14 {strides = array<i32>} : memref<2x3x224x224xf32, #tpu.memory_space<vmem>>, vector<2x1x224x224xf32>,
    %c0_15 = arith.constant 0 : index
    %c2 = arith.constant 2 : index
    %c0_16 = arith.constant 0 : index
    %c0_17 = arith.constant 0 : index
    %15 = vector.load %arg4[%c0_15, %c2, %c0_16, %c0_17] : memref<2x3x224x224xf32, #tpu.memory_space<vmem>>, vector<2x1x224x224xf32>
    %16 = vector.shape_cast %15 : vector<2x1x224x224xf32> to vector<2x224x224xf32>
    %17 = vector.shape_cast %8 : vector<2x224x224xf32> to vector<2x1x224x224xf32>
    tpu.vector_store %arg4[%c0_15, %c2, %c0_16, %c0_17], %17 {strides = array<i32>} : memref<2x3x224x224xf32, #tpu.memory_space<vmem>>, vector<2x1x224x224xf32>,
    return
  }
  func.func @transform_0(%arg0: i32) -> (i32, i32, i32) {
    %c0_i32 = arith.constant 0 : i32
    %c0_i32_0 = arith.constant 0 : i32
    %c0_i32_1 = arith.constant 0 : i32
    return %arg0, %c0_i32, %c0_i32_0 : i32, i32, i32
  }
  func.func @transform_1(%arg0: i32) -> (i32, i32) {
    %c0_i32 = arith.constant 0 : i32
    %c0_i32_0 = arith.constant 0 : i32
    %c0_i32_1 = arith.constant 0 : i32
    return %c0_i32, %c0_i32_0 : i32, i32
  }
  func.func @transform_2(%arg0: i32) -> (i32, i32) {
    %c0_i32 = arith.constant 0 : i32
    %c0_i32_0 = arith.constant 0 : i32
    %c0_i32_1 = arith.constant 0 : i32
    return %c0_i32, %c0_i32_0 : i32, i32
  }
  func.func @transform_3(%arg0: i32) -> (i32, i32, i32, i32) {
    %c0_i32 = arith.constant 0 : i32
    %c0_i32_0 = arith.constant 0 : i32
    %c0_i32_1 = arith.constant 0 : i32
    %c0_i32_2 = arith.constant 0 : i32
    return %arg0, %c0_i32, %c0_i32_0, %c0_i32_1 : i32, i32, i32, i32
  }
}

</mosaic_0001>

<bundles_post_ra>
// kernel: tpu_custom_call.1
= control target key start
LH: loop header
LB: loop body
LE: loop exit
PB: predicated region body
PF: predicated region fallthrough
CT: control target
= control target key end

     0   :  { %8 = vsyncpa [#allocation4], 0  ;;  %s2343_s0 = inlined_call_operand.hbm [shape: u8[2,16,16], index: 0, kind: input, shape index: {}]   ;;  %s2344_s1 = inlined_call_operand.vmem [shape: f32[224,16], index: 1, kind: input, shape index: {}]   ;;  %s2345_s2 = inlined_call_operand.hbm [shape: f32[16,224], index: 2, kind: input, shape index: {}]   ;;  %s2346_s3 = inlined_call_operand.hbm [shape: f32[2,3,224,224], index: 3, kind: output, shape index: {}]  }
   0x1   :  { %9 = vsyncpa [#allocation7], 0 }
   0x2   :  { %10 = vsyncpa [#allocation5], 0  ;;  %s15_s14 = sshll.u32 %s2343_s0, 4  ;;  %s1757_s15 = smov [#allocation3]   ;;  %s16_s14 = int_to_ptr.hbm [resolvable:$true] %s15_s14 }
   0x3   :  { %s17_s16 = sshll.u32 %s1757_s15, 4  ;;  %s30_s19 = sshll.u32 %s2345_s2, 4  ;;  %s18_s16 = int_to_ptr.vmem [resolvable:$true] %s17_s16  ;;  %s31_s19 = int_to_ptr.hbm [resolvable:$true] %s30_s19 }
   0x4   :  { %s1758_s20 = smov 32   ;;  %s1759_s21 = smov 2  }
   0x5   :  { %23 = dma.hbm_to_vmem [thread:$0]  %s16_s14, 128, %s18_s16, [#allocation4], %s1758_s20, %s1758_s20, %s1759_s21  }
   0x6   :  { %s1760_s22 = smov [#allocation6]   ;;  %s1761_s24 = smov 256  }
   0x7   :  { %s32_s23 = sshll.u32 %s1760_s22, 4  ;;  %s1762_s25 = smov 16   ;;  %s33_s23 = int_to_ptr.vmem [resolvable:$true] %s32_s23 }
   0x8   :  { %38 = dma.hbm_to_vmem [thread:$0]  %s31_s19, 512, %s33_s23, [#allocation7], %s1761_s24, %s1761_s24, %s1762_s25  }
   0x9   :  { %1747 = dma.done.wait [#allocation4], 128  }
   0xa   :  { %1748 = vsyncadd [#allocation4], 4294967168 }
   0xb   :  { %1749 = dma.done.wait [#allocation7], 512  }
   0xc   :  { %1750 = vsyncadd [#allocation7], 4294966784  ;;  %v1796_v0 = vld [vmem:[%s2344_s1] sm:$0xff]  ;;  %v1801_v1 = vld [vmem:[%s2344_s1 + $0x8] sm:$0xff]  ;;  %s1933_s2 = smov 0  }
   0xd   :  { %v1806_v2 = vld [vmem:[%s2344_s1 + $0x10] sm:$0xff]  ;;  %v1811_v3 = vld [vmem:[%s2344_s1 + $0x18] sm:$0xff]  ;;  %v1816_v4 = vld [vmem:[%s2344_s1 + $0x20] sm:$0xff] }
   0xe   :  { %v1821_v5 = vld [vmem:[%s2344_s1 + $0x28] sm:$0xff]  ;;  %v1826_v6 = vld [vmem:[%s2344_s1 + $0x30] sm:$0xff]  ;;  %v1831_v7 = vld [vmem:[%s2344_s1 + $0x38] sm:$0xff] }
   0xf   :  { %v1836_v8 = vld [vmem:[%s2344_s1 + $0x40] sm:$0xff]  ;;  %v1841_v9 = vld [vmem:[%s2344_s1 + $0x48] sm:$0xff]  ;;  %v1846_v10 = vld [vmem:[%s2344_s1 + $0x50] sm:$0xff] }
  0x10   :  { %v1851_v11 = vld [vmem:[%s2344_s1 + $0x58] sm:$0xff]  ;;  %v1856_v12 = vld [vmem:[%s2344_s1 + $0x60] sm:$0xff]  ;;  %v1861_v13 = vld [vmem:[%s2344_s1 + $0x68] sm:$0xff] }
  0x11   :  { %v1866_v14 = vld [vmem:[%s2344_s1 + $0x70] sm:$0xff]  ;;  %v1871_v15 = vld [vmem:[%s2344_s1 + $0x78] sm:$0xff]  ;;  %v1876_v16 = vld [vmem:[%s2344_s1 + $0x80] sm:$0xff] }
  0x12   :  { %v1881_v17 = vld [vmem:[%s2344_s1 + $0x88] sm:$0xff]  ;;  %v1886_v18 = vld [vmem:[%s2344_s1 + $0x90] sm:$0xff]  ;;  %v1891_v19 = vld [vmem:[%s2344_s1 + $0x98] sm:$0xff] }
  0x13   :  { %v1896_v20 = vld [vmem:[%s2344_s1 + $0xa0] sm:$0xff]  ;;  %v1901_v21 = vld [vmem:[%s2344_s1 + $0xa8] sm:$0xff]  ;;  %v1906_v22 = vld [vmem:[%s2344_s1 + $0xb0] sm:$0xff] }
  0x14   :  { %v1911_v23 = vld [vmem:[%s2344_s1 + $0xb8] sm:$0xff]  ;;  %v1916_v24 = vld [vmem:[%s2344_s1 + $0xc0] sm:$0xff]  ;;  %v1921_v25 = vld [vmem:[%s2344_s1 + $0xc8] sm:$0xff] }
  0x15   :  { %v1926_v26 = vld [vmem:[%s2344_s1 + $0xd0] sm:$0xff]  ;;  %v1931_v27 = vld [vmem:[%s2344_s1 + $0xd8] sm:$0xff] }
  0x16 LB: > { %s1641_s27 = sshll.u32 %s1755_s2, 2  ;;  %vm92_vm0 = vcmask 130048   ;;  %s278_s1 = smul.u32 224, %s1755_s2  ;;  %s1755_s2 = sphi %s1933_s2, %s80_s2  }
  0x17   : > { %s83_s28 = scalar_lea.vmem [#allocation3], %s1641_s27  ;;  %s80_s2 = sadd.s32 1, %s1755_s2  }
  0x18   : > { %v1643_v28 = vld [vmem:[%s83_s28] sm:$0xf]   ;;  %s1996_s29 = scalar_lea.vmem [#allocation2], %s278_s1  ;;  %p77_p0 = scmp.ge.s32.totalorder %s80_s2, 2  }
  0x19   : > { %v1645_v29 = vunpack.c.1.s8 %v1643_v28  ;;  %v1644_v30 = vunpack.c.0.s8 %v1643_v28  ;;  %v366_v63 = vld [vmem:[#allocation6 + $0x10] sm:$0xff] (%p77_p0)  ;;  %v367_v28 = vld [vmem:[#allocation6 + $0x18] sm:$0xff] (%p77_p0)  ;;  %vm1020_vm1 = vcmask (%p77_p0), 785408   ;;  %s1763_s30 = smov (%p77_p0), [#allocation8]   ;;  %s1364_s7 = sshll.u32 (%p77_p0), %s2346_s3, 4  ;;  %s1365_s7 = int_to_ptr.hbm [resolvable:$true] %s1364_s7 }
  0x1a   :  { %s1362_s4 = sshll.u32 (%p77_p0), %s1763_s30, 4  ;;  %s1363_s4 = int_to_ptr.vmem [resolvable:$true] %s1362_s4 }
  0x1b   : > { %v89_v31 = vand.u32 255, %v1645_v29  ;;  %v88_v32 = vand.u32 255, %v1644_v30  ;;  %v364_v29 = vld [vmem:[#allocation6] sm:$0xff] (%p77_p0)  ;;  %v365_v30 = vld [vmem:[#allocation6 + $0x8] sm:$0xff] (%p77_p0) }
  0x1d   : > { %v91_v33 = vcvt.s32.f32 %v89_v31  ;;  %v90_v34 = vcvt.s32.f32 %v88_v32 }
  0x1f   : > { %1647 = vmatpush.msra.mxu2 %v91_v33  ;;  %1648 = vmatpush.msra.mxu3 %v91_v33 }
  0x20   : > { %191 = vmatpush.msra.mxu0 %v91_v33  ;;  %1646 = vmatpush.msra.mxu1 %v91_v33 }
  0x21   : > { %1650 = vmatpush.msra.mxu2 %v90_v34  ;;  %1651 = vmatpush.msra.mxu3 %v90_v34 }
  0x22   : > { %1403 = vmatmul.msk.f32.vlgmr.msra.gmra.mxu2 %vm92_vm0, %v1866_v14  ;;  %1410 = vmatmul.msk.f32.vlgmr.msra.gmra.mxu3 %vm92_vm0, %v1901_v21 }
  0x23   : > { %192 = vmatpush.msra.mxu0 %v90_v34  ;;  %1649 = vmatpush.msra.mxu1 %v90_v34 }
  0x24   : > { %1389 = vmatmul.msk.f32.vlgmr.msra.gmra.mxu0 %vm92_vm0, %v1796_v0  ;;  %1396 = vmatmul.msk.f32.vlgmr.msra.gmra.mxu1 %vm92_vm0, %v1831_v7 }
  0x25   :  { %1652 = vmatpush.msra.mxu2 (%p77_p0), %v366_v63  ;;  %1654 = vmatpush.msra.mxu3 (%p77_p0), %v367_v28 }
  0x26   :  { %551 = vmatpush.msra.mxu0 (%p77_p0), %v366_v63  ;;  %736 = vmatpush.msra.mxu1 (%p77_p0), %v367_v28 }
  0x27   :  { %1653 = vmatpush.msra.mxu2 (%p77_p0), %v364_v29  ;;  %1655 = vmatpush.msra.mxu3 (%p77_p0), %v365_v30 }
  0x28   :  { %552 = vmatpush.msra.mxu0 (%p77_p0), %v364_v29  ;;  %737 = vmatpush.msra.mxu1 (%p77_p0), %v365_v30 }
  0x2a   : > { %1404 = vmatmul.msk.f32.gmra.mxu2 %vm92_vm0, %v1871_v15  ;;  %1411 = vmatmul.msk.f32.gmra.mxu3 %vm92_vm0, %v1906_v22 }
  0x2c   : > { %1390 = vmatmul.msk.f32.gmra.mxu0 %vm92_vm0, %v1801_v1  ;;  %1397 = vmatmul.msk.f32.gmra.mxu1 %vm92_vm0, %v1836_v8 }
  0x32   : > { %1405 = vmatmul.msk.f32.gmra.mxu2 %vm92_vm0, %v1876_v16  ;;  %1412 = vmatmul.msk.f32.gmra.mxu3 %vm92_vm0, %v1911_v23 }
  0x34   : > { %1391 = vmatmul.msk.f32.gmra.mxu0 %vm92_vm0, %v1806_v2  ;;  %1398 = vmatmul.msk.f32.gmra.mxu1 %vm92_vm0, %v1841_v9 }
  0x3a   : > { %1406 = vmatmul.msk.f32.gmra.mxu2 %vm92_vm0, %v1881_v17  ;;  %1413 = vmatmul.msk.f32.gmra.mxu3 %vm92_vm0, %v1916_v24 }
  0x3c   : > { %1392 = vmatmul.msk.f32.gmra.mxu0 %vm92_vm0, %v1811_v3  ;;  %1399 = vmatmul.msk.f32.gmra.mxu1 %vm92_vm0, %v1846_v10 }
  0x42   : > { %1407 = vmatmul.msk.f32.gmra.mxu2 %vm92_vm0, %v1886_v18  ;;  %1414 = vmatmul.msk.f32.gmra.mxu3 %vm92_vm0, %v1921_v25 }
  0x44   : > { %1393 = vmatmul.msk.f32.gmra.mxu0 %vm92_vm0, %v1816_v4  ;;  %1400 = vmatmul.msk.f32.gmra.mxu1 %vm92_vm0, %v1851_v11 }
  0x4a   : > { %1408 = vmatmul.msk.f32.gmra.mxu2 %vm92_vm0, %v1891_v19  ;;  %1415 = vmatmul.msk.f32.gmra.mxu3 %vm92_vm0, %v1926_v26 }
  0x4c   : > { %1394 = vmatmul.msk.f32.gmra.mxu0 %vm92_vm0, %v1821_v5  ;;  %1401 = vmatmul.msk.f32.gmra.mxu1 %vm92_vm0, %v1856_v12 }
  0x52   : > { %1409 = vmatmul.msk.f32.gmra.mxu2 %vm92_vm0, %v1896_v20  ;;  %1416 = vmatmul.msk.f32.gmra.mxu3 %vm92_vm0, %v1931_v27 }
  0x54   : > { %1395 = vmatmul.msk.f32.gmra.mxu0 %vm92_vm0, %v1826_v6  ;;  %1402 = vmatmul.msk.f32.gmra.mxu1 %vm92_vm0, %v1861_v13 }
  0xa1   : > { %v194_v35 = vpop.f32.mrf.mxu0  ;;  %v215_v36 = vpop.f32.mrf.mxu1 }
  0xa2   : > { %280 = vst.msk [vmem:[%s1996_s29] sm:$0xff] %vm92_vm0, %v194_v35 }
  0xa3   : > { %287 = vst.msk [vmem:[%s1996_s29 + $0x38] sm:$0xff] %vm92_vm0, %v215_v36 }
  0xa5   : > { %v236_v37 = vpop.f32.mrf.mxu2  ;;  %v257_v38 = vpop.f32.mrf.mxu3 }
  0xa6   : > { %294 = vst.msk [vmem:[%s1996_s29 + $0x70] sm:$0xff] %vm92_vm0, %v236_v37 }
  0xa7   : > { %301 = vst.msk [vmem:[%s1996_s29 + $0xa8] sm:$0xff] %vm92_vm0, %v257_v38 }
  0xa9   : > { %v197_v39 = vpop.f32.mrf.mxu0  ;;  %v218_v40 = vpop.f32.mrf.mxu1 }
  0xaa   : > { %281 = vst.msk [vmem:[%s1996_s29 + $0x8] sm:$0xff] %vm92_vm0, %v197_v39 }
  0xab   : > { %288 = vst.msk [vmem:[%s1996_s29 + $0x40] sm:$0xff] %vm92_vm0, %v218_v40 }
  0xad   : > { %v239_v41 = vpop.f32.mrf.mxu2  ;;  %v260_v42 = vpop.f32.mrf.mxu3 }
  0xae   : > { %295 = vst.msk [vmem:[%s1996_s29 + $0x78] sm:$0xff] %vm92_vm0, %v239_v41 }
  0xaf   : > { %302 = vst.msk [vmem:[%s1996_s29 + $0xb0] sm:$0xff] %vm92_vm0, %v260_v42 }
  0xb1   : > { %v200_v43 = vpop.f32.mrf.mxu0  ;;  %v221_v44 = vpop.f32.mrf.mxu1 }
  0xb2   : > { %282 = vst.msk [vmem:[%s1996_s29 + $0x10] sm:$0xff] %vm92_vm0, %v200_v43 }
  0xb3   : > { %289 = vst.msk [vmem:[%s1996_s29 + $0x48] sm:$0xff] %vm92_vm0, %v221_v44 }
  0xb5   : > { %v242_v45 = vpop.f32.mrf.mxu2  ;;  %v263_v46 = vpop.f32.mrf.mxu3 }
  0xb6   : > { %296 = vst.msk [vmem:[%s1996_s29 + $0x80] sm:$0xff] %vm92_vm0, %v242_v45 }
  0xb7   : > { %303 = vst.msk [vmem:[%s1996_s29 + $0xb8] sm:$0xff] %vm92_vm0, %v263_v46 }
  0xb9   : > { %v203_v47 = vpop.f32.mrf.mxu0  ;;  %v224_v48 = vpop.f32.mrf.mxu1 }
  0xba   : > { %283 = vst.msk [vmem:[%s1996_s29 + $0x18] sm:$0xff] %vm92_vm0, %v203_v47 }
  0xbb   : > { %290 = vst.msk [vmem:[%s1996_s29 + $0x50] sm:$0xff] %vm92_vm0, %v224_v48 }
  0xbd   : > { %v245_v49 = vpop.f32.mrf.mxu2  ;;  %v266_v50 = vpop.f32.mrf.mxu3 }
  0xbe   : > { %297 = vst.msk [vmem:[%s1996_s29 + $0x88] sm:$0xff] %vm92_vm0, %v245_v49 }
  0xbf   : > { %304 = vst.msk [vmem:[%s1996_s29 + $0xc0] sm:$0xff] %vm92_vm0, %v266_v50 }
  0xc1   : > { %v206_v51 = vpop.f32.mrf.mxu0  ;;  %v227_v52 = vpop.f32.mrf.mxu1 }
  0xc2   : > { %284 = vst.msk [vmem:[%s1996_s29 + $0x20] sm:$0xff] %vm92_vm0, %v206_v51 }
  0xc3   : > { %291 = vst.msk [vmem:[%s1996_s29 + $0x58] sm:$0xff] %vm92_vm0, %v227_v52 }
  0xc5   : > { %v248_v53 = vpop.f32.mrf.mxu2  ;;  %v269_v54 = vpop.f32.mrf.mxu3 }
  0xc6   : > { %298 = vst.msk [vmem:[%s1996_s29 + $0x90] sm:$0xff] %vm92_vm0, %v248_v53 }
  0xc7   : > { %305 = vst.msk [vmem:[%s1996_s29 + $0xc8] sm:$0xff] %vm92_vm0, %v269_v54 }
  0xc9   : > { %v209_v55 = vpop.f32.mrf.mxu0  ;;  %v230_v56 = vpop.f32.mrf.mxu1 }
  0xca   : > { %285 = vst.msk [vmem:[%s1996_s29 + $0x28] sm:$0xff] %vm92_vm0, %v209_v55 }
  0xcb   : > { %292 = vst.msk [vmem:[%s1996_s29 + $0x60] sm:$0xff] %vm92_vm0, %v230_v56 }
  0xcd   : > { %v251_v57 = vpop.f32.mrf.mxu2  ;;  %v272_v58 = vpop.f32.mrf.mxu3 }
  0xce   : > { %299 = vst.msk [vmem:[%s1996_s29 + $0x98] sm:$0xff] %vm92_vm0, %v251_v57 }
  0xcf   : > { %306 = vst.msk [vmem:[%s1996_s29 + $0xd0] sm:$0xff] %vm92_vm0, %v272_v58 }
  0xd1   : > { %v212_v59 = vpop.f32.mrf.mxu0  ;;  %v233_v60 = vpop.f32.mrf.mxu1 }
  0xd2   : > { %286 = vst.msk [vmem:[%s1996_s29 + $0x30] sm:$0xff] %vm92_vm0, %v212_v59 }
  0xd3   : > { %293 = vst.msk [vmem:[%s1996_s29 + $0x68] sm:$0xff] %vm92_vm0, %v233_v60  ;;  %79 = sbr.rel (!%p77_p0) target bundleno = 22 (0x16), region = 51 }
  0xd5   : > { %v254_v61 = vpop.f32.mrf.mxu2  ;;  %v275_v62 = vpop.f32.mrf.mxu3 }
  0xd6   : > { %300 = vst.msk [vmem:[%s1996_s29 + $0xa0] sm:$0xff] %vm92_vm0, %v254_v61 }
  0xd7   : > { %307 = vst.msk [vmem:[%s1996_s29 + $0xd8] sm:$0xff] %vm92_vm0, %v275_v62 }
  0xde   :  { %v336_v31 = vld [vmem:[#allocation2 + $0xe0] sm:$0xff]  ;;  %v337_v0 = vld [vmem:[#allocation2 + $0xe8] sm:$0xff]  ;;  %v338_v2 = vld [vmem:[#allocation2 + $0xf0] sm:$0xff] }
  0xdf   :  { %v308_v32 = vld [vmem:[#allocation2] sm:$0xff]  ;;  %1445 = vmatmul.msk.f32.vlgmr.msra.gmra.mxu2 %vm92_vm0, %v336_v31  ;;  %1501 = vmatmul.msk.f32.vlgmr.msra.gmra.mxu3 %vm92_vm0, %v336_v31  ;;  %v309_v1 = vld [vmem:[#allocation2 + $0x8] sm:$0xff]  ;;  %v310_v3 = vld [vmem:[#allocation2 + $0x10] sm:$0xff] }
  0xe0   :  { %1417 = vmatmul.msk.f32.vlgmr.msra.gmra.mxu0 %vm92_vm0, %v308_v32  ;;  %1473 = vmatmul.msk.f32.vlgmr.msra.gmra.mxu1 %vm92_vm0, %v308_v32  ;;  %v339_v4 = vld [vmem:[#allocation2 + $0xf8] sm:$0xff]  ;;  %v340_v6 = vld [vmem:[#allocation2 + $0x100] sm:$0xff]  ;;  %v341_v8 = vld [vmem:[#allocation2 + $0x108] sm:$0xff] }
  0xe1   :  { %v311_v5 = vld [vmem:[#allocation2 + $0x18] sm:$0xff]  ;;  %v312_v7 = vld [vmem:[#allocation2 + $0x20] sm:$0xff]  ;;  %v313_v9 = vld [vmem:[#allocation2 + $0x28] sm:$0xff] }
  0xe2   :  { %v342_v10 = vld [vmem:[#allocation2 + $0x110] sm:$0xff]  ;;  %v343_v12 = vld [vmem:[#allocation2 + $0x118] sm:$0xff]  ;;  %v344_v14 = vld [vmem:[#allocation2 + $0x120] sm:$0xff] }
  0xe3   :  { %v314_v11 = vld [vmem:[#allocation2 + $0x30] sm:$0xff]  ;;  %v315_v13 = vld [vmem:[#allocation2 + $0x38] sm:$0xff]  ;;  %v316_v15 = vld [vmem:[#allocation2 + $0x40] sm:$0xff] }
  0xe4   :  { %v345_v16 = vld [vmem:[#allocation2 + $0x128] sm:$0xff]  ;;  %v346_v18 = vld [vmem:[#allocation2 + $0x130] sm:$0xff]  ;;  %v347_v20 = vld [vmem:[#allocation2 + $0x138] sm:$0xff] }
  0xe5   :  { %v317_v17 = vld [vmem:[#allocation2 + $0x48] sm:$0xff]  ;;  %v318_v19 = vld [vmem:[#allocation2 + $0x50] sm:$0xff]  ;;  %v319_v21 = vld [vmem:[#allocation2 + $0x58] sm:$0xff] }
  0xe6   :  { %v348_v22 = vld [vmem:[#allocation2 + $0x140] sm:$0xff]  ;;  %v349_v24 = vld [vmem:[#allocation2 + $0x148] sm:$0xff]  ;;  %v350_v26 = vld [vmem:[#allocation2 + $0x150] sm:$0xff] }
  0xe7   :  { %1446 = vmatmul.msk.f32.gmra.mxu2 %vm92_vm0, %v337_v0  ;;  %1502 = vmatmul.msk.f32.gmra.mxu3 %vm92_vm0, %v337_v0  ;;  %v320_v23 = vld [vmem:[#allocation2 + $0x60] sm:$0xff]  ;;  %v321_v25 = vld [vmem:[#allocation2 + $0x68] sm:$0xff]  ;;  %v322_v27 = vld [vmem:[#allocation2 + $0x70] sm:$0xff] }
  0xe8   :  { %1418 = vmatmul.msk.f32.gmra.mxu0 %vm92_vm0, %v309_v1  ;;  %1474 = vmatmul.msk.f32.gmra.mxu1 %vm92_vm0, %v309_v1  ;;  %v351_v33 = vld [vmem:[#allocation2 + $0x158] sm:$0xff]  ;;  %v352_v35 = vld [vmem:[#allocation2 + $0x160] sm:$0xff]  ;;  %v353_v44 = vld [vmem:[#allocation2 + $0x168] sm:$0xff] }
  0xe9   :  { %v323_v34 = vld [vmem:[#allocation2 + $0x78] sm:$0xff]  ;;  %v324_v38 = vld [vmem:[#allocation2 + $0x80] sm:$0xff]  ;;  %v325_v47 = vld [vmem:[#allocation2 + $0x88] sm:$0xff] }
  0xea   :  { %v354_v52 = vld [vmem:[#allocation2 + $0x170] sm:$0xff]  ;;  %v355_v58 = vld [vmem:[#allocation2 + $0x178] sm:$0xff]  ;;  %v356_v30 = vld [vmem:[#allocation2 + $0x180] sm:$0xff] }
  0xeb   :  { %v326_v53 = vld [vmem:[#allocation2 + $0x90] sm:$0xff]  ;;  %v327_v61 = vld [vmem:[#allocation2 + $0x98] sm:$0xff]  ;;  %v328_v0 = vld [vmem:[#allocation2 + $0xa0] sm:$0xff] }
  0xef   :  { %1447 = vmatmul.msk.f32.gmra.mxu2 %vm92_vm0, %v338_v2  ;;  %1503 = vmatmul.msk.f32.gmra.mxu3 %vm92_vm0, %v338_v2 }
  0xf0   :  { %1419 = vmatmul.msk.f32.gmra.mxu0 %vm92_vm0, %v310_v3  ;;  %1475 = vmatmul.msk.f32.gmra.mxu1 %vm92_vm0, %v310_v3 }
  0xf7   :  { %1448 = vmatmul.msk.f32.gmra.mxu2 %vm92_vm0, %v339_v4  ;;  %1504 = vmatmul.msk.f32.gmra.mxu3 %vm92_vm0, %v339_v4 }
  0xf8   :  { %1420 = vmatmul.msk.f32.gmra.mxu0 %vm92_vm0, %v311_v5  ;;  %1476 = vmatmul.msk.f32.gmra.mxu1 %vm92_vm0, %v311_v5  ;;  %v357_v5 = vld [vmem:[#allocation2 + $0x188] sm:$0xff] }
  0xff   :  { %1449 = vmatmul.msk.f32.gmra.mxu2 %vm92_vm0, %v340_v6  ;;  %1505 = vmatmul.msk.f32.gmra.mxu3 %vm92_vm0, %v340_v6 }
 0x100   :  { %1421 = vmatmul.msk.f32.gmra.mxu0 %vm92_vm0, %v312_v7  ;;  %1477 = vmatmul.msk.f32.gmra.mxu1 %vm92_vm0, %v312_v7 }
 0x107   :  { %1450 = vmatmul.msk.f32.gmra.mxu2 %vm92_vm0, %v341_v8  ;;  %1506 = vmatmul.msk.f32.gmra.mxu3 %vm92_vm0, %v341_v8  ;;  %v329_v8 = vld [vmem:[#allocation2 + $0xa8] sm:$0xff] }
 0x108   :  { %1422 = vmatmul.msk.f32.gmra.mxu0 %vm92_vm0, %v313_v9  ;;  %1478 = vmatmul.msk.f32.gmra.mxu1 %vm92_vm0, %v313_v9 }
 0x10f   :  { %1451 = vmatmul.msk.f32.gmra.mxu2 %vm92_vm0, %v342_v10  ;;  %1507 = vmatmul.msk.f32.gmra.mxu3 %vm92_vm0, %v342_v10 }
 0x110   :  { %1423 = vmatmul.msk.f32.gmra.mxu0 %vm92_vm0, %v314_v11  ;;  %1479 = vmatmul.msk.f32.gmra.mxu1 %vm92_vm0, %v314_v11  ;;  %v358_v11 = vld [vmem:[#allocation2 + $0x190] sm:$0xff] }
 0x117   :  { %1452 = vmatmul.msk.f32.gmra.mxu2 %vm92_vm0, %v343_v12  ;;  %1508 = vmatmul.msk.f32.gmra.mxu3 %vm92_vm0, %v343_v12 }
 0x118   :  { %1424 = vmatmul.msk.f32.gmra.mxu0 %vm92_vm0, %v315_v13  ;;  %1480 = vmatmul.msk.f32.gmra.mxu1 %vm92_vm0, %v315_v13 }
 0x11f   :  { %1453 = vmatmul.msk.f32.gmra.mxu2 %vm92_vm0, %v344_v14  ;;  %1509 = vmatmul.msk.f32.gmra.mxu3 %vm92_vm0, %v344_v14 }
 0x120   :  { %1425 = vmatmul.msk.f32.gmra.mxu0 %vm92_vm0, %v316_v15  ;;  %1481 = vmatmul.msk.f32.gmra.mxu1 %vm92_vm0, %v316_v15 }
 0x127   :  { %1454 = vmatmul.msk.f32.gmra.mxu2 %vm92_vm0, %v345_v16  ;;  %1510 = vmatmul.msk.f32.gmra.mxu3 %vm92_vm0, %v345_v16 }
 0x128   :  { %1426 = vmatmul.msk.f32.gmra.mxu0 %vm92_vm0, %v317_v17  ;;  %1482 = vmatmul.msk.f32.gmra.mxu1 %vm92_vm0, %v317_v17 }
 0x12f   :  { %1455 = vmatmul.msk.f32.gmra.mxu2 %vm92_vm0, %v346_v18  ;;  %1511 = vmatmul.msk.f32.gmra.mxu3 %vm92_vm0, %v346_v18  ;;  %v330_v18 = vld [vmem:[#allocation2 + $0xb0] sm:$0xff] }
 0x130   :  { %1427 = vmatmul.msk.f32.gmra.mxu0 %vm92_vm0, %v318_v19  ;;  %1483 = vmatmul.msk.f32.gmra.mxu1 %vm92_vm0, %v318_v19  ;;  %v359_v19 = vld [vmem:[#allocation2 + $0x198] sm:$0xff] }
 0x137   :  { %1456 = vmatmul.msk.f32.gmra.mxu2 %vm92_vm0, %v347_v20  ;;  %1512 = vmatmul.msk.f32.gmra.mxu3 %vm92_vm0, %v347_v20 }
 0x138   :  { %1428 = vmatmul.msk.f32.gmra.mxu0 %vm92_vm0, %v319_v21  ;;  %1484 = vmatmul.msk.f32.gmra.mxu1 %vm92_vm0, %v319_v21 }
 0x13f   :  { %1457 = vmatmul.msk.f32.gmra.mxu2 %vm92_vm0, %v348_v22  ;;  %1513 = vmatmul.msk.f32.gmra.mxu3 %vm92_vm0, %v348_v22 }
 0x140   :  { %1429 = vmatmul.msk.f32.gmra.mxu0 %vm92_vm0, %v320_v23  ;;  %1485 = vmatmul.msk.f32.gmra.mxu1 %vm92_vm0, %v320_v23 }
 0x147   :  { %1458 = vmatmul.msk.f32.gmra.mxu2 %vm92_vm0, %v349_v24  ;;  %1514 = vmatmul.msk.f32.gmra.mxu3 %vm92_vm0, %v349_v24 }
 0x148   :  { %1430 = vmatmul.msk.f32.gmra.mxu0 %vm92_vm0, %v321_v25  ;;  %1486 = vmatmul.msk.f32.gmra.mxu1 %vm92_vm0, %v321_v25 }
 0x14f   :  { %1459 = vmatmul.msk.f32.gmra.mxu2 %vm92_vm0, %v350_v26  ;;  %1515 = vmatmul.msk.f32.gmra.mxu3 %vm92_vm0, %v350_v26 }
 0x150   :  { %1431 = vmatmul.msk.f32.gmra.mxu0 %vm92_vm0, %v322_v27  ;;  %1487 = vmatmul.msk.f32.gmra.mxu1 %vm92_vm0, %v322_v27 }
 0x157   :  { %1460 = vmatmul.msk.f32.gmra.mxu2 %vm92_vm0, %v351_v33  ;;  %1516 = vmatmul.msk.f32.gmra.mxu3 %vm92_vm0, %v351_v33  ;;  %v331_v33 = vld [vmem:[#allocation2 + $0xb8] sm:$0xff] }
 0x158   :  { %1432 = vmatmul.msk.f32.gmra.mxu0 %vm92_vm0, %v323_v34  ;;  %1488 = vmatmul.msk.f32.gmra.mxu1 %vm92_vm0, %v323_v34  ;;  %v360_v34 = vld [vmem:[#allocation2 + $0x1a0] sm:$0xff] }
 0x15d   :  { %v554_v36 = vpop.f32.mrf.mxu0  ;;  %v739_v37 = vpop.f32.mrf.mxu1 }
 0x15e   :  { %v1529_v39 = vadd.f32 -1.0, %v554_v36  ;;  %v1530_v40 = vadd.f32 -1.0, %v739_v37 }
 0x15f   :  { %1461 = vmatmul.msk.f32.gmra.mxu2 %vm92_vm0, %v352_v35  ;;  %1517 = vmatmul.msk.f32.gmra.mxu3 %vm92_vm0, %v352_v35 }
 0x160   :  { %1019 = vst [vmem:[#allocation8] sm:$0xff] %v1529_v39  ;;  %1433 = vmatmul.msk.f32.gmra.mxu0 %vm92_vm0, %v324_v38  ;;  %1489 = vmatmul.msk.f32.gmra.mxu1 %vm92_vm0, %v324_v38 }
 0x161   :  { %1133 = vst [vmem:[#allocation8 + $0x1c0] sm:$0xff] %v1529_v39 }
 0x162   :  { %v638_v41 = vpop.f32.mrf.mxu2  ;;  %1246 = vst [vmem:[#allocation8 + $0x380] sm:$0xff] %v1529_v39  ;;  %v823_v43 = vpop.f32.mrf.mxu3 }
 0x163   :  { %v1585_v42 = vadd.f32 -1.0, %v638_v41  ;;  %1021 = vst.msk [vmem:[#allocation8 + $0x8] sm:$0xff] %vm1020_vm1, %v1530_v40  ;;  %v1586_v45 = vadd.f32 -1.0, %v823_v43  ;;  %v332_v43 = vld [vmem:[#allocation2 + $0xc0] sm:$0xff] }
 0x164   :  { %1134 = vst.msk [vmem:[#allocation8 + $0x1c8] sm:$0xff] %vm1020_vm1, %v1530_v40 }
 0x165   :  { %1076 = vst [vmem:[#allocation8 + $0x540] sm:$0xff] %v1585_v42  ;;  %v557_v46 = vpop.f32.mrf.mxu0  ;;  %v742_v51 = vpop.f32.mrf.mxu1 }
 0x166   :  { %1189 = vst [vmem:[#allocation8 + $0x700] sm:$0xff] %v1585_v42  ;;  %v1531_v48 = vadd.f32 -1.0, %v557_v46  ;;  %v1532_v54 = vadd.f32 -1.0, %v742_v51 }
 0x167   :  { %1302 = vst [vmem:[#allocation8 + $0x8c0] sm:$0xff] %v1585_v42  ;;  %1462 = vmatmul.msk.f32.gmra.mxu2 %vm92_vm0, %v353_v44  ;;  %1518 = vmatmul.msk.f32.gmra.mxu3 %vm92_vm0, %v353_v44  ;;  %v361_v44 = vld [vmem:[#allocation2 + $0x1a8] sm:$0xff] }
 0x168   :  { %1247 = vst.msk [vmem:[#allocation8 + $0x388] sm:$0xff] %vm1020_vm1, %v1530_v40  ;;  %1434 = vmatmul.msk.f32.gmra.mxu0 %vm92_vm0, %v325_v47  ;;  %1490 = vmatmul.msk.f32.gmra.mxu1 %vm92_vm0, %v325_v47 }
 0x169   :  { %1077 = vst.msk [vmem:[#allocation8 + $0x548] sm:$0xff] %vm1020_vm1, %v1586_v45 }
 0x16a   :  { %v641_v49 = vpop.f32.mrf.mxu2  ;;  %1190 = vst.msk [vmem:[#allocation8 + $0x708] sm:$0xff] %vm1020_vm1, %v1586_v45  ;;  %v826_v55 = vpop.f32.mrf.mxu3 }
 0x16b   :  { %1303 = vst.msk [vmem:[#allocation8 + $0x8c8] sm:$0xff] %vm1020_vm1, %v1586_v45  ;;  %v1587_v50 = vadd.f32 -1.0, %v641_v49  ;;  %v1588_v56 = vadd.f32 -1.0, %v826_v55 }
 0x16c   :  { %1022 = vst [vmem:[#allocation8 + $0x10] sm:$0xff] %v1531_v48 }
 0x16d   :  { %1135 = vst [vmem:[#allocation8 + $0x1d0] sm:$0xff] %v1531_v48  ;;  %v560_v57 = vpop.f32.mrf.mxu0  ;;  %v745_v63 = vpop.f32.mrf.mxu1 }
 0x16e   :  { %1248 = vst [vmem:[#allocation8 + $0x390] sm:$0xff] %v1531_v48  ;;  %v1533_v59 = vadd.f32 -1.0, %v560_v57  ;;  %v1534_v28 = vadd.f32 -1.0, %v745_v63  ;;  %v334_v63 = vld [vmem:[#allocation2 + $0xd0] sm:$0xff] }
 0x16f   :  { %1463 = vmatmul.msk.f32.gmra.mxu2 %vm92_vm0, %v354_v52  ;;  %1519 = vmatmul.msk.f32.gmra.mxu3 %vm92_vm0, %v354_v52  ;;  %1078 = vst [vmem:[#allocation8 + $0x550] sm:$0xff] %v1587_v50 }
 0x170   :  { %1191 = vst [vmem:[#allocation8 + $0x710] sm:$0xff] %v1587_v50  ;;  %1435 = vmatmul.msk.f32.gmra.mxu0 %vm92_vm0, %v326_v53  ;;  %1491 = vmatmul.msk.f32.gmra.mxu1 %vm92_vm0, %v326_v53  ;;  %v333_v53 = vld [vmem:[#allocation2 + $0xc8] sm:$0xff] }
 0x171   :  { %1304 = vst [vmem:[#allocation8 + $0x8d0] sm:$0xff] %v1587_v50 }
 0x172   :  { %1023 = vst.msk [vmem:[#allocation8 + $0x18] sm:$0xff] %vm1020_vm1, %v1532_v54  ;;  %v644_v60 = vpop.f32.mrf.mxu2  ;;  %v829_v29 = vpop.f32.mrf.mxu3 }
 0x173   :  { %1136 = vst.msk [vmem:[#allocation8 + $0x1d8] sm:$0xff] %vm1020_vm1, %v1532_v54  ;;  %v1589_v62 = vadd.f32 -1.0, %v644_v60  ;;  %v1590_v31 = vadd.f32 -1.0, %v829_v29 }
 0x174   :  { %1249 = vst.msk [vmem:[#allocation8 + $0x398] sm:$0xff] %vm1020_vm1, %v1532_v54  ;;  %v362_v54 = vld [vmem:[#allocation2 + $0x1b0] sm:$0xff] }
 0x175   :  { %1079 = vst.msk [vmem:[#allocation8 + $0x558] sm:$0xff] %vm1020_vm1, %v1588_v56  ;;  %v563_v32 = vpop.f32.mrf.mxu0  ;;  %v748_v4 = vpop.f32.mrf.mxu1 }
 0x176   :  { %1192 = vst.msk [vmem:[#allocation8 + $0x718] sm:$0xff] %vm1020_vm1, %v1588_v56  ;;  %v1535_v1 = vadd.f32 -1.0, %v563_v32  ;;  %v1536_v6 = vadd.f32 -1.0, %v748_v4  ;;  %v335_v4 = vld [vmem:[#allocation2 + $0xd8] sm:$0xff] }
 0x177   :  { %1464 = vmatmul.msk.f32.gmra.mxu2 %vm92_vm0, %v355_v58  ;;  %1520 = vmatmul.msk.f32.gmra.mxu3 %vm92_vm0, %v355_v58  ;;  %1305 = vst.msk [vmem:[#allocation8 + $0x8d8] sm:$0xff] %vm1020_vm1, %v1588_v56 }
 0x178   :  { %1024 = vst [vmem:[#allocation8 + $0x20] sm:$0xff] %v1533_v59  ;;  %1436 = vmatmul.msk.f32.gmra.mxu0 %vm92_vm0, %v327_v61  ;;  %1492 = vmatmul.msk.f32.gmra.mxu1 %vm92_vm0, %v327_v61 }
 0x179   :  { %1137 = vst [vmem:[#allocation8 + $0x1e0] sm:$0xff] %v1533_v59 }
 0x17a   :  { %1250 = vst [vmem:[#allocation8 + $0x3a0] sm:$0xff] %v1533_v59  ;;  %v647_v2 = vpop.f32.mrf.mxu2  ;;  %v832_v7 = vpop.f32.mrf.mxu3 }
 0x17b   :  { %1080 = vst [vmem:[#allocation8 + $0x560] sm:$0xff] %v1589_v62  ;;  %v1591_v3 = vadd.f32 -1.0, %v647_v2  ;;  %v1592_v9 = vadd.f32 -1.0, %v832_v7 }
 0x17c   :  { %1193 = vst [vmem:[#allocation8 + $0x720] sm:$0xff] %v1589_v62 }
 0x17d   :  { %1306 = vst [vmem:[#allocation8 + $0x8e0] sm:$0xff] %v1589_v62  ;;  %v566_v10 = vpop.f32.mrf.mxu0  ;;  %v751_v15 = vpop.f32.mrf.mxu1 }
 0x17e   :  { %1025 = vst.msk [vmem:[#allocation8 + $0x28] sm:$0xff] %vm1020_vm1, %v1534_v28  ;;  %v1537_v12 = vadd.f32 -1.0, %v566_v10  ;;  %v1538_v16 = vadd.f32 -1.0, %v751_v15 }
 0x17f   :  { %1465 = vmatmul.msk.f32.gmra.mxu2 %vm92_vm0, %v356_v30  ;;  %1521 = vmatmul.msk.f32.gmra.mxu3 %vm92_vm0, %v356_v30  ;;  %1138 = vst.msk [vmem:[#allocation8 + $0x1e8] sm:$0xff] %vm1020_vm1, %v1534_v28 }
 0x180   :  { %1251 = vst.msk [vmem:[#allocation8 + $0x3a8] sm:$0xff] %vm1020_vm1, %v1534_v28  ;;  %1437 = vmatmul.msk.f32.gmra.mxu0 %vm92_vm0, %v328_v0  ;;  %1493 = vmatmul.msk.f32.gmra.mxu1 %vm92_vm0, %v328_v0  ;;  %v363_v28 = vld [vmem:[#allocation2 + $0x1b8] sm:$0xff] }
 0x181   :  { %1081 = vst.msk [vmem:[#allocation8 + $0x568] sm:$0xff] %vm1020_vm1, %v1590_v31 }
 0x182   :  { %1194 = vst.msk [vmem:[#allocation8 + $0x728] sm:$0xff] %vm1020_vm1, %v1590_v31  ;;  %v650_v13 = vpop.f32.mrf.mxu2  ;;  %v835_v17 = vpop.f32.mrf.mxu3 }
 0x183   :  { %1307 = vst.msk [vmem:[#allocation8 + $0x8e8] sm:$0xff] %vm1020_vm1, %v1590_v31  ;;  %v1593_v14 = vadd.f32 -1.0, %v650_v13  ;;  %v1594_v20 = vadd.f32 -1.0, %v835_v17 }
 0x184   :  { %1026 = vst [vmem:[#allocation8 + $0x30] sm:$0xff] %v1535_v1 }
 0x185   :  { %1139 = vst [vmem:[#allocation8 + $0x1f0] sm:$0xff] %v1535_v1  ;;  %v569_v21 = vpop.f32.mrf.mxu0  ;;  %v754_v25 = vpop.f32.mrf.mxu1 }
 0x186   :  { %1252 = vst [vmem:[#allocation8 + $0x3b0] sm:$0xff] %v1535_v1  ;;  %v1539_v22 = vadd.f32 -1.0, %v569_v21  ;;  %v1540_v26 = vadd.f32 -1.0, %v754_v25 }
 0x187   :  { %1466 = vmatmul.msk.f32.gmra.mxu2 %vm92_vm0, %v357_v5  ;;  %1522 = vmatmul.msk.f32.gmra.mxu3 %vm92_vm0, %v357_v5  ;;  %1082 = vst [vmem:[#allocation8 + $0x570] sm:$0xff] %v1591_v3 }
 0x188   :  { %1195 = vst [vmem:[#allocation8 + $0x730] sm:$0xff] %v1591_v3  ;;  %1438 = vmatmul.msk.f32.gmra.mxu0 %vm92_vm0, %v329_v8  ;;  %1494 = vmatmul.msk.f32.gmra.mxu1 %vm92_vm0, %v329_v8 }
 0x189   :  { %1308 = vst [vmem:[#allocation8 + $0x8f0] sm:$0xff] %v1591_v3 }
 0x18a   :  { %1027 = vst.msk [vmem:[#allocation8 + $0x38] sm:$0xff] %vm1020_vm1, %v1536_v6  ;;  %v653_v23 = vpop.f32.mrf.mxu2  ;;  %v838_v27 = vpop.f32.mrf.mxu3 }
 0x18b   :  { %1140 = vst.msk [vmem:[#allocation8 + $0x1f8] sm:$0xff] %vm1020_vm1, %v1536_v6  ;;  %v1595_v24 = vadd.f32 -1.0, %v653_v23  ;;  %v1596_v35 = vadd.f32 -1.0, %v838_v27 }
 0x18c   :  { %1253 = vst.msk [vmem:[#allocation8 + $0x3b8] sm:$0xff] %vm1020_vm1, %v1536_v6 }
 0x18d   :  { %1083 = vst.msk [vmem:[#allocation8 + $0x578] sm:$0xff] %vm1020_vm1, %v1592_v9  ;;  %v572_v36 = vpop.f32.mrf.mxu0  ;;  %v757_v40 = vpop.f32.mrf.mxu1 }
 0x18e   :  { %1196 = vst.msk [vmem:[#allocation8 + $0x738] sm:$0xff] %vm1020_vm1, %v1592_v9  ;;  %v1541_v37 = vadd.f32 -1.0, %v572_v36  ;;  %v1542_v41 = vadd.f32 -1.0, %v757_v40 }
 0x18f   :  { %1467 = vmatmul.msk.f32.gmra.mxu2 %vm92_vm0, %v358_v11  ;;  %1523 = vmatmul.msk.f32.gmra.mxu3 %vm92_vm0, %v358_v11  ;;  %1309 = vst.msk [vmem:[#allocation8 + $0x8f8] sm:$0xff] %vm1020_vm1, %v1592_v9 }
 0x190   :  { %1028 = vst [vmem:[#allocation8 + $0x40] sm:$0xff] %v1537_v12  ;;  %1439 = vmatmul.msk.f32.gmra.mxu0 %vm92_vm0, %v330_v18  ;;  %1495 = vmatmul.msk.f32.gmra.mxu1 %vm92_vm0, %v330_v18 }
 0x191   :  { %1141 = vst [vmem:[#allocation8 + $0x200] sm:$0xff] %v1537_v12 }
 0x192   :  { %1254 = vst [vmem:[#allocation8 + $0x3c0] sm:$0xff] %v1537_v12  ;;  %v656_v38 = vpop.f32.mrf.mxu2  ;;  %v841_v42 = vpop.f32.mrf.mxu3 }
 0x193   :  { %1084 = vst [vmem:[#allocation8 + $0x580] sm:$0xff] %v1593_v14  ;;  %v1597_v39 = vadd.f32 -1.0, %v656_v38  ;;  %v1598_v45 = vadd.f32 -1.0, %v841_v42 }
 0x194   :  { %1197 = vst [vmem:[#allocation8 + $0x740] sm:$0xff] %v1593_v14 }
 0x195   :  { %1310 = vst [vmem:[#allocation8 + $0x900] sm:$0xff] %v1593_v14  ;;  %v575_v46 = vpop.f32.mrf.mxu0  ;;  %v760_v50 = vpop.f32.mrf.mxu1 }
 0x196   :  { %1029 = vst.msk [vmem:[#allocation8 + $0x48] sm:$0xff] %vm1020_vm1, %v1538_v16  ;;  %v1543_v47 = vadd.f32 -1.0, %v575_v46  ;;  %v1544_v51 = vadd.f32 -1.0, %v760_v50 }
 0x197   :  { %1468 = vmatmul.msk.f32.gmra.mxu2 %vm92_vm0, %v359_v19  ;;  %1524 = vmatmul.msk.f32.gmra.mxu3 %vm92_vm0, %v359_v19  ;;  %1142 = vst.msk [vmem:[#allocation8 + $0x208] sm:$0xff] %vm1020_vm1, %v1538_v16 }
 0x198   :  { %1255 = vst.msk [vmem:[#allocation8 + $0x3c8] sm:$0xff] %vm1020_vm1, %v1538_v16  ;;  %1440 = vmatmul.msk.f32.gmra.mxu0 %vm92_vm0, %v331_v33  ;;  %1496 = vmatmul.msk.f32.gmra.mxu1 %vm92_vm0, %v331_v33 }
 0x199   :  { %1085 = vst.msk [vmem:[#allocation8 + $0x588] sm:$0xff] %vm1020_vm1, %v1594_v20 }
 0x19a   :  { %1198 = vst.msk [vmem:[#allocation8 + $0x748] sm:$0xff] %vm1020_vm1, %v1594_v20  ;;  %v659_v48 = vpop.f32.mrf.mxu2  ;;  %v844_v52 = vpop.f32.mrf.mxu3 }
 0x19b   :  { %1311 = vst.msk [vmem:[#allocation8 + $0x908] sm:$0xff] %vm1020_vm1, %v1594_v20  ;;  %v1599_v49 = vadd.f32 -1.0, %v659_v48  ;;  %v1600_v55 = vadd.f32 -1.0, %v844_v52 }
 0x19c   :  { %1030 = vst [vmem:[#allocation8 + $0x50] sm:$0xff] %v1539_v22 }
 0x19d   :  { %1143 = vst [vmem:[#allocation8 + $0x210] sm:$0xff] %v1539_v22  ;;  %v578_v56 = vpop.f32.mrf.mxu0  ;;  %v763_v60 = vpop.f32.mrf.mxu1 }
 0x19e   :  { %1256 = vst [vmem:[#allocation8 + $0x3d0] sm:$0xff] %v1539_v22  ;;  %v1545_v57 = vadd.f32 -1.0, %v578_v56  ;;  %v1546_v61 = vadd.f32 -1.0, %v763_v60 }
 0x19f   :  { %1086 = vst [vmem:[#allocation8 + $0x590] sm:$0xff] %v1595_v24  ;;  %1469 = vmatmul.msk.f32.gmra.mxu2 %vm92_vm0, %v360_v34  ;;  %1525 = vmatmul.msk.f32.gmra.mxu3 %vm92_vm0, %v360_v34 }
 0x1a0   :  { %1199 = vst [vmem:[#allocation8 + $0x750] sm:$0xff] %v1595_v24  ;;  %1441 = vmatmul.msk.f32.gmra.mxu0 %vm92_vm0, %v332_v43  ;;  %1497 = vmatmul.msk.f32.gmra.mxu1 %vm92_vm0, %v332_v43 }
 0x1a1   :  { %1312 = vst [vmem:[#allocation8 + $0x910] sm:$0xff] %v1595_v24 }
 0x1a2   :  { %1031 = vst.msk [vmem:[#allocation8 + $0x58] sm:$0xff] %vm1020_vm1, %v1540_v26  ;;  %v662_v58 = vpop.f32.mrf.mxu2  ;;  %v847_v62 = vpop.f32.mrf.mxu3 }
 0x1a3   :  { %1144 = vst.msk [vmem:[#allocation8 + $0x218] sm:$0xff] %vm1020_vm1, %v1540_v26  ;;  %v1601_v59 = vadd.f32 -1.0, %v662_v58  ;;  %v1602_v29 = vadd.f32 -1.0, %v847_v62 }
 0x1a4   :  { %1257 = vst.msk [vmem:[#allocation8 + $0x3d8] sm:$0xff] %vm1020_vm1, %v1540_v26 }
 0x1a5   :  { %1087 = vst.msk [vmem:[#allocation8 + $0x598] sm:$0xff] %vm1020_vm1, %v1596_v35  ;;  %v581_v30 = vpop.f32.mrf.mxu0  ;;  %v766_v1 = vpop.f32.mrf.mxu1 }
 0x1a6   :  { %1200 = vst.msk [vmem:[#allocation8 + $0x758] sm:$0xff] %vm1020_vm1, %v1596_v35  ;;  %v1547_v31 = vadd.f32 -1.0, %v581_v30  ;;  %v1548_v2 = vadd.f32 -1.0, %v766_v1 }
 0x1a7   :  { %1313 = vst.msk [vmem:[#allocation8 + $0x918] sm:$0xff] %vm1020_vm1, %v1596_v35  ;;  %1470 = vmatmul.msk.f32.gmra.mxu2 %vm92_vm0, %v361_v44  ;;  %1526 = vmatmul.msk.f32.gmra.mxu3 %vm92_vm0, %v361_v44 }
 0x1a8   :  { %1032 = vst [vmem:[#allocation8 + $0x60] sm:$0xff] %v1541_v37  ;;  %1442 = vmatmul.msk.f32.gmra.mxu0 %vm92_vm0, %v333_v53  ;;  %1498 = vmatmul.msk.f32.gmra.mxu1 %vm92_vm0, %v333_v53 }
 0x1a9   :  { %1145 = vst [vmem:[#allocation8 + $0x220] sm:$0xff] %v1541_v37 }
 0x1aa   :  { %1258 = vst [vmem:[#allocation8 + $0x3e0] sm:$0xff] %v1541_v37  ;;  %v665_v32 = vpop.f32.mrf.mxu2  ;;  %v850_v3 = vpop.f32.mrf.mxu3 }
 0x1ab   :  { %1088 = vst [vmem:[#allocation8 + $0x5a0] sm:$0xff] %v1597_v39  ;;  %v1603_v0 = vadd.f32 -1.0, %v665_v32  ;;  %v1604_v5 = vadd.f32 -1.0, %v850_v3 }
 0x1ac   :  { %1201 = vst [vmem:[#allocation8 + $0x760] sm:$0xff] %v1597_v39 }
 0x1ad   :  { %1314 = vst [vmem:[#allocation8 + $0x920] sm:$0xff] %v1597_v39  ;;  %v584_v6 = vpop.f32.mrf.mxu0  ;;  %v769_v10 = vpop.f32.mrf.mxu1 }
 0x1ae   :  { %1033 = vst.msk [vmem:[#allocation8 + $0x68] sm:$0xff] %vm1020_vm1, %v1542_v41  ;;  %v1549_v7 = vadd.f32 -1.0, %v584_v6  ;;  %v1550_v11 = vadd.f32 -1.0, %v769_v10 }
 0x1af   :  { %1146 = vst.msk [vmem:[#allocation8 + $0x228] sm:$0xff] %vm1020_vm1, %v1542_v41  ;;  %1471 = vmatmul.msk.f32.gmra.mxu2 %vm92_vm0, %v362_v54  ;;  %1527 = vmatmul.msk.f32.gmra.mxu3 %vm92_vm0, %v362_v54 }
 0x1b0   :  { %1259 = vst.msk [vmem:[#allocation8 + $0x3e8] sm:$0xff] %vm1020_vm1, %v1542_v41  ;;  %1443 = vmatmul.msk.f32.gmra.mxu0 %vm92_vm0, %v334_v63  ;;  %1499 = vmatmul.msk.f32.gmra.mxu1 %vm92_vm0, %v334_v63 }
 0x1b1   :  { %1089 = vst.msk [vmem:[#allocation8 + $0x5a8] sm:$0xff] %vm1020_vm1, %v1598_v45 }
 0x1b2   :  { %1202 = vst.msk [vmem:[#allocation8 + $0x768] sm:$0xff] %vm1020_vm1, %v1598_v45  ;;  %v668_v8 = vpop.f32.mrf.mxu2  ;;  %v853_v12 = vpop.f32.mrf.mxu3 }
 0x1b3   :  { %1315 = vst.msk [vmem:[#allocation8 + $0x928] sm:$0xff] %vm1020_vm1, %v1598_v45  ;;  %v1605_v9 = vadd.f32 -1.0, %v668_v8  ;;  %v1606_v13 = vadd.f32 -1.0, %v853_v12 }
 0x1b4   :  { %1034 = vst [vmem:[#allocation8 + $0x70] sm:$0xff] %v1543_v47 }
 0x1b5   :  { %1147 = vst [vmem:[#allocation8 + $0x230] sm:$0xff] %v1543_v47  ;;  %v587_v14 = vpop.f32.mrf.mxu0  ;;  %v772_v18 = vpop.f32.mrf.mxu1 }
 0x1b6   :  { %1260 = vst [vmem:[#allocation8 + $0x3f0] sm:$0xff] %v1543_v47  ;;  %v1551_v15 = vadd.f32 -1.0, %v587_v14  ;;  %v1552_v19 = vadd.f32 -1.0, %v772_v18 }
 0x1b7   :  { %1090 = vst [vmem:[#allocation8 + $0x5b0] sm:$0xff] %v1599_v49  ;;  %1472 = vmatmul.msk.f32.gmra.mxu2 %vm92_vm0, %v363_v28  ;;  %1528 = vmatmul.msk.f32.gmra.mxu3 %vm92_vm0, %v363_v28 }
 0x1b8   :  { %1203 = vst [vmem:[#allocation8 + $0x770] sm:$0xff] %v1599_v49  ;;  %1444 = vmatmul.msk.f32.gmra.mxu0 %vm92_vm0, %v335_v4  ;;  %1500 = vmatmul.msk.f32.gmra.mxu1 %vm92_vm0, %v335_v4 }
 0x1b9   :  { %1316 = vst [vmem:[#allocation8 + $0x930] sm:$0xff] %v1599_v49 }
 0x1ba   :  { %1035 = vst.msk [vmem:[#allocation8 + $0x78] sm:$0xff] %vm1020_vm1, %v1544_v51  ;;  %v671_v16 = vpop.f32.mrf.mxu2  ;;  %v856_v20 = vpop.f32.mrf.mxu3 }
 0x1bb   :  { %1148 = vst.msk [vmem:[#allocation8 + $0x238] sm:$0xff] %vm1020_vm1, %v1544_v51  ;;  %v1607_v17 = vadd.f32 -1.0, %v671_v16  ;;  %v1608_v21 = vadd.f32 -1.0, %v856_v20 }
 0x1bc   :  { %1261 = vst.msk [vmem:[#allocation8 + $0x3f8] sm:$0xff] %vm1020_vm1, %v1544_v51 }
 0x1bd   :  { %1091 = vst.msk [vmem:[#allocation8 + $0x5b8] sm:$0xff] %vm1020_vm1, %v1600_v55  ;;  %v590_v22 = vpop.f32.mrf.mxu0  ;;  %v775_v26 = vpop.f32.mrf.mxu1 }
 0x1be   :  { %1204 = vst.msk [vmem:[#allocation8 + $0x778] sm:$0xff] %vm1020_vm1, %v1600_v55  ;;  %v1553_v23 = vadd.f32 -1.0, %v590_v22  ;;  %v1554_v27 = vadd.f32 -1.0, %v775_v26 }
 0x1bf   :  { %1317 = vst.msk [vmem:[#allocation8 + $0x938] sm:$0xff] %vm1020_vm1, %v1600_v55 }
 0x1c0   :  { %1036 = vst [vmem:[#allocation8 + $0x80] sm:$0xff] %v1545_v57 }
 0x1c1   :  { %1149 = vst [vmem:[#allocation8 + $0x240] sm:$0xff] %v1545_v57 }
 0x1c2   :  { %1262 = vst [vmem:[#allocation8 + $0x400] sm:$0xff] %v1545_v57  ;;  %v674_v24 = vpop.f32.mrf.mxu2  ;;  %v859_v33 = vpop.f32.mrf.mxu3 }
 0x1c3   :  { %1092 = vst [vmem:[#allocation8 + $0x5c0] sm:$0xff] %v1601_v59  ;;  %v1609_v25 = vadd.f32 -1.0, %v674_v24  ;;  %v1610_v34 = vadd.f32 -1.0, %v859_v33 }
 0x1c4   :  { %1205 = vst [vmem:[#allocation8 + $0x780] sm:$0xff] %v1601_v59 }
 0x1c5   :  { %1318 = vst [vmem:[#allocation8 + $0x940] sm:$0xff] %v1601_v59  ;;  %v593_v35 = vpop.f32.mrf.mxu0  ;;  %v778_v39 = vpop.f32.mrf.mxu1 }
 0x1c6   :  { %1037 = vst.msk [vmem:[#allocation8 + $0x88] sm:$0xff] %vm1020_vm1, %v1546_v61  ;;  %v1555_v36 = vadd.f32 -1.0, %v593_v35  ;;  %v1556_v40 = vadd.f32 -1.0, %v778_v39 }
 0x1c7   :  { %1150 = vst.msk [vmem:[#allocation8 + $0x248] sm:$0xff] %vm1020_vm1, %v1546_v61 }
 0x1c8   :  { %1263 = vst.msk [vmem:[#allocation8 + $0x408] sm:$0xff] %vm1020_vm1, %v1546_v61 }
 0x1c9   :  { %1093 = vst.msk [vmem:[#allocation8 + $0x5c8] sm:$0xff] %vm1020_vm1, %v1602_v29 }
 0x1ca   :  { %1206 = vst.msk [vmem:[#allocation8 + $0x788] sm:$0xff] %vm1020_vm1, %v1602_v29  ;;  %v677_v37 = vpop.f32.mrf.mxu2  ;;  %v862_v41 = vpop.f32.mrf.mxu3 }
 0x1cb   :  { %1319 = vst.msk [vmem:[#allocation8 + $0x948] sm:$0xff] %vm1020_vm1, %v1602_v29  ;;  %v1611_v38 = vadd.f32 -1.0, %v677_v37  ;;  %v1612_v42 = vadd.f32 -1.0, %v862_v41 }
 0x1cc   :  { %1038 = vst [vmem:[#allocation8 + $0x90] sm:$0xff] %v1547_v31 }
 0x1cd   :  { %1151 = vst [vmem:[#allocation8 + $0x250] sm:$0xff] %v1547_v31  ;;  %v596_v43 = vpop.f32.mrf.mxu0  ;;  %v781_v47 = vpop.f32.mrf.mxu1 }
 0x1ce   :  { %1264 = vst [vmem:[#allocation8 + $0x410] sm:$0xff] %v1547_v31  ;;  %v1557_v44 = vadd.f32 -1.0, %v596_v43  ;;  %v1558_v48 = vadd.f32 -1.0, %v781_v47 }
 0x1cf   :  { %1094 = vst [vmem:[#allocation8 + $0x5d0] sm:$0xff] %v1603_v0 }
 0x1d0   :  { %1207 = vst [vmem:[#allocation8 + $0x790] sm:$0xff] %v1603_v0 }
 0x1d1   :  { %1320 = vst [vmem:[#allocation8 + $0x950] sm:$0xff] %v1603_v0 }
 0x1d2   :  { %1039 = vst.msk [vmem:[#allocation8 + $0x98] sm:$0xff] %vm1020_vm1, %v1548_v2  ;;  %v680_v45 = vpop.f32.mrf.mxu2  ;;  %v865_v49 = vpop.f32.mrf.mxu3 }
 0x1d3   :  { %1152 = vst.msk [vmem:[#allocation8 + $0x258] sm:$0xff] %vm1020_vm1, %v1548_v2  ;;  %v1613_v46 = vadd.f32 -1.0, %v680_v45  ;;  %v1614_v50 = vadd.f32 -1.0, %v865_v49 }
 0x1d4   :  { %1265 = vst.msk [vmem:[#allocation8 + $0x418] sm:$0xff] %vm1020_vm1, %v1548_v2 }
 0x1d5   :  { %1095 = vst.msk [vmem:[#allocation8 + $0x5d8] sm:$0xff] %vm1020_vm1, %v1604_v5  ;;  %v599_v51 = vpop.f32.mrf.mxu0  ;;  %v784_v55 = vpop.f32.mrf.mxu1 }
 0x1d6   :  { %1208 = vst.msk [vmem:[#allocation8 + $0x798] sm:$0xff] %vm1020_vm1, %v1604_v5  ;;  %v1559_v52 = vadd.f32 -1.0, %v599_v51  ;;  %v1560_v56 = vadd.f32 -1.0, %v784_v55 }
 0x1d7   :  { %1321 = vst.msk [vmem:[#allocation8 + $0x958] sm:$0xff] %vm1020_vm1, %v1604_v5 }
 0x1d8   :  { %1040 = vst [vmem:[#allocation8 + $0xa0] sm:$0xff] %v1549_v7 }
 0x1d9   :  { %1153 = vst [vmem:[#allocation8 + $0x260] sm:$0xff] %v1549_v7 }
 0x1da   :  { %1266 = vst [vmem:[#allocation8 + $0x420] sm:$0xff] %v1549_v7  ;;  %v683_v53 = vpop.f32.mrf.mxu2  ;;  %v868_v57 = vpop.f32.mrf.mxu3 }
 0x1db   :  { %1096 = vst [vmem:[#allocation8 + $0x5e0] sm:$0xff] %v1605_v9  ;;  %v1615_v54 = vadd.f32 -1.0, %v683_v53  ;;  %v1616_v58 = vadd.f32 -1.0, %v868_v57 }
 0x1dc   :  { %1209 = vst [vmem:[#allocation8 + $0x7a0] sm:$0xff] %v1605_v9 }
 0x1dd   :  { %1322 = vst [vmem:[#allocation8 + $0x960] sm:$0xff] %v1605_v9  ;;  %v602_v59 = vpop.f32.mrf.mxu0  ;;  %v787_v63 = vpop.f32.mrf.mxu1 }
 0x1de   :  { %1041 = vst.msk [vmem:[#allocation8 + $0xa8] sm:$0xff] %vm1020_vm1, %v1550_v11  ;;  %v1561_v60 = vadd.f32 -1.0, %v602_v59  ;;  %v1562_v28 = vadd.f32 -1.0, %v787_v63 }
 0x1df   :  { %1154 = vst.msk [vmem:[#allocation8 + $0x268] sm:$0xff] %vm1020_vm1, %v1550_v11 }
 0x1e0   :  { %1267 = vst.msk [vmem:[#allocation8 + $0x428] sm:$0xff] %vm1020_vm1, %v1550_v11 }
 0x1e1   :  { %1097 = vst.msk [vmem:[#allocation8 + $0x5e8] sm:$0xff] %vm1020_vm1, %v1606_v13 }
 0x1e2   :  { %1210 = vst.msk [vmem:[#allocation8 + $0x7a8] sm:$0xff] %vm1020_vm1, %v1606_v13  ;;  %v686_v61 = vpop.f32.mrf.mxu2  ;;  %v871_v29 = vpop.f32.mrf.mxu3 }
 0x1e3   :  { %1323 = vst.msk [vmem:[#allocation8 + $0x968] sm:$0xff] %vm1020_vm1, %v1606_v13  ;;  %v1617_v62 = vadd.f32 -1.0, %v686_v61  ;;  %v1618_v30 = vadd.f32 -1.0, %v871_v29 }
 0x1e4   :  { %1042 = vst [vmem:[#allocation8 + $0xb0] sm:$0xff] %v1551_v15 }
 0x1e5   :  { %1155 = vst [vmem:[#allocation8 + $0x270] sm:$0xff] %v1551_v15  ;;  %v605_v31 = vpop.f32.mrf.mxu0  ;;  %v790_v2 = vpop.f32.mrf.mxu1 }
 0x1e6   :  { %1268 = vst [vmem:[#allocation8 + $0x430] sm:$0xff] %v1551_v15  ;;  %v1563_v32 = vadd.f32 -1.0, %v605_v31  ;;  %v1564_v3 = vadd.f32 -1.0, %v790_v2 }
 0x1e7   :  { %1098 = vst [vmem:[#allocation8 + $0x5f0] sm:$0xff] %v1607_v17 }
 0x1e8   :  { %1211 = vst [vmem:[#allocation8 + $0x7b0] sm:$0xff] %v1607_v17 }
 0x1e9   :  { %1324 = vst [vmem:[#allocation8 + $0x970] sm:$0xff] %v1607_v17 }
 0x1ea   :  { %1043 = vst.msk [vmem:[#allocation8 + $0xb8] sm:$0xff] %vm1020_vm1, %v1552_v19  ;;  %v689_v0 = vpop.f32.mrf.mxu2  ;;  %v874_v4 = vpop.f32.mrf.mxu3 }
 0x1eb   :  { %1156 = vst.msk [vmem:[#allocation8 + $0x278] sm:$0xff] %vm1020_vm1, %v1552_v19  ;;  %v1619_v1 = vadd.f32 -1.0, %v689_v0  ;;  %v1620_v5 = vadd.f32 -1.0, %v874_v4 }
 0x1ec   :  { %1269 = vst.msk [vmem:[#allocation8 + $0x438] sm:$0xff] %vm1020_vm1, %v1552_v19 }
 0x1ed   :  { %1099 = vst.msk [vmem:[#allocation8 + $0x5f8] sm:$0xff] %vm1020_vm1, %v1608_v21  ;;  %v608_v6 = vpop.f32.mrf.mxu0  ;;  %v793_v10 = vpop.f32.mrf.mxu1 }
 0x1ee   :  { %1212 = vst.msk [vmem:[#allocation8 + $0x7b8] sm:$0xff] %vm1020_vm1, %v1608_v21  ;;  %v1565_v7 = vadd.f32 -1.0, %v608_v6  ;;  %v1566_v11 = vadd.f32 -1.0, %v793_v10 }
 0x1ef   :  { %1325 = vst.msk [vmem:[#allocation8 + $0x978] sm:$0xff] %vm1020_vm1, %v1608_v21 }
 0x1f0   :  { %1044 = vst [vmem:[#allocation8 + $0xc0] sm:$0xff] %v1553_v23 }
 0x1f1   :  { %1157 = vst [vmem:[#allocation8 + $0x280] sm:$0xff] %v1553_v23 }
 0x1f2   :  { %1270 = vst [vmem:[#allocation8 + $0x440] sm:$0xff] %v1553_v23  ;;  %v692_v8 = vpop.f32.mrf.mxu2  ;;  %v877_v12 = vpop.f32.mrf.mxu3 }
 0x1f3   :  { %1100 = vst [vmem:[#allocation8 + $0x600] sm:$0xff] %v1609_v25  ;;  %v1621_v9 = vadd.f32 -1.0, %v692_v8  ;;  %v1622_v13 = vadd.f32 -1.0, %v877_v12 }
 0x1f4   :  { %1213 = vst [vmem:[#allocation8 + $0x7c0] sm:$0xff] %v1609_v25 }
 0x1f5   :  { %1326 = vst [vmem:[#allocation8 + $0x980] sm:$0xff] %v1609_v25  ;;  %v611_v14 = vpop.f32.mrf.mxu0  ;;  %v796_v18 = vpop.f32.mrf.mxu1 }
 0x1f6   :  { %1045 = vst.msk [vmem:[#allocation8 + $0xc8] sm:$0xff] %vm1020_vm1, %v1554_v27  ;;  %v1567_v15 = vadd.f32 -1.0, %v611_v14  ;;  %v1568_v19 = vadd.f32 -1.0, %v796_v18 }
 0x1f7   :  { %1158 = vst.msk [vmem:[#allocation8 + $0x288] sm:$0xff] %vm1020_vm1, %v1554_v27 }
 0x1f8   :  { %1271 = vst.msk [vmem:[#allocation8 + $0x448] sm:$0xff] %vm1020_vm1, %v1554_v27 }
 0x1f9   :  { %1101 = vst.msk [vmem:[#allocation8 + $0x608] sm:$0xff] %vm1020_vm1, %v1610_v34 }
 0x1fa   :  { %1214 = vst.msk [vmem:[#allocation8 + $0x7c8] sm:$0xff] %vm1020_vm1, %v1610_v34  ;;  %v695_v16 = vpop.f32.mrf.mxu2  ;;  %v880_v20 = vpop.f32.mrf.mxu3 }
 0x1fb   :  { %1327 = vst.msk [vmem:[#allocation8 + $0x988] sm:$0xff] %vm1020_vm1, %v1610_v34  ;;  %v1623_v17 = vadd.f32 -1.0, %v695_v16  ;;  %v1624_v21 = vadd.f32 -1.0, %v880_v20 }
 0x1fc   :  { %1046 = vst [vmem:[#allocation8 + $0xd0] sm:$0xff] %v1555_v36 }
 0x1fd   :  { %1159 = vst [vmem:[#allocation8 + $0x290] sm:$0xff] %v1555_v36  ;;  %v614_v22 = vpop.f32.mrf.mxu0  ;;  %v799_v26 = vpop.f32.mrf.mxu1 }
 0x1fe   :  { %1272 = vst [vmem:[#allocation8 + $0x450] sm:$0xff] %v1555_v36  ;;  %v1569_v23 = vadd.f32 -1.0, %v614_v22  ;;  %v1570_v27 = vadd.f32 -1.0, %v799_v26 }
 0x1ff   :  { %1102 = vst [vmem:[#allocation8 + $0x610] sm:$0xff] %v1611_v38 }
 0x200   :  { %1215 = vst [vmem:[#allocation8 + $0x7d0] sm:$0xff] %v1611_v38 }
 0x201   :  { %1328 = vst [vmem:[#allocation8 + $0x990] sm:$0xff] %v1611_v38 }
 0x202   :  { %1047 = vst.msk [vmem:[#allocation8 + $0xd8] sm:$0xff] %vm1020_vm1, %v1556_v40  ;;  %v698_v24 = vpop.f32.mrf.mxu2  ;;  %v883_v33 = vpop.f32.mrf.mxu3 }
 0x203   :  { %1160 = vst.msk [vmem:[#allocation8 + $0x298] sm:$0xff] %vm1020_vm1, %v1556_v40  ;;  %v1625_v25 = vadd.f32 -1.0, %v698_v24  ;;  %v1626_v34 = vadd.f32 -1.0, %v883_v33 }
 0x204   :  { %1273 = vst.msk [vmem:[#allocation8 + $0x458] sm:$0xff] %vm1020_vm1, %v1556_v40 }
 0x205   :  { %1103 = vst.msk [vmem:[#allocation8 + $0x618] sm:$0xff] %vm1020_vm1, %v1612_v42  ;;  %v617_v35 = vpop.f32.mrf.mxu0  ;;  %v802_v39 = vpop.f32.mrf.mxu1 }
 0x206   :  { %1216 = vst.msk [vmem:[#allocation8 + $0x7d8] sm:$0xff] %vm1020_vm1, %v1612_v42  ;;  %v1571_v36 = vadd.f32 -1.0, %v617_v35  ;;  %v1572_v40 = vadd.f32 -1.0, %v802_v39 }
 0x207   :  { %1329 = vst.msk [vmem:[#allocation8 + $0x998] sm:$0xff] %vm1020_vm1, %v1612_v42 }
 0x208   :  { %1048 = vst [vmem:[#allocation8 + $0xe0] sm:$0xff] %v1557_v44 }
 0x209   :  { %1161 = vst [vmem:[#allocation8 + $0x2a0] sm:$0xff] %v1557_v44 }
 0x20a   :  { %1274 = vst [vmem:[#allocation8 + $0x460] sm:$0xff] %v1557_v44  ;;  %v701_v37 = vpop.f32.mrf.mxu2  ;;  %v886_v41 = vpop.f32.mrf.mxu3 }
 0x20b   :  { %1104 = vst [vmem:[#allocation8 + $0x620] sm:$0xff] %v1613_v46  ;;  %v1627_v38 = vadd.f32 -1.0, %v701_v37  ;;  %v1628_v42 = vadd.f32 -1.0, %v886_v41 }
 0x20c   :  { %1217 = vst [vmem:[#allocation8 + $0x7e0] sm:$0xff] %v1613_v46 }
 0x20d   :  { %1330 = vst [vmem:[#allocation8 + $0x9a0] sm:$0xff] %v1613_v46  ;;  %v620_v43 = vpop.f32.mrf.mxu0  ;;  %v805_v47 = vpop.f32.mrf.mxu1 }
 0x20e   :  { %1049 = vst.msk [vmem:[#allocation8 + $0xe8] sm:$0xff] %vm1020_vm1, %v1558_v48  ;;  %v1573_v44 = vadd.f32 -1.0, %v620_v43 }
 0x20f   :  { %1162 = vst.msk [vmem:[#allocation8 + $0x2a8] sm:$0xff] %vm1020_vm1, %v1558_v48 }
 0x210   :  { %1275 = vst.msk [vmem:[#allocation8 + $0x468] sm:$0xff] %vm1020_vm1, %v1558_v48  ;;  %v1574_v48 = vadd.f32 -1.0, %v805_v47 }
 0x211   :  { %1105 = vst.msk [vmem:[#allocation8 + $0x628] sm:$0xff] %vm1020_vm1, %v1614_v50 }
 0x212   :  { %1218 = vst.msk [vmem:[#allocation8 + $0x7e8] sm:$0xff] %vm1020_vm1, %v1614_v50  ;;  %v704_v45 = vpop.f32.mrf.mxu2  ;;  %v889_v49 = vpop.f32.mrf.mxu3 }
 0x213   :  { %1331 = vst.msk [vmem:[#allocation8 + $0x9a8] sm:$0xff] %vm1020_vm1, %v1614_v50  ;;  %v1629_v46 = vadd.f32 -1.0, %v704_v45  ;;  %v1630_v50 = vadd.f32 -1.0, %v889_v49 }
 0x214   :  { %1050 = vst [vmem:[#allocation8 + $0xf0] sm:$0xff] %v1559_v52 }
 0x215   :  { %1163 = vst [vmem:[#allocation8 + $0x2b0] sm:$0xff] %v1559_v52  ;;  %v623_v51 = vpop.f32.mrf.mxu0  ;;  %v808_v55 = vpop.f32.mrf.mxu1 }
 0x216   :  { %1276 = vst [vmem:[#allocation8 + $0x470] sm:$0xff] %v1559_v52  ;;  %v1575_v52 = vadd.f32 -1.0, %v623_v51 }
 0x217   :  { %1106 = vst [vmem:[#allocation8 + $0x630] sm:$0xff] %v1615_v54 }
 0x218   :  { %1219 = vst [vmem:[#allocation8 + $0x7f0] sm:$0xff] %v1615_v54 }
 0x219   :  { %1332 = vst [vmem:[#allocation8 + $0x9b0] sm:$0xff] %v1615_v54 }
 0x21a   :  { %1051 = vst.msk [vmem:[#allocation8 + $0xf8] sm:$0xff] %vm1020_vm1, %v1560_v56  ;;  %v707_v53 = vpop.f32.mrf.mxu2  ;;  %v892_v57 = vpop.f32.mrf.mxu3 }
 0x21b   :  { %1164 = vst.msk [vmem:[#allocation8 + $0x2b8] sm:$0xff] %vm1020_vm1, %v1560_v56  ;;  %v1631_v54 = vadd.f32 -1.0, %v707_v53 }
 0x21c   :  { %1277 = vst.msk [vmem:[#allocation8 + $0x478] sm:$0xff] %vm1020_vm1, %v1560_v56  ;;  %v1576_v56 = vadd.f32 -1.0, %v808_v55 }
 0x21d   :  { %1107 = vst.msk [vmem:[#allocation8 + $0x638] sm:$0xff] %vm1020_vm1, %v1616_v58  ;;  %v626_v59 = vpop.f32.mrf.mxu0  ;;  %v811_v63 = vpop.f32.mrf.mxu1 }
 0x21e   :  { %1220 = vst.msk [vmem:[#allocation8 + $0x7f8] sm:$0xff] %vm1020_vm1, %v1616_v58 }
 0x21f   :  { %1333 = vst.msk [vmem:[#allocation8 + $0x9b8] sm:$0xff] %vm1020_vm1, %v1616_v58  ;;  %v1632_v58 = vadd.f32 -1.0, %v892_v57 }
 0x220   :  { %1052 = vst [vmem:[#allocation8 + $0x100] sm:$0xff] %v1561_v60 }
 0x221   :  { %1165 = vst [vmem:[#allocation8 + $0x2c0] sm:$0xff] %v1561_v60 }
 0x222   :  { %1278 = vst [vmem:[#allocation8 + $0x480] sm:$0xff] %v1561_v60  ;;  %v1577_v60 = vadd.f32 -1.0, %v626_v59  ;;  %v710_v61 = vpop.f32.mrf.mxu2  ;;  %v895_v29 = vpop.f32.mrf.mxu3 }
 0x223   :  { %1108 = vst [vmem:[#allocation8 + $0x640] sm:$0xff] %v1617_v62 }
 0x224   :  { %1221 = vst [vmem:[#allocation8 + $0x800] sm:$0xff] %v1617_v62 }
 0x225   :  { %1334 = vst [vmem:[#allocation8 + $0x9c0] sm:$0xff] %v1617_v62  ;;  %v1633_v62 = vadd.f32 -1.0, %v710_v61  ;;  %v629_v31 = vpop.f32.mrf.mxu0  ;;  %v814_v2 = vpop.f32.mrf.mxu1 }
 0x226   :  { %1053 = vst.msk [vmem:[#allocation8 + $0x108] sm:$0xff] %vm1020_vm1, %v1562_v28 }
 0x227   :  { %1166 = vst.msk [vmem:[#allocation8 + $0x2c8] sm:$0xff] %vm1020_vm1, %v1562_v28 }
 0x228   :  { %1279 = vst.msk [vmem:[#allocation8 + $0x488] sm:$0xff] %vm1020_vm1, %v1562_v28  ;;  %v1578_v28 = vadd.f32 -1.0, %v811_v63 }
 0x229   :  { %1109 = vst.msk [vmem:[#allocation8 + $0x648] sm:$0xff] %vm1020_vm1, %v1618_v30 }
 0x22a   :  { %1222 = vst.msk [vmem:[#allocation8 + $0x808] sm:$0xff] %vm1020_vm1, %v1618_v30  ;;  %v713_v0 = vpop.f32.mrf.mxu2  ;;  %v898_v4 = vpop.f32.mrf.mxu3 }
 0x22b   :  { %1335 = vst.msk [vmem:[#allocation8 + $0x9c8] sm:$0xff] %vm1020_vm1, %v1618_v30  ;;  %v1634_v30 = vadd.f32 -1.0, %v895_v29 }
 0x22c   :  { %1054 = vst [vmem:[#allocation8 + $0x110] sm:$0xff] %v1563_v32 }
 0x22d   :  { %1167 = vst [vmem:[#allocation8 + $0x2d0] sm:$0xff] %v1563_v32  ;;  %v632_v6 = vpop.f32.mrf.mxu0  ;;  %v817_v10 = vpop.f32.mrf.mxu1 }
 0x22e   :  { %1280 = vst [vmem:[#allocation8 + $0x490] sm:$0xff] %v1563_v32  ;;  %v1579_v32 = vadd.f32 -1.0, %v629_v31 }
 0x22f   :  { %1110 = vst [vmem:[#allocation8 + $0x650] sm:$0xff] %v1619_v1 }
 0x230   :  { %1223 = vst [vmem:[#allocation8 + $0x810] sm:$0xff] %v1619_v1 }
 0x231   :  { %1336 = vst [vmem:[#allocation8 + $0x9d0] sm:$0xff] %v1619_v1  ;;  %v1635_v1 = vadd.f32 -1.0, %v713_v0 }
 0x232   :  { %1055 = vst.msk [vmem:[#allocation8 + $0x118] sm:$0xff] %vm1020_vm1, %v1564_v3  ;;  %v716_v8 = vpop.f32.mrf.mxu2  ;;  %v901_v12 = vpop.f32.mrf.mxu3 }
 0x233   :  { %1168 = vst.msk [vmem:[#allocation8 + $0x2d8] sm:$0xff] %vm1020_vm1, %v1564_v3 }
 0x234   :  { %1281 = vst.msk [vmem:[#allocation8 + $0x498] sm:$0xff] %vm1020_vm1, %v1564_v3  ;;  %v1580_v3 = vadd.f32 -1.0, %v814_v2 }
 0x235   :  { %1111 = vst.msk [vmem:[#allocation8 + $0x658] sm:$0xff] %vm1020_vm1, %v1620_v5  ;;  %v635_v14 = vpop.f32.mrf.mxu0  ;;  %v820_v18 = vpop.f32.mrf.mxu1 }
 0x236   :  { %1224 = vst.msk [vmem:[#allocation8 + $0x818] sm:$0xff] %vm1020_vm1, %v1620_v5 }
 0x237   :  { %1337 = vst.msk [vmem:[#allocation8 + $0x9d8] sm:$0xff] %vm1020_vm1, %v1620_v5  ;;  %v1636_v5 = vadd.f32 -1.0, %v898_v4 }
 0x238   :  { %1056 = vst [vmem:[#allocation8 + $0x120] sm:$0xff] %v1565_v7 }
 0x239   :  { %1169 = vst [vmem:[#allocation8 + $0x2e0] sm:$0xff] %v1565_v7 }
 0x23a   :  { %1282 = vst [vmem:[#allocation8 + $0x4a0] sm:$0xff] %v1565_v7  ;;  %v1581_v7 = vadd.f32 -1.0, %v632_v6  ;;  %v719_v16 = vpop.f32.mrf.mxu2  ;;  %v904_v20 = vpop.f32.mrf.mxu3 }
 0x23b   :  { %1112 = vst [vmem:[#allocation8 + $0x660] sm:$0xff] %v1621_v9 }
 0x23c   :  { %1225 = vst [vmem:[#allocation8 + $0x820] sm:$0xff] %v1621_v9 }
 0x23d   :  { %1338 = vst [vmem:[#allocation8 + $0x9e0] sm:$0xff] %v1621_v9  ;;  %v1637_v9 = vadd.f32 -1.0, %v716_v8 }
 0x23e   :  { %1057 = vst.msk [vmem:[#allocation8 + $0x128] sm:$0xff] %vm1020_vm1, %v1566_v11 }
 0x23f   :  { %1170 = vst.msk [vmem:[#allocation8 + $0x2e8] sm:$0xff] %vm1020_vm1, %v1566_v11 }
 0x240   :  { %1283 = vst.msk [vmem:[#allocation8 + $0x4a8] sm:$0xff] %vm1020_vm1, %v1566_v11  ;;  %v1582_v11 = vadd.f32 -1.0, %v817_v10 }
 0x241   :  { %1113 = vst.msk [vmem:[#allocation8 + $0x668] sm:$0xff] %vm1020_vm1, %v1622_v13 }
 0x242   :  { %1226 = vst.msk [vmem:[#allocation8 + $0x828] sm:$0xff] %vm1020_vm1, %v1622_v13 }
 0x243   :  { %1339 = vst.msk [vmem:[#allocation8 + $0x9e8] sm:$0xff] %vm1020_vm1, %v1622_v13  ;;  %v1638_v13 = vadd.f32 -1.0, %v901_v12 }
 0x244   :  { %1058 = vst [vmem:[#allocation8 + $0x130] sm:$0xff] %v1567_v15 }
 0x245   :  { %1171 = vst [vmem:[#allocation8 + $0x2f0] sm:$0xff] %v1567_v15 }
 0x246   :  { %1284 = vst [vmem:[#allocation8 + $0x4b0] sm:$0xff] %v1567_v15  ;;  %v1583_v15 = vadd.f32 -1.0, %v635_v14 }
 0x247   :  { %1114 = vst [vmem:[#allocation8 + $0x670] sm:$0xff] %v1623_v17 }
 0x248   :  { %1227 = vst [vmem:[#allocation8 + $0x830] sm:$0xff] %v1623_v17 }
 0x249   :  { %1340 = vst [vmem:[#allocation8 + $0x9f0] sm:$0xff] %v1623_v17  ;;  %v1639_v17 = vadd.f32 -1.0, %v719_v16 }
 0x24a   :  { %1059 = vst.msk [vmem:[#allocation8 + $0x138] sm:$0xff] %vm1020_vm1, %v1568_v19 }
 0x24b   :  { %1172 = vst.msk [vmem:[#allocation8 + $0x2f8] sm:$0xff] %vm1020_vm1, %v1568_v19 }
 0x24c   :  { %1285 = vst.msk [vmem:[#allocation8 + $0x4b8] sm:$0xff] %vm1020_vm1, %v1568_v19  ;;  %v1584_v19 = vadd.f32 -1.0, %v820_v18 }
 0x24d   :  { %1115 = vst.msk [vmem:[#allocation8 + $0x678] sm:$0xff] %vm1020_vm1, %v1624_v21 }
 0x24e   :  { %1228 = vst.msk [vmem:[#allocation8 + $0x838] sm:$0xff] %vm1020_vm1, %v1624_v21 }
 0x24f   :  { %1341 = vst.msk [vmem:[#allocation8 + $0x9f8] sm:$0xff] %vm1020_vm1, %v1624_v21  ;;  %v1640_v21 = vadd.f32 -1.0, %v904_v20 }
 0x250   :  { %1060 = vst [vmem:[#allocation8 + $0x140] sm:$0xff] %v1569_v23 }
 0x251   :  { %1173 = vst [vmem:[#allocation8 + $0x300] sm:$0xff] %v1569_v23 }
 0x252   :  { %1286 = vst [vmem:[#allocation8 + $0x4c0] sm:$0xff] %v1569_v23 }
 0x253   :  { %1116 = vst [vmem:[#allocation8 + $0x680] sm:$0xff] %v1625_v25 }
 0x254   :  { %1229 = vst [vmem:[#allocation8 + $0x840] sm:$0xff] %v1625_v25 }
 0x255   :  { %1342 = vst [vmem:[#allocation8 + $0xa00] sm:$0xff] %v1625_v25 }
 0x256   :  { %1061 = vst.msk [vmem:[#allocation8 + $0x148] sm:$0xff] %vm1020_vm1, %v1570_v27 }
 0x257   :  { %1174 = vst.msk [vmem:[#allocation8 + $0x308] sm:$0xff] %vm1020_vm1, %v1570_v27 }
 0x258   :  { %1287 = vst.msk [vmem:[#allocation8 + $0x4c8] sm:$0xff] %vm1020_vm1, %v1570_v27 }
 0x259   :  { %1117 = vst.msk [vmem:[#allocation8 + $0x688] sm:$0xff] %vm1020_vm1, %v1626_v34 }
 0x25a   :  { %1230 = vst.msk [vmem:[#allocation8 + $0x848] sm:$0xff] %vm1020_vm1, %v1626_v34 }
 0x25b   :  { %1343 = vst.msk [vmem:[#allocation8 + $0xa08] sm:$0xff] %vm1020_vm1, %v1626_v34 }
 0x25c   :  { %1062 = vst [vmem:[#allocation8 + $0x150] sm:$0xff] %v1571_v36 }
 0x25d   :  { %1175 = vst [vmem:[#allocation8 + $0x310] sm:$0xff] %v1571_v36 }
 0x25e   :  { %1288 = vst [vmem:[#allocation8 + $0x4d0] sm:$0xff] %v1571_v36 }
 0x25f   :  { %1118 = vst [vmem:[#allocation8 + $0x690] sm:$0xff] %v1627_v38 }
 0x260   :  { %1231 = vst [vmem:[#allocation8 + $0x850] sm:$0xff] %v1627_v38 }
 0x261   :  { %1344 = vst [vmem:[#allocation8 + $0xa10] sm:$0xff] %v1627_v38 }
 0x262   :  { %1063 = vst.msk [vmem:[#allocation8 + $0x158] sm:$0xff] %vm1020_vm1, %v1572_v40 }
 0x263   :  { %1176 = vst.msk [vmem:[#allocation8 + $0x318] sm:$0xff] %vm1020_vm1, %v1572_v40 }
 0x264   :  { %1289 = vst.msk [vmem:[#allocation8 + $0x4d8] sm:$0xff] %vm1020_vm1, %v1572_v40 }
 0x265   :  { %1119 = vst.msk [vmem:[#allocation8 + $0x698] sm:$0xff] %vm1020_vm1, %v1628_v42 }
 0x266   :  { %1232 = vst.msk [vmem:[#allocation8 + $0x858] sm:$0xff] %vm1020_vm1, %v1628_v42 }
 0x267   :  { %1345 = vst.msk [vmem:[#allocation8 + $0xa18] sm:$0xff] %vm1020_vm1, %v1628_v42 }
 0x268   :  { %1064 = vst [vmem:[#allocation8 + $0x160] sm:$0xff] %v1573_v44 }
 0x269   :  { %1177 = vst [vmem:[#allocation8 + $0x320] sm:$0xff] %v1573_v44 }
 0x26a   :  { %1290 = vst [vmem:[#allocation8 + $0x4e0] sm:$0xff] %v1573_v44 }
 0x26b   :  { %1120 = vst [vmem:[#allocation8 + $0x6a0] sm:$0xff] %v1629_v46 }
 0x26c   :  { %1233 = vst [vmem:[#allocation8 + $0x860] sm:$0xff] %v1629_v46 }
 0x26d   :  { %1346 = vst [vmem:[#allocation8 + $0xa20] sm:$0xff] %v1629_v46 }
 0x26e   :  { %1065 = vst.msk [vmem:[#allocation8 + $0x168] sm:$0xff] %vm1020_vm1, %v1574_v48 }
 0x26f   :  { %1178 = vst.msk [vmem:[#allocation8 + $0x328] sm:$0xff] %vm1020_vm1, %v1574_v48 }
 0x270   :  { %1291 = vst.msk [vmem:[#allocation8 + $0x4e8] sm:$0xff] %vm1020_vm1, %v1574_v48 }
 0x271   :  { %1121 = vst.msk [vmem:[#allocation8 + $0x6a8] sm:$0xff] %vm1020_vm1, %v1630_v50 }
 0x272   :  { %1234 = vst.msk [vmem:[#allocation8 + $0x868] sm:$0xff] %vm1020_vm1, %v1630_v50 }
 0x273   :  { %1347 = vst.msk [vmem:[#allocation8 + $0xa28] sm:$0xff] %vm1020_vm1, %v1630_v50 }
 0x274   :  { %1066 = vst [vmem:[#allocation8 + $0x170] sm:$0xff] %v1575_v52 }
 0x275   :  { %1179 = vst [vmem:[#allocation8 + $0x330] sm:$0xff] %v1575_v52 }
 0x276   :  { %1292 = vst [vmem:[#allocation8 + $0x4f0] sm:$0xff] %v1575_v52 }
 0x277   :  { %1122 = vst [vmem:[#allocation8 + $0x6b0] sm:$0xff] %v1631_v54 }
 0x278   :  { %1235 = vst [vmem:[#allocation8 + $0x870] sm:$0xff] %v1631_v54 }
 0x279   :  { %1348 = vst [vmem:[#allocation8 + $0xa30] sm:$0xff] %v1631_v54 }
 0x27a   :  { %1067 = vst.msk [vmem:[#allocation8 + $0x178] sm:$0xff] %vm1020_vm1, %v1576_v56 }
 0x27b   :  { %1180 = vst.msk [vmem:[#allocation8 + $0x338] sm:$0xff] %vm1020_vm1, %v1576_v56 }
 0x27c   :  { %1293 = vst.msk [vmem:[#allocation8 + $0x4f8] sm:$0xff] %vm1020_vm1, %v1576_v56 }
 0x27d   :  { %1123 = vst.msk [vmem:[#allocation8 + $0x6b8] sm:$0xff] %vm1020_vm1, %v1632_v58 }
 0x27e   :  { %1236 = vst.msk [vmem:[#allocation8 + $0x878] sm:$0xff] %vm1020_vm1, %v1632_v58 }
 0x27f   :  { %1349 = vst.msk [vmem:[#allocation8 + $0xa38] sm:$0xff] %vm1020_vm1, %v1632_v58 }
 0x280   :  { %1068 = vst [vmem:[#allocation8 + $0x180] sm:$0xff] %v1577_v60 }
 0x281   :  { %1181 = vst [vmem:[#allocation8 + $0x340] sm:$0xff] %v1577_v60 }
 0x282   :  { %1294 = vst [vmem:[#allocation8 + $0x500] sm:$0xff] %v1577_v60 }
 0x283   :  { %1124 = vst [vmem:[#allocation8 + $0x6c0] sm:$0xff] %v1633_v62 }
 0x284   :  { %1237 = vst [vmem:[#allocation8 + $0x880] sm:$0xff] %v1633_v62 }
 0x285   :  { %1350 = vst [vmem:[#allocation8 + $0xa40] sm:$0xff] %v1633_v62 }
 0x286   :  { %1069 = vst.msk [vmem:[#allocation8 + $0x188] sm:$0xff] %vm1020_vm1, %v1578_v28 }
 0x287   :  { %1182 = vst.msk [vmem:[#allocation8 + $0x348] sm:$0xff] %vm1020_vm1, %v1578_v28 }
 0x288   :  { %1295 = vst.msk [vmem:[#allocation8 + $0x508] sm:$0xff] %vm1020_vm1, %v1578_v28 }
 0x289   :  { %1125 = vst.msk [vmem:[#allocation8 + $0x6c8] sm:$0xff] %vm1020_vm1, %v1634_v30 }
 0x28a   :  { %1238 = vst.msk [vmem:[#allocation8 + $0x888] sm:$0xff] %vm1020_vm1, %v1634_v30 }
 0x28b   :  { %1351 = vst.msk [vmem:[#allocation8 + $0xa48] sm:$0xff] %vm1020_vm1, %v1634_v30 }
 0x28c   :  { %1070 = vst [vmem:[#allocation8 + $0x190] sm:$0xff] %v1579_v32 }
 0x28d   :  { %1183 = vst [vmem:[#allocation8 + $0x350] sm:$0xff] %v1579_v32 }
 0x28e   :  { %1296 = vst [vmem:[#allocation8 + $0x510] sm:$0xff] %v1579_v32 }
 0x28f   :  { %1126 = vst [vmem:[#allocation8 + $0x6d0] sm:$0xff] %v1635_v1 }
 0x290   :  { %1239 = vst [vmem:[#allocation8 + $0x890] sm:$0xff] %v1635_v1 }
 0x291   :  { %1352 = vst [vmem:[#allocation8 + $0xa50] sm:$0xff] %v1635_v1 }
 0x292   :  { %1071 = vst.msk [vmem:[#allocation8 + $0x198] sm:$0xff] %vm1020_vm1, %v1580_v3 }
 0x293   :  { %1184 = vst.msk [vmem:[#allocation8 + $0x358] sm:$0xff] %vm1020_vm1, %v1580_v3 }
 0x294   :  { %1297 = vst.msk [vmem:[#allocation8 + $0x518] sm:$0xff] %vm1020_vm1, %v1580_v3 }
 0x295   :  { %1127 = vst.msk [vmem:[#allocation8 + $0x6d8] sm:$0xff] %vm1020_vm1, %v1636_v5 }
 0x296   :  { %1240 = vst.msk [vmem:[#allocation8 + $0x898] sm:$0xff] %vm1020_vm1, %v1636_v5 }
 0x297   :  { %1353 = vst.msk [vmem:[#allocation8 + $0xa58] sm:$0xff] %vm1020_vm1, %v1636_v5 }
 0x298   :  { %1072 = vst [vmem:[#allocation8 + $0x1a0] sm:$0xff] %v1581_v7 }
 0x299   :  { %1185 = vst [vmem:[#allocation8 + $0x360] sm:$0xff] %v1581_v7 }
 0x29a   :  { %1298 = vst [vmem:[#allocation8 + $0x520] sm:$0xff] %v1581_v7 }
 0x29b   :  { %1128 = vst [vmem:[#allocation8 + $0x6e0] sm:$0xff] %v1637_v9 }
 0x29c   :  { %1241 = vst [vmem:[#allocation8 + $0x8a0] sm:$0xff] %v1637_v9 }
 0x29d   :  { %1354 = vst [vmem:[#allocation8 + $0xa60] sm:$0xff] %v1637_v9 }
 0x29e   :  { %1073 = vst.msk [vmem:[#allocation8 + $0x1a8] sm:$0xff] %vm1020_vm1, %v1582_v11 }
 0x29f   :  { %1186 = vst.msk [vmem:[#allocation8 + $0x368] sm:$0xff] %vm1020_vm1, %v1582_v11 }
 0x2a0   :  { %1299 = vst.msk [vmem:[#allocation8 + $0x528] sm:$0xff] %vm1020_vm1, %v1582_v11 }
 0x2a1   :  { %1129 = vst.msk [vmem:[#allocation8 + $0x6e8] sm:$0xff] %vm1020_vm1, %v1638_v13 }
 0x2a2   :  { %1242 = vst.msk [vmem:[#allocation8 + $0x8a8] sm:$0xff] %vm1020_vm1, %v1638_v13 }
 0x2a3   :  { %1355 = vst.msk [vmem:[#allocation8 + $0xa68] sm:$0xff] %vm1020_vm1, %v1638_v13 }
 0x2a4   :  { %1074 = vst [vmem:[#allocation8 + $0x1b0] sm:$0xff] %v1583_v15 }
 0x2a5   :  { %1187 = vst [vmem:[#allocation8 + $0x370] sm:$0xff] %v1583_v15 }
 0x2a6   :  { %1300 = vst [vmem:[#allocation8 + $0x530] sm:$0xff] %v1583_v15 }
 0x2a7   :  { %1130 = vst [vmem:[#allocation8 + $0x6f0] sm:$0xff] %v1639_v17 }
 0x2a8   :  { %1243 = vst [vmem:[#allocation8 + $0x8b0] sm:$0xff] %v1639_v17 }
 0x2a9   :  { %1356 = vst [vmem:[#allocation8 + $0xa70] sm:$0xff] %v1639_v17 }
 0x2aa   :  { %1075 = vst.msk [vmem:[#allocation8 + $0x1b8] sm:$0xff] %vm1020_vm1, %v1584_v19 }
 0x2ab   :  { %1188 = vst.msk [vmem:[#allocation8 + $0x378] sm:$0xff] %vm1020_vm1, %v1584_v19 }
 0x2ac   :  { %1301 = vst.msk [vmem:[#allocation8 + $0x538] sm:$0xff] %vm1020_vm1, %v1584_v19 }
 0x2ad   :  { %1131 = vst.msk [vmem:[#allocation8 + $0x6f8] sm:$0xff] %vm1020_vm1, %v1640_v21 }
 0x2ae   :  { %1244 = vst.msk [vmem:[#allocation8 + $0x8b8] sm:$0xff] %vm1020_vm1, %v1640_v21 }
 0x2af   :  { %1357 = vst.msk [vmem:[#allocation8 + $0xa78] sm:$0xff] %vm1020_vm1, %v1640_v21 }
 0x2b0   :  { %1370 = dma.vmem_to_hbm [thread:$0]  %s1363_s4, 43008, %s1365_s7, [#allocation5], %s1761_s24, %s1761_s24, %s1762_s25  }
 0x2b1   :  { %1751 = dma.done.wait [#allocation5], 43008  }
 0x2b2   :  { %1752 = vsyncadd [#allocation5], 4294924288 }
 0x2b3   :  { %1375 = vsyncpa [#allocation4], 1 }
 0x2b4   :  { %1376 = vsyncpa [#allocation7], 1 }
 0x2b5   :  { %1377 = vsyncpa [#allocation5], 1 }

// kernel: tpu_custom_call.1
= control target key start
LH: loop header
LB: loop body
LE: loop exit
PB: predicated region body
PF: predicated region fallthrough
CT: control target
= control target key end

     0   :  { %8 = vsyncpa [#allocation4], 0  ;;  %s2343_s0 = inlined_call_operand.hbm [shape: u8[2,16,16], index: 0, kind: input, shape index: {}]   ;;  %s2344_s1 = inlined_call_operand.vmem [shape: f32[224,16], index: 1, kind: input, shape index: {}]   ;;  %s2345_s2 = inlined_call_operand.hbm [shape: f32[16,224], index: 2, kind: input, shape index: {}]   ;;  %s2346_s3 = inlined_call_operand.hbm [shape: f32[2,3,224,224], index: 3, kind: output, shape index: {}]  }
   0x1   :  { %9 = vsyncpa [#allocation7], 0 }
   0x2   :  { %10 = vsyncpa [#allocation5], 0  ;;  %s15_s14 = sshll.u32 %s2343_s0, 4  ;;  %s1757_s15 = smov [#allocation3]   ;;  %s16_s14 = int_to_ptr.hbm [resolvable:$true] %s15_s14 }
   0x3   :  { %s17_s16 = sshll.u32 %s1757_s15, 4  ;;  %s30_s19 = sshll.u32 %s2345_s2, 4  ;;  %s18_s16 = int_to_ptr.vmem [resolvable:$true] %s17_s16  ;;  %s31_s19 = int_to_ptr.hbm [resolvable:$true] %s30_s19 }
   0x4   :  { %s1758_s20 = smov 32   ;;  %s1759_s21 = smov 2  }
   0x5   :  { %23 = dma.hbm_to_vmem [thread:$0]  %s16_s14, 128, %s18_s16, [#allocation4], %s1758_s20, %s1758_s20, %s1759_s21  }
   0x6   :  { %s1760_s22 = smov [#allocation6]   ;;  %s1761_s24 = smov 256  }
   0x7   :  { %s32_s23 = sshll.u32 %s1760_s22, 4  ;;  %s1762_s25 = smov 16   ;;  %s33_s23 = int_to_ptr.vmem [resolvable:$true] %s32_s23 }
   0x8   :  { %38 = dma.hbm_to_vmem [thread:$0]  %s31_s19, 512, %s33_s23, [#allocation7], %s1761_s24, %s1761_s24, %s1762_s25  }
   0x9   :  { %1747 = dma.done.wait [#allocation4], 128  }
   0xa   :  { %1748 = vsyncadd [#allocation4], 4294967168 }
   0xb   :  { %1749 = dma.done.wait [#allocation7], 512  }
   0xc   :  { %1750 = vsyncadd [#allocation7], 4294966784  ;;  %v1796_v0 = vld [vmem:[%s2344_s1] sm:$0xff]  ;;  %v1801_v1 = vld [vmem:[%s2344_s1 + $0x8] sm:$0xff]  ;;  %s1933_s2 = smov 0  }
   0xd   :  { %v1806_v2 = vld [vmem:[%s2344_s1 + $0x10] sm:$0xff]  ;;  %v1811_v3 = vld [vmem:[%s2344_s1 + $0x18] sm:$0xff]  ;;  %v1816_v4 = vld [vmem:[%s2344_s1 + $0x20] sm:$0xff] }
   0xe   :  { %v1821_v5 = vld [vmem:[%s2344_s1 + $0x28] sm:$0xff]  ;;  %v1826_v6 = vld [vmem:[%s2344_s1 + $0x30] sm:$0xff]  ;;  %v1831_v7 = vld [vmem:[%s2344_s1 + $0x38] sm:$0xff] }
   0xf   :  { %v1836_v8 = vld [vmem:[%s2344_s1 + $0x40] sm:$0xff]  ;;  %v1841_v9 = vld [vmem:[%s2344_s1 + $0x48] sm:$0xff]  ;;  %v1846_v10 = vld [vmem:[%s2344_s1 + $0x50] sm:$0xff] }
  0x10   :  { %v1851_v11 = vld [vmem:[%s2344_s1 + $0x58] sm:$0xff]  ;;  %v1856_v12 = vld [vmem:[%s2344_s1 + $0x60] sm:$0xff]  ;;  %v1861_v13 = vld [vmem:[%s2344_s1 + $0x68] sm:$0xff] }
  0x11   :  { %v1866_v14 = vld [vmem:[%s2344_s1 + $0x70] sm:$0xff]  ;;  %v1871_v15 = vld [vmem:[%s2344_s1 + $0x78] sm:$0xff]  ;;  %v1876_v16 = vld [vmem:[%s2344_s1 + $0x80] sm:$0xff] }
  0x12   :  { %v1881_v17 = vld [vmem:[%s2344_s1 + $0x88] sm:$0xff]  ;;  %v1886_v18 = vld [vmem:[%s2344_s1 + $0x90] sm:$0xff]  ;;  %v1891_v19 = vld [vmem:[%s2344_s1 + $0x98] sm:$0xff] }
  0x13   :  { %v1896_v20 = vld [vmem:[%s2344_s1 + $0xa0] sm:$0xff]  ;;  %v1901_v21 = vld [vmem:[%s2344_s1 + $0xa8] sm:$0xff]  ;;  %v1906_v22 = vld [vmem:[%s2344_s1 + $0xb0] sm:$0xff] }
  0x14   :  { %v1911_v23 = vld [vmem:[%s2344_s1 + $0xb8] sm:$0xff]  ;;  %v1916_v24 = vld [vmem:[%s2344_s1 + $0xc0] sm:$0xff]  ;;  %v1921_v25 = vld [vmem:[%s2344_s1 + $0xc8] sm:$0xff] }
  0x15   :  { %v1926_v26 = vld [vmem:[%s2344_s1 + $0xd0] sm:$0xff]  ;;  %v1931_v27 = vld [vmem:[%s2344_s1 + $0xd8] sm:$0xff] }
  0x16 LB: > { %s1641_s27 = sshll.u32 %s1755_s2, 2  ;;  %vm92_vm0 = vcmask 130048   ;;  %s278_s1 = smul.u32 224, %s1755_s2  ;;  %s1755_s2 = sphi %s1933_s2, %s80_s2  }
  0x17   : > { %s83_s28 = scalar_lea.vmem [#allocation3], %s1641_s27  ;;  %s80_s2 = sadd.s32 1, %s1755_s2  }
  0x18   : > { %v1643_v28 = vld [vmem:[%s83_s28] sm:$0xf]   ;;  %s1996_s29 = scalar_lea.vmem [#allocation2], %s278_s1  ;;  %p77_p0 = scmp.ge.s32.totalorder %s80_s2, 2  }
  0x19   : > { %v1645_v29 = vunpack.c.1.s8 %v1643_v28  ;;  %v1644_v30 = vunpack.c.0.s8 %v1643_v28  ;;  %v366_v63 = vld [vmem:[#allocation6 + $0x10] sm:$0xff] (%p77_p0)  ;;  %v367_v28 = vld [vmem:[#allocation6 + $0x18] sm:$0xff] (%p77_p0)  ;;  %vm1020_vm1 = vcmask (%p77_p0), 785408   ;;  %s1763_s30 = smov (%p77_p0), [#allocation8]   ;;  %s1364_s7 = sshll.u32 (%p77_p0), %s2346_s3, 4  ;;  %s1365_s7 = int_to_ptr.hbm [resolvable:$true] %s1364_s7 }
  0x1a   :  { %s1362_s4 = sshll.u32 (%p77_p0), %s1763_s30, 4  ;;  %s1363_s4 = int_to_ptr.vmem [resolvable:$true] %s1362_s4 }
  0x1b   : > { %v89_v31 = vand.u32 255, %v1645_v29  ;;  %v88_v32 = vand.u32 255, %v1644_v30  ;;  %v364_v29 = vld [vmem:[#allocation6] sm:$0xff] (%p77_p0)  ;;  %v365_v30 = vld [vmem:[#allocation6 + $0x8] sm:$0xff] (%p77_p0) }
  0x1d   : > { %v91_v33 = vcvt.s32.f32 %v89_v31  ;;  %v90_v34 = vcvt.s32.f32 %v88_v32 }
  0x1f   : > { %1647 = vmatpush.msra.mxu2 %v91_v33  ;;  %1648 = vmatpush.msra.mxu3 %v91_v33 }
  0x20   : > { %191 = vmatpush.msra.mxu0 %v91_v33  ;;  %1646 = vmatpush.msra.mxu1 %v91_v33 }
  0x21   : > { %1650 = vmatpush.msra.mxu2 %v90_v34  ;;  %1651 = vmatpush.msra.mxu3 %v90_v34 }
  0x22   : > { %1403 = vmatmul.msk.f32.vlgmr.msra.gmra.mxu2 %vm92_vm0, %v1866_v14  ;;  %1410 = vmatmul.msk.f32.vlgmr.msra.gmra.mxu3 %vm92_vm0, %v1901_v21 }
  0x23   : > { %192 = vmatpush.msra.mxu0 %v90_v34  ;;  %1649 = vmatpush.msra.mxu1 %v90_v34 }
  0x24   : > { %1389 = vmatmul.msk.f32.vlgmr.msra.gmra.mxu0 %vm92_vm0, %v1796_v0  ;;  %1396 = vmatmul.msk.f32.vlgmr.msra.gmra.mxu1 %vm92_vm0, %v1831_v7 }
  0x25   :  { %1652 = vmatpush.msra.mxu2 (%p77_p0), %v366_v63  ;;  %1654 = vmatpush.msra.mxu3 (%p77_p0), %v367_v28 }
  0x26   :  { %551 = vmatpush.msra.mxu0 (%p77_p0), %v366_v63  ;;  %736 = vmatpush.msra.mxu1 (%p77_p0), %v367_v28 }
  0x27   :  { %1653 = vmatpush.msra.mxu2 (%p77_p0), %v364_v29  ;;  %1655 = vmatpush.msra.mxu3 (%p77_p0), %v365_v30 }
  0x28   :  { %552 = vmatpush.msra.mxu0 (%p77_p0), %v364_v29  ;;  %737 = vmatpush.msra.mxu1 (%p77_p0), %v365_v30 }
  0x2a   : > { %1404 = vmatmul.msk.f32.gmra.mxu2 %vm92_vm0, %v1871_v15  ;;  %1411 = vmatmul.msk.f32.gmra.mxu3 %vm92_vm0, %v1906_v22 }
  0x2c   : > { %1390 = vmatmul.msk.f32.gmra.mxu0 %vm92_vm0, %v1801_v1  ;;  %1397 = vmatmul.msk.f32.gmra.mxu1 %vm92_vm0, %v1836_v8 }
  0x32   : > { %1405 = vmatmul.msk.f32.gmra.mxu2 %vm92_vm0, %v1876_v16  ;;  %1412 = vmatmul.msk.f32.gmra.mxu3 %vm92_vm0, %v1911_v23 }
  0x34   : > { %1391 = vmatmul.msk.f32.gmra.mxu0 %vm92_vm0, %v1806_v2  ;;  %1398 = vmatmul.msk.f32.gmra.mxu1 %vm92_vm0, %v1841_v9 }
  0x3a   : > { %1406 = vmatmul.msk.f32.gmra.mxu2 %vm92_vm0, %v1881_v17  ;;  %1413 = vmatmul.msk.f32.gmra.mxu3 %vm92_vm0, %v1916_v24 }
  0x3c   : > { %1392 = vmatmul.msk.f32.gmra.mxu0 %vm92_vm0, %v1811_v3  ;;  %1399 = vmatmul.msk.f32.gmra.mxu1 %vm92_vm0, %v1846_v10 }
  0x42   : > { %1407 = vmatmul.msk.f32.gmra.mxu2 %vm92_vm0, %v1886_v18  ;;  %1414 = vmatmul.msk.f32.gmra.mxu3 %vm92_vm0, %v1921_v25 }
  0x44   : > { %1393 = vmatmul.msk.f32.gmra.mxu0 %vm92_vm0, %v1816_v4  ;;  %1400 = vmatmul.msk.f32.gmra.mxu1 %vm92_vm0, %v1851_v11 }
  0x4a   : > { %1408 = vmatmul.msk.f32.gmra.mxu2 %vm92_vm0, %v1891_v19  ;;  %1415 = vmatmul.msk.f32.gmra.mxu3 %vm92_vm0, %v1926_v26 }
  0x4c   : > { %1394 = vmatmul.msk.f32.gmra.mxu0 %vm92_vm0, %v1821_v5  ;;  %1401 = vmatmul.msk.f32.gmra.mxu1 %vm92_vm0, %v1856_v12 }
  0x52   : > { %1409 = vmatmul.msk.f32.gmra.mxu2 %vm92_vm0, %v1896_v20  ;;  %1416 = vmatmul.msk.f32.gmra.mxu3 %vm92_vm0, %v1931_v27 }
  0x54   : > { %1395 = vmatmul.msk.f32.gmra.mxu0 %vm92_vm0, %v1826_v6  ;;  %1402 = vmatmul.msk.f32.gmra.mxu1 %vm92_vm0, %v1861_v13 }
  0xa1   : > { %v194_v35 = vpop.f32.mrf.mxu0  ;;  %v215_v36 = vpop.f32.mrf.mxu1 }
  0xa2   : > { %280 = vst.msk [vmem:[%s1996_s29] sm:$0xff] %vm92_vm0, %v194_v35 }
  0xa3   : > { %287 = vst.msk [vmem:[%s1996_s29 + $0x38] sm:$0xff] %vm92_vm0, %v215_v36 }
  0xa5   : > { %v236_v37 = vpop.f32.mrf.mxu2  ;;  %v257_v38 = vpop.f32.mrf.mxu3 }
  0xa6   : > { %294 = vst.msk [vmem:[%s1996_s29 + $0x70] sm:$0xff] %vm92_vm0, %v236_v37 }
  0xa7   : > { %301 = vst.msk [vmem:[%s1996_s29 + $0xa8] sm:$0xff] %vm92_vm0, %v257_v38 }
  0xa9   : > { %v197_v39 = vpop.f32.mrf.mxu0  ;;  %v218_v40 = vpop.f32.mrf.mxu1 }
  0xaa   : > { %281 = vst.msk [vmem:[%s1996_s29 + $0x8] sm:$0xff] %vm92_vm0, %v197_v39 }
  0xab   : > { %288 = vst.msk [vmem:[%s1996_s29 + $0x40] sm:$0xff] %vm92_vm0, %v218_v40 }
  0xad   : > { %v239_v41 = vpop.f32.mrf.mxu2  ;;  %v260_v42 = vpop.f32.mrf.mxu3 }
  0xae   : > { %295 = vst.msk [vmem:[%s1996_s29 + $0x78] sm:$0xff] %vm92_vm0, %v239_v41 }
  0xaf   : > { %302 = vst.msk [vmem:[%s1996_s29 + $0xb0] sm:$0xff] %vm92_vm0, %v260_v42 }
  0xb1   : > { %v200_v43 = vpop.f32.mrf.mxu0  ;;  %v221_v44 = vpop.f32.mrf.mxu1 }
  0xb2   : > { %282 = vst.msk [vmem:[%s1996_s29 + $0x10] sm:$0xff] %vm92_vm0, %v200_v43 }
  0xb3   : > { %289 = vst.msk [vmem:[%s1996_s29 + $0x48] sm:$0xff] %vm92_vm0, %v221_v44 }
  0xb5   : > { %v242_v45 = vpop.f32.mrf.mxu2  ;;  %v263_v46 = vpop.f32.mrf.mxu3 }
  0xb6   : > { %296 = vst.msk [vmem:[%s1996_s29 + $0x80] sm:$0xff] %vm92_vm0, %v242_v45 }
  0xb7   : > { %303 = vst.msk [vmem:[%s1996_s29 + $0xb8] sm:$0xff] %vm92_vm0, %v263_v46 }
  0xb9   : > { %v203_v47 = vpop.f32.mrf.mxu0  ;;  %v224_v48 = vpop.f32.mrf.mxu1 }
  0xba   : > { %283 = vst.msk [vmem:[%s1996_s29 + $0x18] sm:$0xff] %vm92_vm0, %v203_v47 }
  0xbb   : > { %290 = vst.msk [vmem:[%s1996_s29 + $0x50] sm:$0xff] %vm92_vm0, %v224_v48 }
  0xbd   : > { %v245_v49 = vpop.f32.mrf.mxu2  ;;  %v266_v50 = vpop.f32.mrf.mxu3 }
  0xbe   : > { %297 = vst.msk [vmem:[%s1996_s29 + $0x88] sm:$0xff] %vm92_vm0, %v245_v49 }
  0xbf   : > { %304 = vst.msk [vmem:[%s1996_s29 + $0xc0] sm:$0xff] %vm92_vm0, %v266_v50 }
  0xc1   : > { %v206_v51 = vpop.f32.mrf.mxu0  ;;  %v227_v52 = vpop.f32.mrf.mxu1 }
  0xc2   : > { %284 = vst.msk [vmem:[%s1996_s29 + $0x20] sm:$0xff] %vm92_vm0, %v206_v51 }
  0xc3   : > { %291 = vst.msk [vmem:[%s1996_s29 + $0x58] sm:$0xff] %vm92_vm0, %v227_v52 }
  0xc5   : > { %v248_v53 = vpop.f32.mrf.mxu2  ;;  %v269_v54 = vpop.f32.mrf.mxu3 }
  0xc6   : > { %298 = vst.msk [vmem:[%s1996_s29 + $0x90] sm:$0xff] %vm92_vm0, %v248_v53 }
  0xc7   : > { %305 = vst.msk [vmem:[%s1996_s29 + $0xc8] sm:$0xff] %vm92_vm0, %v269_v54 }
  0xc9   : > { %v209_v55 = vpop.f32.mrf.mxu0  ;;  %v230_v56 = vpop.f32.mrf.mxu1 }
  0xca   : > { %285 = vst.msk [vmem:[%s1996_s29 + $0x28] sm:$0xff] %vm92_vm0, %v209_v55 }
  0xcb   : > { %292 = vst.msk [vmem:[%s1996_s29 + $0x60] sm:$0xff] %vm92_vm0, %v230_v56 }
  0xcd   : > { %v251_v57 = vpop.f32.mrf.mxu2  ;;  %v272_v58 = vpop.f32.mrf.mxu3 }
  0xce   : > { %299 = vst.msk [vmem:[%s1996_s29 + $0x98] sm:$0xff] %vm92_vm0, %v251_v57 }
  0xcf   : > { %306 = vst.msk [vmem:[%s1996_s29 + $0xd0] sm:$0xff] %vm92_vm0, %v272_v58 }
  0xd1   : > { %v212_v59 = vpop.f32.mrf.mxu0  ;;  %v233_v60 = vpop.f32.mrf.mxu1 }
  0xd2   : > { %286 = vst.msk [vmem:[%s1996_s29 + $0x30] sm:$0xff] %vm92_vm0, %v212_v59 }
  0xd3   : > { %293 = vst.msk [vmem:[%s1996_s29 + $0x68] sm:$0xff] %vm92_vm0, %v233_v60  ;;  %79 = sbr.rel (!%p77_p0) target bundleno = 22 (0x16), region = 51 }
  0xd5   : > { %v254_v61 = vpop.f32.mrf.mxu2  ;;  %v275_v62 = vpop.f32.mrf.mxu3 }
  0xd6   : > { %300 = vst.msk [vmem:[%s1996_s29 + $0xa0] sm:$0xff] %vm92_vm0, %v254_v61 }
  0xd7   : > { %307 = vst.msk [vmem:[%s1996_s29 + $0xd8] sm:$0xff] %vm92_vm0, %v275_v62 }
  0xde   :  { %v336_v31 = vld [vmem:[#allocation2 + $0xe0] sm:$0xff]  ;;  %v337_v0 = vld [vmem:[#allocation2 + $0xe8] sm:$0xff]  ;;  %v338_v2 = vld [vmem:[#allocation2 + $0xf0] sm:$0xff] }
  0xdf   :  { %v308_v32 = vld [vmem:[#allocation2] sm:$0xff]  ;;  %1445 = vmatmul.msk.f32.vlgmr.msra.gmra.mxu2 %vm92_vm0, %v336_v31  ;;  %1501 = vmatmul.msk.f32.vlgmr.msra.gmra.mxu3 %vm92_vm0, %v336_v31  ;;  %v309_v1 = vld [vmem:[#allocation2 + $0x8] sm:$0xff]  ;;  %v310_v3 = vld [vmem:[#allocation2 + $0x10] sm:$0xff] }
  0xe0   :  { %1417 = vmatmul.msk.f32.vlgmr.msra.gmra.mxu0 %vm92_vm0, %v308_v32  ;;  %1473 = vmatmul.msk.f32.vlgmr.msra.gmra.mxu1 %vm92_vm0, %v308_v32  ;;  %v339_v4 = vld [vmem:[#allocation2 + $0xf8] sm:$0xff]  ;;  %v340_v6 = vld [vmem:[#allocation2 + $0x100] sm:$0xff]  ;;  %v341_v8 = vld [vmem:[#allocation2 + $0x108] sm:$0xff] }
  0xe1   :  { %v311_v5 = vld [vmem:[#allocation2 + $0x18] sm:$0xff]  ;;  %v312_v7 = vld [vmem:[#allocation2 + $0x20] sm:$0xff]  ;;  %v313_v9 = vld [vmem:[#allocation2 + $0x28] sm:$0xff] }
  0xe2   :  { %v342_v10 = vld [vmem:[#allocation2 + $0x110] sm:$0xff]  ;;  %v343_v12 = vld [vmem:[#allocation2 + $0x118] sm:$0xff]  ;;  %v344_v14 = vld [vmem:[#allocation2 + $0x120] sm:$0xff] }
  0xe3   :  { %v314_v11 = vld [vmem:[#allocation2 + $0x30] sm:$0xff]  ;;  %v315_v13 = vld [vmem:[#allocation2 + $0x38] sm:$0xff]  ;;  %v316_v15 = vld [vmem:[#allocation2 + $0x40] sm:$0xff] }
  0xe4   :  { %v345_v16 = vld [vmem:[#allocation2 + $0x128] sm:$0xff]  ;;  %v346_v18 = vld [vmem:[#allocation2 + $0x130] sm:$0xff]  ;;  %v347_v20 = vld [vmem:[#allocation2 + $0x138] sm:$0xff] }
  0xe5   :  { %v317_v17 = vld [vmem:[#allocation2 + $0x48] sm:$0xff]  ;;  %v318_v19 = vld [vmem:[#allocation2 + $0x50] sm:$0xff]  ;;  %v319_v21 = vld [vmem:[#allocation2 + $0x58] sm:$0xff] }
  0xe6   :  { %v348_v22 = vld [vmem:[#allocation2 + $0x140] sm:$0xff]  ;;  %v349_v24 = vld [vmem:[#allocation2 + $0x148] sm:$0xff]  ;;  %v350_v26 = vld [vmem:[#allocation2 + $0x150] sm:$0xff] }
  0xe7   :  { %1446 = vmatmul.msk.f32.gmra.mxu2 %vm92_vm0, %v337_v0  ;;  %1502 = vmatmul.msk.f32.gmra.mxu3 %vm92_vm0, %v337_v0  ;;  %v320_v23 = vld [vmem:[#allocation2 + $0x60] sm:$0xff]  ;;  %v321_v25 = vld [vmem:[#allocation2 + $0x68] sm:$0xff]  ;;  %v322_v27 = vld [vmem:[#allocation2 + $0x70] sm:$0xff] }
  0xe8   :  { %1418 = vmatmul.msk.f32.gmra.mxu0 %vm92_vm0, %v309_v1  ;;  %1474 = vmatmul.msk.f32.gmra.mxu1 %vm92_vm0, %v309_v1  ;;  %v351_v33 = vld [vmem:[#allocation2 + $0x158] sm:$0xff]  ;;  %v352_v35 = vld [vmem:[#allocation2 + $0x160] sm:$0xff]  ;;  %v353_v44 = vld [vmem:[#allocation2 + $0x168] sm:$0xff] }
  0xe9   :  { %v323_v34 = vld [vmem:[#allocation2 + $0x78] sm:$0xff]  ;;  %v324_v38 = vld [vmem:[#allocation2 + $0x80] sm:$0xff]  ;;  %v325_v47 = vld [vmem:[#allocation2 + $0x88] sm:$0xff] }
  0xea   :  { %v354_v52 = vld [vmem:[#allocation2 + $0x170] sm:$0xff]  ;;  %v355_v58 = vld [vmem:[#allocation2 + $0x178] sm:$0xff]  ;;  %v356_v30 = vld [vmem:[#allocation2 + $0x180] sm:$0xff] }
  0xeb   :  { %v326_v53 = vld [vmem:[#allocation2 + $0x90] sm:$0xff]  ;;  %v327_v61 = vld [vmem:[#allocation2 + $0x98] sm:$0xff]  ;;  %v328_v0 = vld [vmem:[#allocation2 + $0xa0] sm:$0xff] }
  0xef   :  { %1447 = vmatmul.msk.f32.gmra.mxu2 %vm92_vm0, %v338_v2  ;;  %1503 = vmatmul.msk.f32.gmra.mxu3 %vm92_vm0, %v338_v2 }
  0xf0   :  { %1419 = vmatmul.msk.f32.gmra.mxu0 %vm92_vm0, %v310_v3  ;;  %1475 = vmatmul.msk.f32.gmra.mxu1 %vm92_vm0, %v310_v3 }
  0xf7   :  { %1448 = vmatmul.msk.f32.gmra.mxu2 %vm92_vm0, %v339_v4  ;;  %1504 = vmatmul.msk.f32.gmra.mxu3 %vm92_vm0, %v339_v4 }
  0xf8   :  { %1420 = vmatmul.msk.f32.gmra.mxu0 %vm92_vm0, %v311_v5  ;;  %1476 = vmatmul.msk.f32.gmra.mxu1 %vm92_vm0, %v311_v5  ;;  %v357_v5 = vld [vmem:[#allocation2 + $0x188] sm:$0xff] }
  0xff   :  { %1449 = vmatmul.msk.f32.gmra.mxu2 %vm92_vm0, %v340_v6  ;;  %1505 = vmatmul.msk.f32.gmra.mxu3 %vm92_vm0, %v340_v6 }
 0x100   :  { %1421 = vmatmul.msk.f32.gmra.mxu0 %vm92_vm0, %v312_v7  ;;  %1477 = vmatmul.msk.f32.gmra.mxu1 %vm92_vm0, %v312_v7 }
 0x107   :  { %1450 = vmatmul.msk.f32.gmra.mxu2 %vm92_vm0, %v341_v8  ;;  %1506 = vmatmul.msk.f32.gmra.mxu3 %vm92_vm0, %v341_v8  ;;  %v329_v8 = vld [vmem:[#allocation2 + $0xa8] sm:$0xff] }
 0x108   :  { %1422 = vmatmul.msk.f32.gmra.mxu0 %vm92_vm0, %v313_v9  ;;  %1478 = vmatmul.msk.f32.gmra.mxu1 %vm92_vm0, %v313_v9 }
 0x10f   :  { %1451 = vmatmul.msk.f32.gmra.mxu2 %vm92_vm0, %v342_v10  ;;  %1507 = vmatmul.msk.f32.gmra.mxu3 %vm92_vm0, %v342_v10 }
 0x110   :  { %1423 = vmatmul.msk.f32.gmra.mxu0 %vm92_vm0, %v314_v11  ;;  %1479 = vmatmul.msk.f32.gmra.mxu1 %vm92_vm0, %v314_v11  ;;  %v358_v11 = vld [vmem:[#allocation2 + $0x190] sm:$0xff] }
 0x117   :  { %1452 = vmatmul.msk.f32.gmra.mxu2 %vm92_vm0, %v343_v12  ;;  %1508 = vmatmul.msk.f32.gmra.mxu3 %vm92_vm0, %v343_v12 }
 0x118   :  { %1424 = vmatmul.msk.f32.gmra.mxu0 %vm92_vm0, %v315_v13  ;;  %1480 = vmatmul.msk.f32.gmra.mxu1 %vm92_vm0, %v315_v13 }
 0x11f   :  { %1453 = vmatmul.msk.f32.gmra.mxu2 %vm92_vm0, %v344_v14  ;;  %1509 = vmatmul.msk.f32.gmra.mxu3 %vm92_vm0, %v344_v14 }
 0x120   :  { %1425 = vmatmul.msk.f32.gmra.mxu0 %vm92_vm0, %v316_v15  ;;  %1481 = vmatmul.msk.f32.gmra.mxu1 %vm92_vm0, %v316_v15 }
 0x127   :  { %1454 = vmatmul.msk.f32.gmra.mxu2 %vm92_vm0, %v345_v16  ;;  %1510 = vmatmul.msk.f32.gmra.mxu3 %vm92_vm0, %v345_v16 }
 0x128   :  { %1426 = vmatmul.msk.f32.gmra.mxu0 %vm92_vm0, %v317_v17  ;;  %1482 = vmatmul.msk.f32.gmra.mxu1 %vm92_vm0, %v317_v17 }
 0x12f   :  { %1455 = vmatmul.msk.f32.gmra.mxu2 %vm92_vm0, %v346_v18  ;;  %1511 = vmatmul.msk.f32.gmra.mxu3 %vm92_vm0, %v346_v18  ;;  %v330_v18 = vld [vmem:[#allocation2 + $0xb0] sm:$0xff] }
 0x130   :  { %1427 = vmatmul.msk.f32.gmra.mxu0 %vm92_vm0, %v318_v19  ;;  %1483 = vmatmul.msk.f32.gmra.mxu1 %vm92_vm0, %v318_v19  ;;  %v359_v19 = vld [vmem:[#allocation2 + $0x198] sm:$0xff] }
 0x137   :  { %1456 = vmatmul.msk.f32.gmra.mxu2 %vm92_vm0, %v347_v20  ;;  %1512 = vmatmul.msk.f32.gmra.mxu3 %vm92_vm0, %v347_v20 }
 0x138   :  { %1428 = vmatmul.msk.f32.gmra.mxu0 %vm92_vm0, %v319_v21  ;;  %1484 = vmatmul.msk.f32.gmra.mxu1 %vm92_vm0, %v319_v21 }
 0x13f   :  { %1457 = vmatmul.msk.f32.gmra.mxu2 %vm92_vm0, %v348_v22  ;;  %1513 = vmatmul.msk.f32.gmra.mxu3 %vm92_vm0, %v348_v22 }
 0x140   :  { %1429 = vmatmul.msk.f32.gmra.mxu0 %vm92_vm0, %v320_v23  ;;  %1485 = vmatmul.msk.f32.gmra.mxu1 %vm92_vm0, %v320_v23 }
 0x147   :  { %1458 = vmatmul.msk.f32.gmra.mxu2 %vm92_vm0, %v349_v24  ;;  %1514 = vmatmul.msk.f32.gmra.mxu3 %vm92_vm0, %v349_v24 }
 0x148   :  { %1430 = vmatmul.msk.f32.gmra.mxu0 %vm92_vm0, %v321_v25  ;;  %1486 = vmatmul.msk.f32.gmra.mxu1 %vm92_vm0, %v321_v25 }
 0x14f   :  { %1459 = vmatmul.msk.f32.gmra.mxu2 %vm92_vm0, %v350_v26  ;;  %1515 = vmatmul.msk.f32.gmra.mxu3 %vm92_vm0, %v350_v26 }
 0x150   :  { %1431 = vmatmul.msk.f32.gmra.mxu0 %vm92_vm0, %v322_v27  ;;  %1487 = vmatmul.msk.f32.gmra.mxu1 %vm92_vm0, %v322_v27 }
 0x157   :  { %1460 = vmatmul.msk.f32.gmra.mxu2 %vm92_vm0, %v351_v33  ;;  %1516 = vmatmul.msk.f32.gmra.mxu3 %vm92_vm0, %v351_v33  ;;  %v331_v33 = vld [vmem:[#allocation2 + $0xb8] sm:$0xff] }
 0x158   :  { %1432 = vmatmul.msk.f32.gmra.mxu0 %vm92_vm0, %v323_v34  ;;  %1488 = vmatmul.msk.f32.gmra.mxu1 %vm92_vm0, %v323_v34  ;;  %v360_v34 = vld [vmem:[#allocation2 + $0x1a0] sm:$0xff] }
 0x15d   :  { %v554_v36 = vpop.f32.mrf.mxu0  ;;  %v739_v37 = vpop.f32.mrf.mxu1 }
 0x15e   :  { %v1529_v39 = vadd.f32 -1.0, %v554_v36  ;;  %v1530_v40 = vadd.f32 -1.0, %v739_v37 }
 0x15f   :  { %1461 = vmatmul.msk.f32.gmra.mxu2 %vm92_vm0, %v352_v35  ;;  %1517 = vmatmul.msk.f32.gmra.mxu3 %vm92_vm0, %v352_v35 }
 0x160   :  { %1019 = vst [vmem:[#allocation8] sm:$0xff] %v1529_v39  ;;  %1433 = vmatmul.msk.f32.gmra.mxu0 %vm92_vm0, %v324_v38  ;;  %1489 = vmatmul.msk.f32.gmra.mxu1 %vm92_vm0, %v324_v38 }
 0x161   :  { %1133 = vst [vmem:[#allocation8 + $0x1c0] sm:$0xff] %v1529_v39 }
 0x162   :  { %v638_v41 = vpop.f32.mrf.mxu2  ;;  %1246 = vst [vmem:[#allocation8 + $0x380] sm:$0xff] %v1529_v39  ;;  %v823_v43 = vpop.f32.mrf.mxu3 }
 0x163   :  { %v1585_v42 = vadd.f32 -1.0, %v638_v41  ;;  %1021 = vst.msk [vmem:[#allocation8 + $0x8] sm:$0xff] %vm1020_vm1, %v1530_v40  ;;  %v1586_v45 = vadd.f32 -1.0, %v823_v43  ;;  %v332_v43 = vld [vmem:[#allocation2 + $0xc0] sm:$0xff] }
 0x164   :  { %1134 = vst.msk [vmem:[#allocation8 + $0x1c8] sm:$0xff] %vm1020_vm1, %v1530_v40 }
 0x165   :  { %1076 = vst [vmem:[#allocation8 + $0x540] sm:$0xff] %v1585_v42  ;;  %v557_v46 = vpop.f32.mrf.mxu0  ;;  %v742_v51 = vpop.f32.mrf.mxu1 }
 0x166   :  { %1189 = vst [vmem:[#allocation8 + $0x700] sm:$0xff] %v1585_v42  ;;  %v1531_v48 = vadd.f32 -1.0, %v557_v46  ;;  %v1532_v54 = vadd.f32 -1.0, %v742_v51 }
 0x167   :  { %1302 = vst [vmem:[#allocation8 + $0x8c0] sm:$0xff] %v1585_v42  ;;  %1462 = vmatmul.msk.f32.gmra.mxu2 %vm92_vm0, %v353_v44  ;;  %1518 = vmatmul.msk.f32.gmra.mxu3 %vm92_vm0, %v353_v44  ;;  %v361_v44 = vld [vmem:[#allocation2 + $0x1a8] sm:$0xff] }
 0x168   :  { %1247 = vst.msk [vmem:[#allocation8 + $0x388] sm:$0xff] %vm1020_vm1, %v1530_v40  ;;  %1434 = vmatmul.msk.f32.gmra.mxu0 %vm92_vm0, %v325_v47  ;;  %1490 = vmatmul.msk.f32.gmra.mxu1 %vm92_vm0, %v325_v47 }
 0x169   :  { %1077 = vst.msk [vmem:[#allocation8 + $0x548] sm:$0xff] %vm1020_vm1, %v1586_v45 }
 0x16a   :  { %v641_v49 = vpop.f32.mrf.mxu2  ;;  %1190 = vst.msk [vmem:[#allocation8 + $0x708] sm:$0xff] %vm1020_vm1, %v1586_v45  ;;  %v826_v55 = vpop.f32.mrf.mxu3 }
 0x16b   :  { %1303 = vst.msk [vmem:[#allocation8 + $0x8c8] sm:$0xff] %vm1020_vm1, %v1586_v45  ;;  %v1587_v50 = vadd.f32 -1.0, %v641_v49  ;;  %v1588_v56 = vadd.f32 -1.0, %v826_v55 }
 0x16c   :  { %1022 = vst [vmem:[#allocation8 + $0x10] sm:$0xff] %v1531_v48 }
 0x16d   :  { %1135 = vst [vmem:[#allocation8 + $0x1d0] sm:$0xff] %v1531_v48  ;;  %v560_v57 = vpop.f32.mrf.mxu0  ;;  %v745_v63 = vpop.f32.mrf.mxu1 }
 0x16e   :  { %1248 = vst [vmem:[#allocation8 + $0x390] sm:$0xff] %v1531_v48  ;;  %v1533_v59 = vadd.f32 -1.0, %v560_v57  ;;  %v1534_v28 = vadd.f32 -1.0, %v745_v63  ;;  %v334_v63 = vld [vmem:[#allocation2 + $0xd0] sm:$0xff] }
 0x16f   :  { %1463 = vmatmul.msk.f32.gmra.mxu2 %vm92_vm0, %v354_v52  ;;  %1519 = vmatmul.msk.f32.gmra.mxu3 %vm92_vm0, %v354_v52  ;;  %1078 = vst [vmem:[#allocation8 + $0x550] sm:$0xff] %v1587_v50 }
 0x170   :  { %1191 = vst [vmem:[#allocation8 + $0x710] sm:$0xff] %v1587_v50  ;;  %1435 = vmatmul.msk.f32.gmra.mxu0 %vm92_vm0, %v326_v53  ;;  %1491 = vmatmul.msk.f32.gmra.mxu1 %vm92_vm0, %v326_v53  ;;  %v333_v53 = vld [vmem:[#allocation2 + $0xc8] sm:$0xff] }
 0x171   :  { %1304 = vst [vmem:[#allocation8 + $0x8d0] sm:$0xff] %v1587_v50 }
 0x172   :  { %1023 = vst.msk [vmem:[#allocation8 + $0x18] sm:$0xff] %vm1020_vm1, %v1532_v54  ;;  %v644_v60 = vpop.f32.mrf.mxu2  ;;  %v829_v29 = vpop.f32.mrf.mxu3 }
 0x173   :  { %1136 = vst.msk [vmem:[#allocation8 + $0x1d8] sm:$0xff] %vm1020_vm1, %v1532_v54  ;;  %v1589_v62 = vadd.f32 -1.0, %v644_v60  ;;  %v1590_v31 = vadd.f32 -1.0, %v829_v29 }
 0x174   :  { %1249 = vst.msk [vmem:[#allocation8 + $0x398] sm:$0xff] %vm1020_vm1, %v1532_v54  ;;  %v362_v54 = vld [vmem:[#allocation2 + $0x1b0] sm:$0xff] }
 0x175   :  { %1079 = vst.msk [vmem:[#allocation8 + $0x558] sm:$0xff] %vm1020_vm1, %v1588_v56  ;;  %v563_v32 = vpop.f32.mrf.mxu0  ;;  %v748_v4 = vpop.f32.mrf.mxu1 }
 0x176   :  { %1192 = vst.msk [vmem:[#allocation8 + $0x718] sm:$0xff] %vm1020_vm1, %v1588_v56  ;;  %v1535_v1 = vadd.f32 -1.0, %v563_v32  ;;  %v1536_v6 = vadd.f32 -1.0, %v748_v4  ;;  %v335_v4 = vld [vmem:[#allocation2 + $0xd8] sm:$0xff] }
 0x177   :  { %1464 = vmatmul.msk.f32.gmra.mxu2 %vm92_vm0, %v355_v58  ;;  %1520 = vmatmul.msk.f32.gmra.mxu3 %vm92_vm0, %v355_v58  ;;  %1305 = vst.msk [vmem:[#allocation8 + $0x8d8] sm:$0xff] %vm1020_vm1, %v1588_v56 }
 0x178   :  { %1024 = vst [vmem:[#allocation8 + $0x20] sm:$0xff] %v1533_v59  ;;  %1436 = vmatmul.msk.f32.gmra.mxu0 %vm92_vm0, %v327_v61  ;;  %1492 = vmatmul.msk.f32.gmra.mxu1 %vm92_vm0, %v327_v61 }
 0x179   :  { %1137 = vst [vmem:[#allocation8 + $0x1e0] sm:$0xff] %v1533_v59 }
 0x17a   :  { %1250 = vst [vmem:[#allocation8 + $0x3a0] sm:$0xff] %v1533_v59  ;;  %v647_v2 = vpop.f32.mrf.mxu2  ;;  %v832_v7 = vpop.f32.mrf.mxu3 }
 0x17b   :  { %1080 = vst [vmem:[#allocation8 + $0x560] sm:$0xff] %v1589_v62  ;;  %v1591_v3 = vadd.f32 -1.0, %v647_v2  ;;  %v1592_v9 = vadd.f32 -1.0, %v832_v7 }
 0x17c   :  { %1193 = vst [vmem:[#allocation8 + $0x720] sm:$0xff] %v1589_v62 }
 0x17d   :  { %1306 = vst [vmem:[#allocation8 + $0x8e0] sm:$0xff] %v1589_v62  ;;  %v566_v10 = vpop.f32.mrf.mxu0  ;;  %v751_v15 = vpop.f32.mrf.mxu1 }
 0x17e   :  { %1025 = vst.msk [vmem:[#allocation8 + $0x28] sm:$0xff] %vm1020_vm1, %v1534_v28  ;;  %v1537_v12 = vadd.f32 -1.0, %v566_v10  ;;  %v1538_v16 = vadd.f32 -1.0, %v751_v15 }
 0x17f   :  { %1465 = vmatmul.msk.f32.gmra.mxu2 %vm92_vm0, %v356_v30  ;;  %1521 = vmatmul.msk.f32.gmra.mxu3 %vm92_vm0, %v356_v30  ;;  %1138 = vst.msk [vmem:[#allocation8 + $0x1e8] sm:$0xff] %vm1020_vm1, %v1534_v28 }
 0x180   :  { %1251 = vst.msk [vmem:[#allocation8 + $0x3a8] sm:$0xff] %vm1020_vm1, %v1534_v28  ;;  %1437 = vmatmul.msk.f32.gmra.mxu0 %vm92_vm0, %v328_v0  ;;  %1493 = vmatmul.msk.f32.gmra.mxu1 %vm92_vm0, %v328_v0  ;;  %v363_v28 = vld [vmem:[#allocation2 + $0x1b8] sm:$0xff] }
 0x181   :  { %1081 = vst.msk [vmem:[#allocation8 + $0x568] sm:$0xff] %vm1020_vm1, %v1590_v31 }
 0x182   :  { %1194 = vst.msk [vmem:[#allocation8 + $0x728] sm:$0xff] %vm1020_vm1, %v1590_v31  ;;  %v650_v13 = vpop.f32.mrf.mxu2  ;;  %v835_v17 = vpop.f32.mrf.mxu3 }
 0x183   :  { %1307 = vst.msk [vmem:[#allocation8 + $0x8e8] sm:$0xff] %vm1020_vm1, %v1590_v31  ;;  %v1593_v14 = vadd.f32 -1.0, %v650_v13  ;;  %v1594_v20 = vadd.f32 -1.0, %v835_v17 }
 0x184   :  { %1026 = vst [vmem:[#allocation8 + $0x30] sm:$0xff] %v1535_v1 }
 0x185   :  { %1139 = vst [vmem:[#allocation8 + $0x1f0] sm:$0xff] %v1535_v1  ;;  %v569_v21 = vpop.f32.mrf.mxu0  ;;  %v754_v25 = vpop.f32.mrf.mxu1 }
 0x186   :  { %1252 = vst [vmem:[#allocation8 + $0x3b0] sm:$0xff] %v1535_v1  ;;  %v1539_v22 = vadd.f32 -1.0, %v569_v21  ;;  %v1540_v26 = vadd.f32 -1.0, %v754_v25 }
 0x187   :  { %1466 = vmatmul.msk.f32.gmra.mxu2 %vm92_vm0, %v357_v5  ;;  %1522 = vmatmul.msk.f32.gmra.mxu3 %vm92_vm0, %v357_v5  ;;  %1082 = vst [vmem:[#allocation8 + $0x570] sm:$0xff] %v1591_v3 }
 0x188   :  { %1195 = vst [vmem:[#allocation8 + $0x730] sm:$0xff] %v1591_v3  ;;  %1438 = vmatmul.msk.f32.gmra.mxu0 %vm92_vm0, %v329_v8  ;;  %1494 = vmatmul.msk.f32.gmra.mxu1 %vm92_vm0, %v329_v8 }
 0x189   :  { %1308 = vst [vmem:[#allocation8 + $0x8f0] sm:$0xff] %v1591_v3 }
 0x18a   :  { %1027 = vst.msk [vmem:[#allocation8 + $0x38] sm:$0xff] %vm1020_vm1, %v1536_v6  ;;  %v653_v23 = vpop.f32.mrf.mxu2  ;;  %v838_v27 = vpop.f32.mrf.mxu3 }
 0x18b   :  { %1140 = vst.msk [vmem:[#allocation8 + $0x1f8] sm:$0xff] %vm1020_vm1, %v1536_v6  ;;  %v1595_v24 = vadd.f32 -1.0, %v653_v23  ;;  %v1596_v35 = vadd.f32 -1.0, %v838_v27 }
 0x18c   :  { %1253 = vst.msk [vmem:[#allocation8 + $0x3b8] sm:$0xff] %vm1020_vm1, %v1536_v6 }
 0x18d   :  { %1083 = vst.msk [vmem:[#allocation8 + $0x578] sm:$0xff] %vm1020_vm1, %v1592_v9  ;;  %v572_v36 = vpop.f32.mrf.mxu0  ;;  %v757_v40 = vpop.f32.mrf.mxu1 }
 0x18e   :  { %1196 = vst.msk [vmem:[#allocation8 + $0x738] sm:$0xff] %vm1020_vm1, %v1592_v9  ;;  %v1541_v37 = vadd.f32 -1.0, %v572_v36  ;;  %v1542_v41 = vadd.f32 -1.0, %v757_v40 }
 0x18f   :  { %1467 = vmatmul.msk.f32.gmra.mxu2 %vm92_vm0, %v358_v11  ;;  %1523 = vmatmul.msk.f32.gmra.mxu3 %vm92_vm0, %v358_v11  ;;  %1309 = vst.msk [vmem:[#allocation8 + $0x8f8] sm:$0xff] %vm1020_vm1, %v1592_v9 }
 0x190   :  { %1028 = vst [vmem:[#allocation8 + $0x40] sm:$0xff] %v1537_v12  ;;  %1439 = vmatmul.msk.f32.gmra.mxu0 %vm92_vm0, %v330_v18  ;;  %1495 = vmatmul.msk.f32.gmra.mxu1 %vm92_vm0, %v330_v18 }
 0x191   :  { %1141 = vst [vmem:[#allocation8 + $0x200] sm:$0xff] %v1537_v12 }
 0x192   :  { %1254 = vst [vmem:[#allocation8 + $0x3c0] sm:$0xff] %v1537_v12  ;;  %v656_v38 = vpop.f32.mrf.mxu2  ;;  %v841_v42 = vpop.f32.mrf.mxu3 }
 0x193   :  { %1084 = vst [vmem:[#allocation8 + $0x580] sm:$0xff] %v1593_v14  ;;  %v1597_v39 = vadd.f32 -1.0, %v656_v38  ;;  %v1598_v45 = vadd.f32 -1.0, %v841_v42 }
 0x194   :  { %1197 = vst [vmem:[#allocation8 + $0x740] sm:$0xff] %v1593_v14 }
 0x195   :  { %1310 = vst [vmem:[#allocation8 + $0x900] sm:$0xff] %v1593_v14  ;;  %v575_v46 = vpop.f32.mrf.mxu0  ;;  %v760_v50 = vpop.f32.mrf.mxu1 }
 0x196   :  { %1029 = vst.msk [vmem:[#allocation8 + $0x48] sm:$0xff] %vm1020_vm1, %v1538_v16  ;;  %v1543_v47 = vadd.f32 -1.0, %v575_v46  ;;  %v1544_v51 = vadd.f32 -1.0, %v760_v50 }
 0x197   :  { %1468 = vmatmul.msk.f32.gmra.mxu2 %vm92_vm0, %v359_v19  ;;  %1524 = vmatmul.msk.f32.gmra.mxu3 %vm92_vm0, %v359_v19  ;;  %1142 = vst.msk [vmem:[#allocation8 + $0x208] sm:$0xff] %vm1020_vm1, %v1538_v16 }
 0x198   :  { %1255 = vst.msk [vmem:[#allocation8 + $0x3c8] sm:$0xff] %vm1020_vm1, %v1538_v16  ;;  %1440 = vmatmul.msk.f32.gmra.mxu0 %vm92_vm0, %v331_v33  ;;  %1496 = vmatmul.msk.f32.gmra.mxu1 %vm92_vm0, %v331_v33 }
 0x199   :  { %1085 = vst.msk [vmem:[#allocation8 + $0x588] sm:$0xff] %vm1020_vm1, %v1594_v20 }
 0x19a   :  { %1198 = vst.msk [vmem:[#allocation8 + $0x748] sm:$0xff] %vm1020_vm1, %v1594_v20  ;;  %v659_v48 = vpop.f32.mrf.mxu2  ;;  %v844_v52 = vpop.f32.mrf.mxu3 }
 0x19b   :  { %1311 = vst.msk [vmem:[#allocation8 + $0x908] sm:$0xff] %vm1020_vm1, %v1594_v20  ;;  %v1599_v49 = vadd.f32 -1.0, %v659_v48  ;;  %v1600_v55 = vadd.f32 -1.0, %v844_v52 }
 0x19c   :  { %1030 = vst [vmem:[#allocation8 + $0x50] sm:$0xff] %v1539_v22 }
 0x19d   :  { %1143 = vst [vmem:[#allocation8 + $0x210] sm:$0xff] %v1539_v22  ;;  %v578_v56 = vpop.f32.mrf.mxu0  ;;  %v763_v60 = vpop.f32.mrf.mxu1 }
 0x19e   :  { %1256 = vst [vmem:[#allocation8 + $0x3d0] sm:$0xff] %v1539_v22  ;;  %v1545_v57 = vadd.f32 -1.0, %v578_v56  ;;  %v1546_v61 = vadd.f32 -1.0, %v763_v60 }
 0x19f   :  { %1086 = vst [vmem:[#allocation8 + $0x590] sm:$0xff] %v1595_v24  ;;  %1469 = vmatmul.msk.f32.gmra.mxu2 %vm92_vm0, %v360_v34  ;;  %1525 = vmatmul.msk.f32.gmra.mxu3 %vm92_vm0, %v360_v34 }
 0x1a0   :  { %1199 = vst [vmem:[#allocation8 + $0x750] sm:$0xff] %v1595_v24  ;;  %1441 = vmatmul.msk.f32.gmra.mxu0 %vm92_vm0, %v332_v43  ;;  %1497 = vmatmul.msk.f32.gmra.mxu1 %vm92_vm0, %v332_v43 }
 0x1a1   :  { %1312 = vst [vmem:[#allocation8 + $0x910] sm:$0xff] %v1595_v24 }
 0x1a2   :  { %1031 = vst.msk [vmem:[#allocation8 + $0x58] sm:$0xff] %vm1020_vm1, %v1540_v26  ;;  %v662_v58 = vpop.f32.mrf.mxu2  ;;  %v847_v62 = vpop.f32.mrf.mxu3 }
 0x1a3   :  { %1144 = vst.msk [vmem:[#allocation8 + $0x218] sm:$0xff] %vm1020_vm1, %v1540_v26  ;;  %v1601_v59 = vadd.f32 -1.0, %v662_v58  ;;  %v1602_v29 = vadd.f32 -1.0, %v847_v62 }
 0x1a4   :  { %1257 = vst.msk [vmem:[#allocation8 + $0x3d8] sm:$0xff] %vm1020_vm1, %v1540_v26 }
 0x1a5   :  { %1087 = vst.msk [vmem:[#allocation8 + $0x598] sm:$0xff] %vm1020_vm1, %v1596_v35  ;;  %v581_v30 = vpop.f32.mrf.mxu0  ;;  %v766_v1 = vpop.f32.mrf.mxu1 }
 0x1a6   :  { %1200 = vst.msk [vmem:[#allocation8 + $0x758] sm:$0xff] %vm1020_vm1, %v1596_v35  ;;  %v1547_v31 = vadd.f32 -1.0, %v581_v30  ;;  %v1548_v2 = vadd.f32 -1.0, %v766_v1 }
 0x1a7   :  { %1313 = vst.msk [vmem:[#allocation8 + $0x918] sm:$0xff] %vm1020_vm1, %v1596_v35  ;;  %1470 = vmatmul.msk.f32.gmra.mxu2 %vm92_vm0, %v361_v44  ;;  %1526 = vmatmul.msk.f32.gmra.mxu3 %vm92_vm0, %v361_v44 }
 0x1a8   :  { %1032 = vst [vmem:[#allocation8 + $0x60] sm:$0xff] %v1541_v37  ;;  %1442 = vmatmul.msk.f32.gmra.mxu0 %vm92_vm0, %v333_v53  ;;  %1498 = vmatmul.msk.f32.gmra.mxu1 %vm92_vm0, %v333_v53 }
 0x1a9   :  { %1145 = vst [vmem:[#allocation8 + $0x220] sm:$0xff] %v1541_v37 }
 0x1aa   :  { %1258 = vst [vmem:[#allocation8 + $0x3e0] sm:$0xff] %v1541_v37  ;;  %v665_v32 = vpop.f32.mrf.mxu2  ;;  %v850_v3 = vpop.f32.mrf.mxu3 }
 0x1ab   :  { %1088 = vst [vmem:[#allocation8 + $0x5a0] sm:$0xff] %v1597_v39  ;;  %v1603_v0 = vadd.f32 -1.0, %v665_v32  ;;  %v1604_v5 = vadd.f32 -1.0, %v850_v3 }
 0x1ac   :  { %1201 = vst [vmem:[#allocation8 + $0x760] sm:$0xff] %v1597_v39 }
 0x1ad   :  { %1314 = vst [vmem:[#allocation8 + $0x920] sm:$0xff] %v1597_v39  ;;  %v584_v6 = vpop.f32.mrf.mxu0  ;;  %v769_v10 = vpop.f32.mrf.mxu1 }
 0x1ae   :  { %1033 = vst.msk [vmem:[#allocation8 + $0x68] sm:$0xff] %vm1020_vm1, %v1542_v41  ;;  %v1549_v7 = vadd.f32 -1.0, %v584_v6  ;;  %v1550_v11 = vadd.f32 -1.0, %v769_v10 }
 0x1af   :  { %1146 = vst.msk [vmem:[#allocation8 + $0x228] sm:$0xff] %vm1020_vm1, %v1542_v41  ;;  %1471 = vmatmul.msk.f32.gmra.mxu2 %vm92_vm0, %v362_v54  ;;  %1527 = vmatmul.msk.f32.gmra.mxu3 %vm92_vm0, %v362_v54 }
 0x1b0   :  { %1259 = vst.msk [vmem:[#allocation8 + $0x3e8] sm:$0xff] %vm1020_vm1, %v1542_v41  ;;  %1443 = vmatmul.msk.f32.gmra.mxu0 %vm92_vm0, %v334_v63  ;;  %1499 = vmatmul.msk.f32.gmra.mxu1 %vm92_vm0, %v334_v63 }
 0x1b1   :  { %1089 = vst.msk [vmem:[#allocation8 + $0x5a8] sm:$0xff] %vm1020_vm1, %v1598_v45 }
 0x1b2   :  { %1202 = vst.msk [vmem:[#allocation8 + $0x768] sm:$0xff] %vm1020_vm1, %v1598_v45  ;;  %v668_v8 = vpop.f32.mrf.mxu2  ;;  %v853_v12 = vpop.f32.mrf.mxu3 }
 0x1b3   :  { %1315 = vst.msk [vmem:[#allocation8 + $0x928] sm:$0xff] %vm1020_vm1, %v1598_v45  ;;  %v1605_v9 = vadd.f32 -1.0, %v668_v8  ;;  %v1606_v13 = vadd.f32 -1.0, %v853_v12 }
 0x1b4   :  { %1034 = vst [vmem:[#allocation8 + $0x70] sm:$0xff] %v1543_v47 }
 0x1b5   :  { %1147 = vst [vmem:[#allocation8 + $0x230] sm:$0xff] %v1543_v47  ;;  %v587_v14 = vpop.f32.mrf.mxu0  ;;  %v772_v18 = vpop.f32.mrf.mxu1 }
 0x1b6   :  { %1260 = vst [vmem:[#allocation8 + $0x3f0] sm:$0xff] %v1543_v47  ;;  %v1551_v15 = vadd.f32 -1.0, %v587_v14  ;;  %v1552_v19 = vadd.f32 -1.0, %v772_v18 }
 0x1b7   :  { %1090 = vst [vmem:[#allocation8 + $0x5b0] sm:$0xff] %v1599_v49  ;;  %1472 = vmatmul.msk.f32.gmra.mxu2 %vm92_vm0, %v363_v28  ;;  %1528 = vmatmul.msk.f32.gmra.mxu3 %vm92_vm0, %v363_v28 }
 0x1b8   :  { %1203 = vst [vmem:[#allocation8 + $0x770] sm:$0xff] %v1599_v49  ;;  %1444 = vmatmul.msk.f32.gmra.mxu0 %vm92_vm0, %v335_v4  ;;  %1500 = vmatmul.msk.f32.gmra.mxu1 %vm92_vm0, %v335_v4 }
 0x1b9   :  { %1316 = vst [vmem:[#allocation8 + $0x930] sm:$0xff] %v1599_v49 }
 0x1ba   :  { %1035 = vst.msk [vmem:[#allocation8 + $0x78] sm:$0xff] %vm1020_vm1, %v1544_v51  ;;  %v671_v16 = vpop.f32.mrf.mxu2  ;;  %v856_v20 = vpop.f32.mrf.mxu3 }
 0x1bb   :  { %1148 = vst.msk [vmem:[#allocation8 + $0x238] sm:$0xff] %vm1020_vm1, %v1544_v51  ;;  %v1607_v17 = vadd.f32 -1.0, %v671_v16  ;;  %v1608_v21 = vadd.f32 -1.0, %v856_v20 }
 0x1bc   :  { %1261 = vst.msk [vmem:[#allocation8 + $0x3f8] sm:$0xff] %vm1020_vm1, %v1544_v51 }
 0x1bd   :  { %1091 = vst.msk [vmem:[#allocation8 + $0x5b8] sm:$0xff] %vm1020_vm1, %v1600_v55  ;;  %v590_v22 = vpop.f32.mrf.mxu0  ;;  %v775_v26 = vpop.f32.mrf.mxu1 }
 0x1be   :  { %1204 = vst.msk [vmem:[#allocation8 + $0x778] sm:$0xff] %vm1020_vm1, %v1600_v55  ;;  %v1553_v23 = vadd.f32 -1.0, %v590_v22  ;;  %v1554_v27 = vadd.f32 -1.0, %v775_v26 }
 0x1bf   :  { %1317 = vst.msk [vmem:[#allocation8 + $0x938] sm:$0xff] %vm1020_vm1, %v1600_v55 }
 0x1c0   :  { %1036 = vst [vmem:[#allocation8 + $0x80] sm:$0xff] %v1545_v57 }
 0x1c1   :  { %1149 = vst [vmem:[#allocation8 + $0x240] sm:$0xff] %v1545_v57 }
 0x1c2   :  { %1262 = vst [vmem:[#allocation8 + $0x400] sm:$0xff] %v1545_v57  ;;  %v674_v24 = vpop.f32.mrf.mxu2  ;;  %v859_v33 = vpop.f32.mrf.mxu3 }
 0x1c3   :  { %1092 = vst [vmem:[#allocation8 + $0x5c0] sm:$0xff] %v1601_v59  ;;  %v1609_v25 = vadd.f32 -1.0, %v674_v24  ;;  %v1610_v34 = vadd.f32 -1.0, %v859_v33 }
 0x1c4   :  { %1205 = vst [vmem:[#allocation8 + $0x780] sm:$0xff] %v1601_v59 }
 0x1c5   :  { %1318 = vst [vmem:[#allocation8 + $0x940] sm:$0xff] %v1601_v59  ;;  %v593_v35 = vpop.f32.mrf.mxu0  ;;  %v778_v39 = vpop.f32.mrf.mxu1 }
 0x1c6   :  { %1037 = vst.msk [vmem:[#allocation8 + $0x88] sm:$0xff] %vm1020_vm1, %v1546_v61  ;;  %v1555_v36 = vadd.f32 -1.0, %v593_v35  ;;  %v1556_v40 = vadd.f32 -1.0, %v778_v39 }
 0x1c7   :  { %1150 = vst.msk [vmem:[#allocation8 + $0x248] sm:$0xff] %vm1020_vm1, %v1546_v61 }
 0x1c8   :  { %1263 = vst.msk [vmem:[#allocation8 + $0x408] sm:$0xff] %vm1020_vm1, %v1546_v61 }
 0x1c9   :  { %1093 = vst.msk [vmem:[#allocation8 + $0x5c8] sm:$0xff] %vm1020_vm1, %v1602_v29 }
 0x1ca   :  { %1206 = vst.msk [vmem:[#allocation8 + $0x788] sm:$0xff] %vm1020_vm1, %v1602_v29  ;;  %v677_v37 = vpop.f32.mrf.mxu2  ;;  %v862_v41 = vpop.f32.mrf.mxu3 }
 0x1cb   :  { %1319 = vst.msk [vmem:[#allocation8 + $0x948] sm:$0xff] %vm1020_vm1, %v1602_v29  ;;  %v1611_v38 = vadd.f32 -1.0, %v677_v37  ;;  %v1612_v42 = vadd.f32 -1.0, %v862_v41 }
 0x1cc   :  { %1038 = vst [vmem:[#allocation8 + $0x90] sm:$0xff] %v1547_v31 }
 0x1cd   :  { %1151 = vst [vmem:[#allocation8 + $0x250] sm:$0xff] %v1547_v31  ;;  %v596_v43 = vpop.f32.mrf.mxu0  ;;  %v781_v47 = vpop.f32.mrf.mxu1 }
 0x1ce   :  { %1264 = vst [vmem:[#allocation8 + $0x410] sm:$0xff] %v1547_v31  ;;  %v1557_v44 = vadd.f32 -1.0, %v596_v43  ;;  %v1558_v48 = vadd.f32 -1.0, %v781_v47 }
 0x1cf   :  { %1094 = vst [vmem:[#allocation8 + $0x5d0] sm:$0xff] %v1603_v0 }
 0x1d0   :  { %1207 = vst [vmem:[#allocation8 + $0x790] sm:$0xff] %v1603_v0 }
 0x1d1   :  { %1320 = vst [vmem:[#allocation8 + $0x950] sm:$0xff] %v1603_v0 }
 0x1d2   :  { %1039 = vst.msk [vmem:[#allocation8 + $0x98] sm:$0xff] %vm1020_vm1, %v1548_v2  ;;  %v680_v45 = vpop.f32.mrf.mxu2  ;;  %v865_v49 = vpop.f32.mrf.mxu3 }
 0x1d3   :  { %1152 = vst.msk [vmem:[#allocation8 + $0x258] sm:$0xff] %vm1020_vm1, %v1548_v2  ;;  %v1613_v46 = vadd.f32 -1.0, %v680_v45  ;;  %v1614_v50 = vadd.f32 -1.0, %v865_v49 }
 0x1d4   :  { %1265 = vst.msk [vmem:[#allocation8 + $0x418] sm:$0xff] %vm1020_vm1, %v1548_v2 }
 0x1d5   :  { %1095 = vst.msk [vmem:[#allocation8 + $0x5d8] sm:$0xff] %vm1020_vm1, %v1604_v5  ;;  %v599_v51 = vpop.f32.mrf.mxu0  ;;  %v784_v55 = vpop.f32.mrf.mxu1 }
 0x1d6   :  { %1208 = vst.msk [vmem:[#allocation8 + $0x798] sm:$0xff] %vm1020_vm1, %v1604_v5  ;;  %v1559_v52 = vadd.f32 -1.0, %v599_v51  ;;  %v1560_v56 = vadd.f32 -1.0, %v784_v55 }
 0x1d7   :  { %1321 = vst.msk [vmem:[#allocation8 + $0x958] sm:$0xff] %vm1020_vm1, %v1604_v5 }
 0x1d8   :  { %1040 = vst [vmem:[#allocation8 + $0xa0] sm:$0xff] %v1549_v7 }
 0x1d9   :  { %1153 = vst [vmem:[#allocation8 + $0x260] sm:$0xff] %v1549_v7 }
 0x1da   :  { %1266 = vst [vmem:[#allocation8 + $0x420] sm:$0xff] %v1549_v7  ;;  %v683_v53 = vpop.f32.mrf.mxu2  ;;  %v868_v57 = vpop.f32.mrf.mxu3 }
 0x1db   :  { %1096 = vst [vmem:[#allocation8 + $0x5e0] sm:$0xff] %v1605_v9  ;;  %v1615_v54 = vadd.f32 -1.0, %v683_v53  ;;  %v1616_v58 = vadd.f32 -1.0, %v868_v57 }
 0x1dc   :  { %1209 = vst [vmem:[#allocation8 + $0x7a0] sm:$0xff] %v1605_v9 }
 0x1dd   :  { %1322 = vst [vmem:[#allocation8 + $0x960] sm:$0xff] %v1605_v9  ;;  %v602_v59 = vpop.f32.mrf.mxu0  ;;  %v787_v63 = vpop.f32.mrf.mxu1 }
 0x1de   :  { %1041 = vst.msk [vmem:[#allocation8 + $0xa8] sm:$0xff] %vm1020_vm1, %v1550_v11  ;;  %v1561_v60 = vadd.f32 -1.0, %v602_v59  ;;  %v1562_v28 = vadd.f32 -1.0, %v787_v63 }
 0x1df   :  { %1154 = vst.msk [vmem:[#allocation8 + $0x268] sm:$0xff] %vm1020_vm1, %v1550_v11 }
 0x1e0   :  { %1267 = vst.msk [vmem:[#allocation8 + $0x428] sm:$0xff] %vm1020_vm1, %v1550_v11 }
 0x1e1   :  { %1097 = vst.msk [vmem:[#allocation8 + $0x5e8] sm:$0xff] %vm1020_vm1, %v1606_v13 }
 0x1e2   :  { %1210 = vst.msk [vmem:[#allocation8 + $0x7a8] sm:$0xff] %vm1020_vm1, %v1606_v13  ;;  %v686_v61 = vpop.f32.mrf.mxu2  ;;  %v871_v29 = vpop.f32.mrf.mxu3 }
 0x1e3   :  { %1323 = vst.msk [vmem:[#allocation8 + $0x968] sm:$0xff] %vm1020_vm1, %v1606_v13  ;;  %v1617_v62 = vadd.f32 -1.0, %v686_v61  ;;  %v1618_v30 = vadd.f32 -1.0, %v871_v29 }
 0x1e4   :  { %1042 = vst [vmem:[#allocation8 + $0xb0] sm:$0xff] %v1551_v15 }
 0x1e5   :  { %1155 = vst [vmem:[#allocation8 + $0x270] sm:$0xff] %v1551_v15  ;;  %v605_v31 = vpop.f32.mrf.mxu0  ;;  %v790_v2 = vpop.f32.mrf.mxu1 }
 0x1e6   :  { %1268 = vst [vmem:[#allocation8 + $0x430] sm:$0xff] %v1551_v15  ;;  %v1563_v32 = vadd.f32 -1.0, %v605_v31  ;;  %v1564_v3 = vadd.f32 -1.0, %v790_v2 }
 0x1e7   :  { %1098 = vst [vmem:[#allocation8 + $0x5f0] sm:$0xff] %v1607_v17 }
 0x1e8   :  { %1211 = vst [vmem:[#allocation8 + $0x7b0] sm:$0xff] %v1607_v17 }
 0x1e9   :  { %1324 = vst [vmem:[#allocation8 + $0x970] sm:$0xff] %v1607_v17 }
 0x1ea   :  { %1043 = vst.msk [vmem:[#allocation8 + $0xb8] sm:$0xff] %vm1020_vm1, %v1552_v19  ;;  %v689_v0 = vpop.f32.mrf.mxu2  ;;  %v874_v4 = vpop.f32.mrf.mxu3 }
 0x1eb   :  { %1156 = vst.msk [vmem:[#allocation8 + $0x278] sm:$0xff] %vm1020_vm1, %v1552_v19  ;;  %v1619_v1 = vadd.f32 -1.0, %v689_v0  ;;  %v1620_v5 = vadd.f32 -1.0, %v874_v4 }
 0x1ec   :  { %1269 = vst.msk [vmem:[#allocation8 + $0x438] sm:$0xff] %vm1020_vm1, %v1552_v19 }
 0x1ed   :  { %1099 = vst.msk [vmem:[#allocation8 + $0x5f8] sm:$0xff] %vm1020_vm1, %v1608_v21  ;;  %v608_v6 = vpop.f32.mrf.mxu0  ;;  %v793_v10 = vpop.f32.mrf.mxu1 }
 0x1ee   :  { %1212 = vst.msk [vmem:[#allocation8 + $0x7b8] sm:$0xff] %vm1020_vm1, %v1608_v21  ;;  %v1565_v7 = vadd.f32 -1.0, %v608_v6  ;;  %v1566_v11 = vadd.f32 -1.0, %v793_v10 }
 0x1ef   :  { %1325 = vst.msk [vmem:[#allocation8 + $0x978] sm:$0xff] %vm1020_vm1, %v1608_v21 }
 0x1f0   :  { %1044 = vst [vmem:[#allocation8 + $0xc0] sm:$0xff] %v1553_v23 }
 0x1f1   :  { %1157 = vst [vmem:[#allocation8 + $0x280] sm:$0xff] %v1553_v23 }
 0x1f2   :  { %1270 = vst [vmem:[#allocation8 + $0x440] sm:$0xff] %v1553_v23  ;;  %v692_v8 = vpop.f32.mrf.mxu2  ;;  %v877_v12 = vpop.f32.mrf.mxu3 }
 0x1f3   :  { %1100 = vst [vmem:[#allocation8 + $0x600] sm:$0xff] %v1609_v25  ;;  %v1621_v9 = vadd.f32 -1.0, %v692_v8  ;;  %v1622_v13 = vadd.f32 -1.0, %v877_v12 }
 0x1f4   :  { %1213 = vst [vmem:[#allocation8 + $0x7c0] sm:$0xff] %v1609_v25 }
 0x1f5   :  { %1326 = vst [vmem:[#allocation8 + $0x980] sm:$0xff] %v1609_v25  ;;  %v611_v14 = vpop.f32.mrf.mxu0  ;;  %v796_v18 = vpop.f32.mrf.mxu1 }
 0x1f6   :  { %1045 = vst.msk [vmem:[#allocation8 + $0xc8] sm:$0xff] %vm1020_vm1, %v1554_v27  ;;  %v1567_v15 = vadd.f32 -1.0, %v611_v14  ;;  %v1568_v19 = vadd.f32 -1.0, %v796_v18 }
 0x1f7   :  { %1158 = vst.msk [vmem:[#allocation8 + $0x288] sm:$0xff] %vm1020_vm1, %v1554_v27 }
 0x1f8   :  { %1271 = vst.msk [vmem:[#allocation8 + $0x448] sm:$0xff] %vm1020_vm1, %v1554_v27 }
 0x1f9   :  { %1101 = vst.msk [vmem:[#allocation8 + $0x608] sm:$0xff] %vm1020_vm1, %v1610_v34 }
 0x1fa   :  { %1214 = vst.msk [vmem:[#allocation8 + $0x7c8] sm:$0xff] %vm1020_vm1, %v1610_v34  ;;  %v695_v16 = vpop.f32.mrf.mxu2  ;;  %v880_v20 = vpop.f32.mrf.mxu3 }
 0x1fb   :  { %1327 = vst.msk [vmem:[#allocation8 + $0x988] sm:$0xff] %vm1020_vm1, %v1610_v34  ;;  %v1623_v17 = vadd.f32 -1.0, %v695_v16  ;;  %v1624_v21 = vadd.f32 -1.0, %v880_v20 }
 0x1fc   :  { %1046 = vst [vmem:[#allocation8 + $0xd0] sm:$0xff] %v1555_v36 }
 0x1fd   :  { %1159 = vst [vmem:[#allocation8 + $0x290] sm:$0xff] %v1555_v36  ;;  %v614_v22 = vpop.f32.mrf.mxu0  ;;  %v799_v26 = vpop.f32.mrf.mxu1 }
 0x1fe   :  { %1272 = vst [vmem:[#allocation8 + $0x450] sm:$0xff] %v1555_v36  ;;  %v1569_v23 = vadd.f32 -1.0, %v614_v22  ;;  %v1570_v27 = vadd.f32 -1.0, %v799_v26 }
 0x1ff   :  { %1102 = vst [vmem:[#allocation8 + $0x610] sm:$0xff] %v1611_v38 }
 0x200   :  { %1215 = vst [vmem:[#allocation8 + $0x7d0] sm:$0xff] %v1611_v38 }
 0x201   :  { %1328 = vst [vmem:[#allocation8 + $0x990] sm:$0xff] %v1611_v38 }
 0x202   :  { %1047 = vst.msk [vmem:[#allocation8 + $0xd8] sm:$0xff] %vm1020_vm1, %v1556_v40  ;;  %v698_v24 = vpop.f32.mrf.mxu2  ;;  %v883_v33 = vpop.f32.mrf.mxu3 }
 0x203   :  { %1160 = vst.msk [vmem:[#allocation8 + $0x298] sm:$0xff] %vm1020_vm1, %v1556_v40  ;;  %v1625_v25 = vadd.f32 -1.0, %v698_v24  ;;  %v1626_v34 = vadd.f32 -1.0, %v883_v33 }
 0x204   :  { %1273 = vst.msk [vmem:[#allocation8 + $0x458] sm:$0xff] %vm1020_vm1, %v1556_v40 }
 0x205   :  { %1103 = vst.msk [vmem:[#allocation8 + $0x618] sm:$0xff] %vm1020_vm1, %v1612_v42  ;;  %v617_v35 = vpop.f32.mrf.mxu0  ;;  %v802_v39 = vpop.f32.mrf.mxu1 }
 0x206   :  { %1216 = vst.msk [vmem:[#allocation8 + $0x7d8] sm:$0xff] %vm1020_vm1, %v1612_v42  ;;  %v1571_v36 = vadd.f32 -1.0, %v617_v35  ;;  %v1572_v40 = vadd.f32 -1.0, %v802_v39 }
 0x207   :  { %1329 = vst.msk [vmem:[#allocation8 + $0x998] sm:$0xff] %vm1020_vm1, %v1612_v42 }
 0x208   :  { %1048 = vst [vmem:[#allocation8 + $0xe0] sm:$0xff] %v1557_v44 }
 0x209   :  { %1161 = vst [vmem:[#allocation8 + $0x2a0] sm:$0xff] %v1557_v44 }
 0x20a   :  { %1274 = vst [vmem:[#allocation8 + $0x460] sm:$0xff] %v1557_v44  ;;  %v701_v37 = vpop.f32.mrf.mxu2  ;;  %v886_v41 = vpop.f32.mrf.mxu3 }
 0x20b   :  { %1104 = vst [vmem:[#allocation8 + $0x620] sm:$0xff] %v1613_v46  ;;  %v1627_v38 = vadd.f32 -1.0, %v701_v37  ;;  %v1628_v42 = vadd.f32 -1.0, %v886_v41 }
 0x20c   :  { %1217 = vst [vmem:[#allocation8 + $0x7e0] sm:$0xff] %v1613_v46 }
 0x20d   :  { %1330 = vst [vmem:[#allocation8 + $0x9a0] sm:$0xff] %v1613_v46  ;;  %v620_v43 = vpop.f32.mrf.mxu0  ;;  %v805_v47 = vpop.f32.mrf.mxu1 }
 0x20e   :  { %1049 = vst.msk [vmem:[#allocation8 + $0xe8] sm:$0xff] %vm1020_vm1, %v1558_v48  ;;  %v1573_v44 = vadd.f32 -1.0, %v620_v43 }
 0x20f   :  { %1162 = vst.msk [vmem:[#allocation8 + $0x2a8] sm:$0xff] %vm1020_vm1, %v1558_v48 }
 0x210   :  { %1275 = vst.msk [vmem:[#allocation8 + $0x468] sm:$0xff] %vm1020_vm1, %v1558_v48  ;;  %v1574_v48 = vadd.f32 -1.0, %v805_v47 }
 0x211   :  { %1105 = vst.msk [vmem:[#allocation8 + $0x628] sm:$0xff] %vm1020_vm1, %v1614_v50 }
 0x212   :  { %1218 = vst.msk [vmem:[#allocation8 + $0x7e8] sm:$0xff] %vm1020_vm1, %v1614_v50  ;;  %v704_v45 = vpop.f32.mrf.mxu2  ;;  %v889_v49 = vpop.f32.mrf.mxu3 }
 0x213   :  { %1331 = vst.msk [vmem:[#allocation8 + $0x9a8] sm:$0xff] %vm1020_vm1, %v1614_v50  ;;  %v1629_v46 = vadd.f32 -1.0, %v704_v45  ;;  %v1630_v50 = vadd.f32 -1.0, %v889_v49 }
 0x214   :  { %1050 = vst [vmem:[#allocation8 + $0xf0] sm:$0xff] %v1559_v52 }
 0x215   :  { %1163 = vst [vmem:[#allocation8 + $0x2b0] sm:$0xff] %v1559_v52  ;;  %v623_v51 = vpop.f32.mrf.mxu0  ;;  %v808_v55 = vpop.f32.mrf.mxu1 }
 0x216   :  { %1276 = vst [vmem:[#allocation8 + $0x470] sm:$0xff] %v1559_v52  ;;  %v1575_v52 = vadd.f32 -1.0, %v623_v51 }
 0x217   :  { %1106 = vst [vmem:[#allocation8 + $0x630] sm:$0xff] %v1615_v54 }
 0x218   :  { %1219 = vst [vmem:[#allocation8 + $0x7f0] sm:$0xff] %v1615_v54 }
 0x219   :  { %1332 = vst [vmem:[#allocation8 + $0x9b0] sm:$0xff] %v1615_v54 }
 0x21a   :  { %1051 = vst.msk [vmem:[#allocation8 + $0xf8] sm:$0xff] %vm1020_vm1, %v1560_v56  ;;  %v707_v53 = vpop.f32.mrf.mxu2  ;;  %v892_v57 = vpop.f32.mrf.mxu3 }
 0x21b   :  { %1164 = vst.msk [vmem:[#allocation8 + $0x2b8] sm:$0xff] %vm1020_vm1, %v1560_v56  ;;  %v1631_v54 = vadd.f32 -1.0, %v707_v53 }
 0x21c   :  { %1277 = vst.msk [vmem:[#allocation8 + $0x478] sm:$0xff] %vm1020_vm1, %v1560_v56  ;;  %v1576_v56 = vadd.f32 -1.0, %v808_v55 }
 0x21d   :  { %1107 = vst.msk [vmem:[#allocation8 + $0x638] sm:$0xff] %vm1020_vm1, %v1616_v58  ;;  %v626_v59 = vpop.f32.mrf.mxu0  ;;  %v811_v63 = vpop.f32.mrf.mxu1 }
 0x21e   :  { %1220 = vst.msk [vmem:[#allocation8 + $0x7f8] sm:$0xff] %vm1020_vm1, %v1616_v58 }
 0x21f   :  { %1333 = vst.msk [vmem:[#allocation8 + $0x9b8] sm:$0xff] %vm1020_vm1, %v1616_v58  ;;  %v1632_v58 = vadd.f32 -1.0, %v892_v57 }
 0x220   :  { %1052 = vst [vmem:[#allocation8 + $0x100] sm:$0xff] %v1561_v60 }
 0x221   :  { %1165 = vst [vmem:[#allocation8 + $0x2c0] sm:$0xff] %v1561_v60 }
 0x222   :  { %1278 = vst [vmem:[#allocation8 + $0x480] sm:$0xff] %v1561_v60  ;;  %v1577_v60 = vadd.f32 -1.0, %v626_v59  ;;  %v710_v61 = vpop.f32.mrf.mxu2  ;;  %v895_v29 = vpop.f32.mrf.mxu3 }
 0x223   :  { %1108 = vst [vmem:[#allocation8 + $0x640] sm:$0xff] %v1617_v62 }
 0x224   :  { %1221 = vst [vmem:[#allocation8 + $0x800] sm:$0xff] %v1617_v62 }
 0x225   :  { %1334 = vst [vmem:[#allocation8 + $0x9c0] sm:$0xff] %v1617_v62  ;;  %v1633_v62 = vadd.f32 -1.0, %v710_v61  ;;  %v629_v31 = vpop.f32.mrf.mxu0  ;;  %v814_v2 = vpop.f32.mrf.mxu1 }
 0x226   :  { %1053 = vst.msk [vmem:[#allocation8 + $0x108] sm:$0xff] %vm1020_vm1, %v1562_v28 }
 0x227   :  { %1166 = vst.msk [vmem:[#allocation8 + $0x2c8] sm:$0xff] %vm1020_vm1, %v1562_v28 }
 0x228   :  { %1279 = vst.msk [vmem:[#allocation8 + $0x488] sm:$0xff] %vm1020_vm1, %v1562_v28  ;;  %v1578_v28 = vadd.f32 -1.0, %v811_v63 }
 0x229   :  { %1109 = vst.msk [vmem:[#allocation8 + $0x648] sm:$0xff] %vm1020_vm1, %v1618_v30 }
 0x22a   :  { %1222 = vst.msk [vmem:[#allocation8 + $0x808] sm:$0xff] %vm1020_vm1, %v1618_v30  ;;  %v713_v0 = vpop.f32.mrf.mxu2  ;;  %v898_v4 = vpop.f32.mrf.mxu3 }
 0x22b   :  { %1335 = vst.msk [vmem:[#allocation8 + $0x9c8] sm:$0xff] %vm1020_vm1, %v1618_v30  ;;  %v1634_v30 = vadd.f32 -1.0, %v895_v29 }
 0x22c   :  { %1054 = vst [vmem:[#allocation8 + $0x110] sm:$0xff] %v1563_v32 }
 0x22d   :  { %1167 = vst [vmem:[#allocation8 + $0x2d0] sm:$0xff] %v1563_v32  ;;  %v632_v6 = vpop.f32.mrf.mxu0  ;;  %v817_v10 = vpop.f32.mrf.mxu1 }
 0x22e   :  { %1280 = vst [vmem:[#allocation8 + $0x490] sm:$0xff] %v1563_v32  ;;  %v1579_v32 = vadd.f32 -1.0, %v629_v31 }
 0x22f   :  { %1110 = vst [vmem:[#allocation8 + $0x650] sm:$0xff] %v1619_v1 }
 0x230   :  { %1223 = vst [vmem:[#allocation8 + $0x810] sm:$0xff] %v1619_v1 }
 0x231   :  { %1336 = vst [vmem:[#allocation8 + $0x9d0] sm:$0xff] %v1619_v1  ;;  %v1635_v1 = vadd.f32 -1.0, %v713_v0 }
 0x232   :  { %1055 = vst.msk [vmem:[#allocation8 + $0x118] sm:$0xff] %vm1020_vm1, %v1564_v3  ;;  %v716_v8 = vpop.f32.mrf.mxu2  ;;  %v901_v12 = vpop.f32.mrf.mxu3 }
 0x233   :  { %1168 = vst.msk [vmem:[#allocation8 + $0x2d8] sm:$0xff] %vm1020_vm1, %v1564_v3 }
 0x234   :  { %1281 = vst.msk [vmem:[#allocation8 + $0x498] sm:$0xff] %vm1020_vm1, %v1564_v3  ;;  %v1580_v3 = vadd.f32 -1.0, %v814_v2 }
 0x235   :  { %1111 = vst.msk [vmem:[#allocation8 + $0x658] sm:$0xff] %vm1020_vm1, %v1620_v5  ;;  %v635_v14 = vpop.f32.mrf.mxu0  ;;  %v820_v18 = vpop.f32.mrf.mxu1 }
 0x236   :  { %1224 = vst.msk [vmem:[#allocation8 + $0x818] sm:$0xff] %vm1020_vm1, %v1620_v5 }
 0x237   :  { %1337 = vst.msk [vmem:[#allocation8 + $0x9d8] sm:$0xff] %vm1020_vm1, %v1620_v5  ;;  %v1636_v5 = vadd.f32 -1.0, %v898_v4 }
 0x238   :  { %1056 = vst [vmem:[#allocation8 + $0x120] sm:$0xff] %v1565_v7 }
 0x239   :  { %1169 = vst [vmem:[#allocation8 + $0x2e0] sm:$0xff] %v1565_v7 }
 0x23a   :  { %1282 = vst [vmem:[#allocation8 + $0x4a0] sm:$0xff] %v1565_v7  ;;  %v1581_v7 = vadd.f32 -1.0, %v632_v6  ;;  %v719_v16 = vpop.f32.mrf.mxu2  ;;  %v904_v20 = vpop.f32.mrf.mxu3 }
 0x23b   :  { %1112 = vst [vmem:[#allocation8 + $0x660] sm:$0xff] %v1621_v9 }
 0x23c   :  { %1225 = vst [vmem:[#allocation8 + $0x820] sm:$0xff] %v1621_v9 }
 0x23d   :  { %1338 = vst [vmem:[#allocation8 + $0x9e0] sm:$0xff] %v1621_v9  ;;  %v1637_v9 = vadd.f32 -1.0, %v716_v8 }
 0x23e   :  { %1057 = vst.msk [vmem:[#allocation8 + $0x128] sm:$0xff] %vm1020_vm1, %v1566_v11 }
 0x23f   :  { %1170 = vst.msk [vmem:[#allocation8 + $0x2e8] sm:$0xff] %vm1020_vm1, %v1566_v11 }
 0x240   :  { %1283 = vst.msk [vmem:[#allocation8 + $0x4a8] sm:$0xff] %vm1020_vm1, %v1566_v11  ;;  %v1582_v11 = vadd.f32 -1.0, %v817_v10 }
 0x241   :  { %1113 = vst.msk [vmem:[#allocation8 + $0x668] sm:$0xff] %vm1020_vm1, %v1622_v13 }
 0x242   :  { %1226 = vst.msk [vmem:[#allocation8 + $0x828] sm:$0xff] %vm1020_vm1, %v1622_v13 }
 0x243   :  { %1339 = vst.msk [vmem:[#allocation8 + $0x9e8] sm:$0xff] %vm1020_vm1, %v1622_v13  ;;  %v1638_v13 = vadd.f32 -1.0, %v901_v12 }
 0x244   :  { %1058 = vst [vmem:[#allocation8 + $0x130] sm:$0xff] %v1567_v15 }
 0x245   :  { %1171 = vst [vmem:[#allocation8 + $0x2f0] sm:$0xff] %v1567_v15 }
 0x246   :  { %1284 = vst [vmem:[#allocation8 + $0x4b0] sm:$0xff] %v1567_v15  ;;  %v1583_v15 = vadd.f32 -1.0, %v635_v14 }
 0x247   :  { %1114 = vst [vmem:[#allocation8 + $0x670] sm:$0xff] %v1623_v17 }
 0x248   :  { %1227 = vst [vmem:[#allocation8 + $0x830] sm:$0xff] %v1623_v17 }
 0x249   :  { %1340 = vst [vmem:[#allocation8 + $0x9f0] sm:$0xff] %v1623_v17  ;;  %v1639_v17 = vadd.f32 -1.0, %v719_v16 }
 0x24a   :  { %1059 = vst.msk [vmem:[#allocation8 + $0x138] sm:$0xff] %vm1020_vm1, %v1568_v19 }
 0x24b   :  { %1172 = vst.msk [vmem:[#allocation8 + $0x2f8] sm:$0xff] %vm1020_vm1, %v1568_v19 }
 0x24c   :  { %1285 = vst.msk [vmem:[#allocation8 + $0x4b8] sm:$0xff] %vm1020_vm1, %v1568_v19  ;;  %v1584_v19 = vadd.f32 -1.0, %v820_v18 }
 0x24d   :  { %1115 = vst.msk [vmem:[#allocation8 + $0x678] sm:$0xff] %vm1020_vm1, %v1624_v21 }
 0x24e   :  { %1228 = vst.msk [vmem:[#allocation8 + $0x838] sm:$0xff] %vm1020_vm1, %v1624_v21 }
 0x24f   :  { %1341 = vst.msk [vmem:[#allocation8 + $0x9f8] sm:$0xff] %vm1020_vm1, %v1624_v21  ;;  %v1640_v21 = vadd.f32 -1.0, %v904_v20 }
 0x250   :  { %1060 = vst [vmem:[#allocation8 + $0x140] sm:$0xff] %v1569_v23 }
 0x251   :  { %1173 = vst [vmem:[#allocation8 + $0x300] sm:$0xff] %v1569_v23 }
 0x252   :  { %1286 = vst [vmem:[#allocation8 + $0x4c0] sm:$0xff] %v1569_v23 }
 0x253   :  { %1116 = vst [vmem:[#allocation8 + $0x680] sm:$0xff] %v1625_v25 }
 0x254   :  { %1229 = vst [vmem:[#allocation8 + $0x840] sm:$0xff] %v1625_v25 }
 0x255   :  { %1342 = vst [vmem:[#allocation8 + $0xa00] sm:$0xff] %v1625_v25 }
 0x256   :  { %1061 = vst.msk [vmem:[#allocation8 + $0x148] sm:$0xff] %vm1020_vm1, %v1570_v27 }
 0x257   :  { %1174 = vst.msk [vmem:[#allocation8 + $0x308] sm:$0xff] %vm1020_vm1, %v1570_v27 }
 0x258   :  { %1287 = vst.msk [vmem:[#allocation8 + $0x4c8] sm:$0xff] %vm1020_vm1, %v1570_v27 }
 0x259   :  { %1117 = vst.msk [vmem:[#allocation8 + $0x688] sm:$0xff] %vm1020_vm1, %v1626_v34 }
 0x25a   :  { %1230 = vst.msk [vmem:[#allocation8 + $0x848] sm:$0xff] %vm1020_vm1, %v1626_v34 }
 0x25b   :  { %1343 = vst.msk [vmem:[#allocation8 + $0xa08] sm:$0xff] %vm1020_vm1, %v1626_v34 }
 0x25c   :  { %1062 = vst [vmem:[#allocation8 + $0x150] sm:$0xff] %v1571_v36 }
 0x25d   :  { %1175 = vst [vmem:[#allocation8 + $0x310] sm:$0xff] %v1571_v36 }
 0x25e   :  { %1288 = vst [vmem:[#allocation8 + $0x4d0] sm:$0xff] %v1571_v36 }
 0x25f   :  { %1118 = vst [vmem:[#allocation8 + $0x690] sm:$0xff] %v1627_v38 }
 0x260   :  { %1231 = vst [vmem:[#allocation8 + $0x850] sm:$0xff] %v1627_v38 }
 0x261   :  { %1344 = vst [vmem:[#allocation8 + $0xa10] sm:$0xff] %v1627_v38 }
 0x262   :  { %1063 = vst.msk [vmem:[#allocation8 + $0x158] sm:$0xff] %vm1020_vm1, %v1572_v40 }
 0x263   :  { %1176 = vst.msk [vmem:[#allocation8 + $0x318] sm:$0xff] %vm1020_vm1, %v1572_v40 }
 0x264   :  { %1289 = vst.msk [vmem:[#allocation8 + $0x4d8] sm:$0xff] %vm1020_vm1, %v1572_v40 }
 0x265   :  { %1119 = vst.msk [vmem:[#allocation8 + $0x698] sm:$0xff] %vm1020_vm1, %v1628_v42 }
 0x266   :  { %1232 = vst.msk [vmem:[#allocation8 + $0x858] sm:$0xff] %vm1020_vm1, %v1628_v42 }
 0x267   :  { %1345 = vst.msk [vmem:[#allocation8 + $0xa18] sm:$0xff] %vm1020_vm1, %v1628_v42 }
 0x268   :  { %1064 = vst [vmem:[#allocation8 + $0x160] sm:$0xff] %v1573_v44 }
 0x269   :  { %1177 = vst [vmem:[#allocation8 + $0x320] sm:$0xff] %v1573_v44 }
 0x26a   :  { %1290 = vst [vmem:[#allocation8 + $0x4e0] sm:$0xff] %v1573_v44 }
 0x26b   :  { %1120 = vst [vmem:[#allocation8 + $0x6a0] sm:$0xff] %v1629_v46 }
 0x26c   :  { %1233 = vst [vmem:[#allocation8 + $0x860] sm:$0xff] %v1629_v46 }
 0x26d   :  { %1346 = vst [vmem:[#allocation8 + $0xa20] sm:$0xff] %v1629_v46 }
 0x26e   :  { %1065 = vst.msk [vmem:[#allocation8 + $0x168] sm:$0xff] %vm1020_vm1, %v1574_v48 }
 0x26f   :  { %1178 = vst.msk [vmem:[#allocation8 + $0x328] sm:$0xff] %vm1020_vm1, %v1574_v48 }
 0x270   :  { %1291 = vst.msk [vmem:[#allocation8 + $0x4e8] sm:$0xff] %vm1020_vm1, %v1574_v48 }
 0x271   :  { %1121 = vst.msk [vmem:[#allocation8 + $0x6a8] sm:$0xff] %vm1020_vm1, %v1630_v50 }
 0x272   :  { %1234 = vst.msk [vmem:[#allocation8 + $0x868] sm:$0xff] %vm1020_vm1, %v1630_v50 }
 0x273   :  { %1347 = vst.msk [vmem:[#allocation8 + $0xa28] sm:$0xff] %vm1020_vm1, %v1630_v50 }
 0x274   :  { %1066 = vst [vmem:[#allocation8 + $0x170] sm:$0xff] %v1575_v52 }
 0x275   :  { %1179 = vst [vmem:[#allocation8 + $0x330] sm:$0xff] %v1575_v52 }
 0x276   :  { %1292 = vst [vmem:[#allocation8 + $0x4f0] sm:$0xff] %v1575_v52 }
 0x277   :  { %1122 = vst [vmem:[#allocation8 + $0x6b0] sm:$0xff] %v1631_v54 }
 0x278   :  { %1235 = vst [vmem:[#allocation8 + $0x870] sm:$0xff] %v1631_v54 }
 0x279   :  { %1348 = vst [vmem:[#allocation8 + $0xa30] sm:$0xff] %v1631_v54 }
 0x27a   :  { %1067 = vst.msk [vmem:[#allocation8 + $0x178] sm:$0xff] %vm1020_vm1, %v1576_v56 }
 0x27b   :  { %1180 = vst.msk [vmem:[#allocation8 + $0x338] sm:$0xff] %vm1020_vm1, %v1576_v56 }
 0x27c   :  { %1293 = vst.msk [vmem:[#allocation8 + $0x4f8] sm:$0xff] %vm1020_vm1, %v1576_v56 }
 0x27d   :  { %1123 = vst.msk [vmem:[#allocation8 + $0x6b8] sm:$0xff] %vm1020_vm1, %v1632_v58 }
 0x27e   :  { %1236 = vst.msk [vmem:[#allocation8 + $0x878] sm:$0xff] %vm1020_vm1, %v1632_v58 }
 0x27f   :  { %1349 = vst.msk [vmem:[#allocation8 + $0xa38] sm:$0xff] %vm1020_vm1, %v1632_v58 }
 0x280   :  { %1068 = vst [vmem:[#allocation8 + $0x180] sm:$0xff] %v1577_v60 }
 0x281   :  { %1181 = vst [vmem:[#allocation8 + $0x340] sm:$0xff] %v1577_v60 }
 0x282   :  { %1294 = vst [vmem:[#allocation8 + $0x500] sm:$0xff] %v1577_v60 }
 0x283   :  { %1124 = vst [vmem:[#allocation8 + $0x6c0] sm:$0xff] %v1633_v62 }
 0x284   :  { %1237 = vst [vmem:[#allocation8 + $0x880] sm:$0xff] %v1633_v62 }
 0x285   :  { %1350 = vst [vmem:[#allocation8 + $0xa40] sm:$0xff] %v1633_v62 }
 0x286   :  { %1069 = vst.msk [vmem:[#allocation8 + $0x188] sm:$0xff] %vm1020_vm1, %v1578_v28 }
 0x287   :  { %1182 = vst.msk [vmem:[#allocation8 + $0x348] sm:$0xff] %vm1020_vm1, %v1578_v28 }
 0x288   :  { %1295 = vst.msk [vmem:[#allocation8 + $0x508] sm:$0xff] %vm1020_vm1, %v1578_v28 }
 0x289   :  { %1125 = vst.msk [vmem:[#allocation8 + $0x6c8] sm:$0xff] %vm1020_vm1, %v1634_v30 }
 0x28a   :  { %1238 = vst.msk [vmem:[#allocation8 + $0x888] sm:$0xff] %vm1020_vm1, %v1634_v30 }
 0x28b   :  { %1351 = vst.msk [vmem:[#allocation8 + $0xa48] sm:$0xff] %vm1020_vm1, %v1634_v30 }
 0x28c   :  { %1070 = vst [vmem:[#allocation8 + $0x190] sm:$0xff] %v1579_v32 }
 0x28d   :  { %1183 = vst [vmem:[#allocation8 + $0x350] sm:$0xff] %v1579_v32 }
 0x28e   :  { %1296 = vst [vmem:[#allocation8 + $0x510] sm:$0xff] %v1579_v32 }
 0x28f   :  { %1126 = vst [vmem:[#allocation8 + $0x6d0] sm:$0xff] %v1635_v1 }
 0x290   :  { %1239 = vst [vmem:[#allocation8 + $0x890] sm:$0xff] %v1635_v1 }
 0x291   :  { %1352 = vst [vmem:[#allocation8 + $0xa50] sm:$0xff] %v1635_v1 }
 0x292   :  { %1071 = vst.msk [vmem:[#allocation8 + $0x198] sm:$0xff] %vm1020_vm1, %v1580_v3 }
 0x293   :  { %1184 = vst.msk [vmem:[#allocation8 + $0x358] sm:$0xff] %vm1020_vm1, %v1580_v3 }
 0x294   :  { %1297 = vst.msk [vmem:[#allocation8 + $0x518] sm:$0xff] %vm1020_vm1, %v1580_v3 }
 0x295   :  { %1127 = vst.msk [vmem:[#allocation8 + $0x6d8] sm:$0xff] %vm1020_vm1, %v1636_v5 }
 0x296   :  { %1240 = vst.msk [vmem:[#allocation8 + $0x898] sm:$0xff] %vm1020_vm1, %v1636_v5 }
 0x297   :  { %1353 = vst.msk [vmem:[#allocation8 + $0xa58] sm:$0xff] %vm1020_vm1, %v1636_v5 }
 0x298   :  { %1072 = vst [vmem:[#allocation8 + $0x1a0] sm:$0xff] %v1581_v7 }
 0x299   :  { %1185 = vst [vmem:[#allocation8 + $0x360] sm:$0xff] %v1581_v7 }
 0x29a   :  { %1298 = vst [vmem:[#allocation8 + $0x520] sm:$0xff] %v1581_v7 }
 0x29b   :  { %1128 = vst [vmem:[#allocation8 + $0x6e0] sm:$0xff] %v1637_v9 }
 0x29c   :  { %1241 = vst [vmem:[#allocation8 + $0x8a0] sm:$0xff] %v1637_v9 }
 0x29d   :  { %1354 = vst [vmem:[#allocation8 + $0xa60] sm:$0xff] %v1637_v9 }
 0x29e   :  { %1073 = vst.msk [vmem:[#allocation8 + $0x1a8] sm:$0xff] %vm1020_vm1, %v1582_v11 }
 0x29f   :  { %1186 = vst.msk [vmem:[#allocation8 + $0x368] sm:$0xff] %vm1020_vm1, %v1582_v11 }
 0x2a0   :  { %1299 = vst.msk [vmem:[#allocation8 + $0x528] sm:$0xff] %vm1020_vm1, %v1582_v11 }
 0x2a1   :  { %1129 = vst.msk [vmem:[#allocation8 + $0x6e8] sm:$0xff] %vm1020_vm1, %v1638_v13 }
 0x2a2   :  { %1242 = vst.msk [vmem:[#allocation8 + $0x8a8] sm:$0xff] %vm1020_vm1, %v1638_v13 }
 0x2a3   :  { %1355 = vst.msk [vmem:[#allocation8 + $0xa68] sm:$0xff] %vm1020_vm1, %v1638_v13 }
 0x2a4   :  { %1074 = vst [vmem:[#allocation8 + $0x1b0] sm:$0xff] %v1583_v15 }
 0x2a5   :  { %1187 = vst [vmem:[#allocation8 + $0x370] sm:$0xff] %v1583_v15 }
 0x2a6   :  { %1300 = vst [vmem:[#allocation8 + $0x530] sm:$0xff] %v1583_v15 }
 0x2a7   :  { %1130 = vst [vmem:[#allocation8 + $0x6f0] sm:$0xff] %v1639_v17 }
 0x2a8   :  { %1243 = vst [vmem:[#allocation8 + $0x8b0] sm:$0xff] %v1639_v17 }
 0x2a9   :  { %1356 = vst [vmem:[#allocation8 + $0xa70] sm:$0xff] %v1639_v17 }
 0x2aa   :  { %1075 = vst.msk [vmem:[#allocation8 + $0x1b8] sm:$0xff] %vm1020_vm1, %v1584_v19 }
 0x2ab   :  { %1188 = vst.msk [vmem:[#allocation8 + $0x378] sm:$0xff] %vm1020_vm1, %v1584_v19 }
 0x2ac   :  { %1301 = vst.msk [vmem:[#allocation8 + $0x538] sm:$0xff] %vm1020_vm1, %v1584_v19 }
 0x2ad   :  { %1131 = vst.msk [vmem:[#allocation8 + $0x6f8] sm:$0xff] %vm1020_vm1, %v1640_v21 }
 0x2ae   :  { %1244 = vst.msk [vmem:[#allocation8 + $0x8b8] sm:$0xff] %vm1020_vm1, %v1640_v21 }
 0x2af   :  { %1357 = vst.msk [vmem:[#allocation8 + $0xa78] sm:$0xff] %vm1020_vm1, %v1640_v21 }
 0x2b0   :  { %1370 = dma.vmem_to_hbm [thread:$0]  %s1363_s4, 43008, %s1365_s7, [#allocation5], %s1761_s24, %s1761_s24, %s1762_s25  }
 0x2b1   :  { %1751 = dma.done.wait [#allocation5], 43008  }
 0x2b2   :  { %1752 = vsyncadd [#allocation5], 4294924288 }
 0x2b3   :  { %1375 = vsyncpa [#allocation4], 1 }
 0x2b4   :  { %1376 = vsyncpa [#allocation7], 1 }
 0x2b5   :  { %1377 = vsyncpa [#allocation5], 1 }

</bundles_post_ra>
